<compile_context>
chip_gen: v6e
topology: v6e:2x2x1
jax: 0.10.0
libtpu: 0.0.40
codegen_flags: <defaults>
</compile_context>

<pallas_src>
import math
import functools

import jax
import jax.numpy as jnp
from jax.experimental import pallas as pl
from jax.experimental.pallas import tpu as pltpu


# ----------------------------- helpers -------------------------------------

_VMEM_LIMIT = 48 * 1024 * 1024  # above 16/32 MiB defaults, headroom on v7x's 64 MiB


def _cparams(semantics):
    return pltpu.CompilerParams(dimension_semantics=semantics,
                                vmem_limit_bytes=_VMEM_LIMIT)


def _round_up(x, m):
    return (x + m - 1) // m * m


def _pad2(a, rows, cols):
    r, c = a.shape
    if r == rows and c == cols:
        return a
    return jnp.pad(a, ((0, rows - r), (0, cols - c)))


def _layer_norm(z, g, b):
    # z: (rows, H) f32; g/b: (1, H) f32.  eps matches torch.nn.LayerNorm.
    mean = jnp.mean(z, axis=-1, keepdims=True)
    var = jnp.mean(jnp.square(z - mean), axis=-1, keepdims=True)
    return (z - mean) * jax.lax.rsqrt(var + 1e-5) * g + b


# ------------------------- K-tiled projection matmul ------------------------

def _matmul_kernel(x_ref, w_ref, o_ref, acc_ref):
    k = pl.program_id(2)

    @pl.when(k == 0)
    def _():
        acc_ref[...] = jnp.zeros_like(acc_ref)

    acc_ref[...] += jnp.dot(x_ref[...], w_ref[...],
                            preferred_element_type=jnp.float32)

    @pl.when(k == pl.num_programs(2) - 1)
    def _():
        o_ref[...] = acc_ref[...].astype(o_ref.dtype)


def matmul(x, w, out_dtype=jnp.bfloat16, tm=256, tn=256, tk=256):
    """x @ w. bf16 MXU operands, f32 accumulation, (M, N, K) tiled grid."""
    M, K = x.shape
    N = w.shape[1]
    tm = min(tm, _round_up(M, 8))
    tn = min(tn, _round_up(N, 128))
    tk = min(tk, _round_up(K, 128))
    Mp, Np, Kp = _round_up(M, tm), _round_up(N, tn), _round_up(K, tk)
    xp = _pad2(x.astype(jnp.bfloat16), Mp, Kp)   # zero padding is exact for matmul
    wp = _pad2(w.astype(jnp.bfloat16), Kp, Np)
    out = pl.pallas_call(
        _matmul_kernel,
        out_shape=jax.ShapeDtypeStruct((Mp, Np), out_dtype),
        grid=(Mp // tm, Np // tn, Kp // tk),
        in_specs=[pl.BlockSpec((tm, tk), lambda i, j, k: (i, k)),
                  pl.BlockSpec((tk, tn), lambda i, j, k: (k, j))],
        out_specs=pl.BlockSpec((tm, tn), lambda i, j, k: (i, j)),
        scratch_shapes=[pltpu.VMEM((tm, tn), jnp.float32)],
        compiler_params=_cparams(("parallel", "parallel", "arbitrary")),
    )(xp, wp)
    return out[:M, :N] if (Mp != M or Np != N) else out


# --------------------- final vocab projection (with bias) -------------------

def _dense_kernel(x_ref, w_ref, b_ref, o_ref):
    y = jnp.dot(x_ref[...], w_ref[...],
                preferred_element_type=jnp.float32) + b_ref[...]
    o_ref[...] = y.astype(o_ref.dtype)


def dense(x, w, b, tm=256, tn=512):
    # vocab padded to a multiple of 128 for lane-dense stores; tiled over (M, N).
    # TODO(synk): add K (hidden) tiling when H grows past a few thousand.
    M, K = x.shape
    N = w.shape[1]
    tm = min(tm, _round_up(M, 8))
    tn = min(tn, _round_up(N, 128))
    Mp, Np = _round_up(M, tm), _round_up(N, tn)
    xp = _pad2(x.astype(jnp.bfloat16), Mp, K)
    wp = _pad2(w.astype(jnp.bfloat16), K, Np)
    bp = _pad2(b.reshape(1, N).astype(jnp.float32), 1, Np)
    out = pl.pallas_call(
        _dense_kernel,
        out_shape=jax.ShapeDtypeStruct((Mp, Np), jnp.float32),
        grid=(Mp // tm, Np // tn),
        in_specs=[pl.BlockSpec((tm, K), lambda i, j: (i, 0)),
                  pl.BlockSpec((K, tn), lambda i, j: (0, j)),
                  pl.BlockSpec((1, tn), lambda i, j: (0, j))],
        out_specs=pl.BlockSpec((tm, tn), lambda i, j: (i, j)),
        compiler_params=_cparams(("parallel", "parallel")),
    )(xp, wp, bp)
    return out[:M, :N] if (Mp != M or Np != N) else out


# ------------- fused FFN (F-tiled reduction) + residual + LayerNorm ---------

def _ffn_addnorm_kernel(x_ref, w1_ref, b1_ref, w2_ref, b2_ref, g_ref, beta_ref,
                        o_ref, acc_ref):
    f = pl.program_id(1)

    @pl.when(f == 0)
    def _():
        acc_ref[...] = jnp.zeros_like(acc_ref)

    h = jnp.dot(x_ref[...], w1_ref[...],
                preferred_element_type=jnp.float32) + b1_ref[...]
    h = jnp.maximum(h, 0.0).astype(x_ref.dtype)          # relu; bf16 for 2nd MXU pass
    acc_ref[...] += jnp.dot(h, w2_ref[...], preferred_element_type=jnp.float32)

    @pl.when(f == pl.num_programs(1) - 1)
    def _():
        z = x_ref[...].astype(jnp.float32) + acc_ref[...] + b2_ref[...]
        o_ref[...] = _layer_norm(z, g_ref[...], beta_ref[...]).astype(o_ref.dtype)


def ffn_add_norm(X, w1, b1, w2, b2, gamma, beta, tm=256, tf=512):
    B, S, H = X.shape
    M = B * S
    F = w1.shape[1]
    tm = min(tm, _round_up(M, 8))
    tf = min(tf, _round_up(F, 128))
    Mp, Fp = _round_up(M, tm), _round_up(F, tf)
    xp = _pad2(X.reshape(M, H).astype(jnp.bfloat16), Mp, H)
    w1p = _pad2(w1.astype(jnp.bfloat16), H, Fp)          # zero cols -> relu(0)=0
    b1p = _pad2(b1.reshape(1, F).astype(jnp.float32), 1, Fp)
    w2p = _pad2(w2.astype(jnp.bfloat16), Fp, H)
    # TODO(synk): single-buffer the grid-invariant b2/gamma/beta specs
    # (pipeline_mode=pl.Buffered(1)) to shave VMEM on v7x.
    out = pl.pallas_call(
        _ffn_addnorm_kernel,
        out_shape=jax.ShapeDtypeStruct((Mp, H), jnp.bfloat16),
        grid=(Mp // tm, Fp // tf),
        in_specs=[pl.BlockSpec((tm, H), lambda i, f: (i, 0)),
                  pl.BlockSpec((H, tf), lambda i, f: (0, f)),
                  pl.BlockSpec((1, tf), lambda i, f: (0, f)),
                  pl.BlockSpec((tf, H), lambda i, f: (f, 0)),
                  pl.BlockSpec((1, H), lambda i, f: (0, 0)),
                  pl.BlockSpec((1, H), lambda i, f: (0, 0)),
                  pl.BlockSpec((1, H), lambda i, f: (0, 0))],
        out_specs=pl.BlockSpec((tm, H), lambda i, f: (i, 0)),
        scratch_shapes=[pltpu.VMEM((tm, H), jnp.float32)],
        compiler_params=_cparams(("parallel", "arbitrary")),
    )(xp, w1p, b1p, w2p, b2.reshape(1, H).astype(jnp.float32),
      gamma.reshape(1, H).astype(jnp.float32), beta.reshape(1, H).astype(jnp.float32))
    out = out[:M] if Mp != M else out
    return out.reshape(B, S, H)


# -------- fused MHA: head split + masked softmax + W_o + Add & LayerNorm ----

def _attn_addnorm_kernel(vl_ref, qsrc_ref, kvsrc_ref, x_ref, wo_ref, g_ref,
                         beta_ref, o_ref, *, num_heads, causal, scale):
    b = pl.program_id(0)
    qi = pl.program_id(1)
    x = x_ref[0]                               # (tq, H) bf16 residual
    tq, H = x.shape
    dh = H // num_heads
    Sk = kvsrc_ref.shape[1]

    q_all = qsrc_ref[0][:, -H:]                # Q cols (self: [K|V|Q] layout; cross: all)
    kv = kvsrc_ref[0]
    k_all = kv[:, :H]
    v_all = kv[:, H:2 * H]

    # mask shared across heads; f32 math throughout the softmax
    col = jax.lax.broadcasted_iota(jnp.int32, (tq, Sk), 1)
    if causal:
        # training-mode dec_valid_lens = arange(1, Sq+1)  <=>  keep col <= row
        row = jax.lax.broadcasted_iota(jnp.int32, (tq, Sk), 0) + qi * tq
        keep = col <= row
    else:
        keep = col < vl_ref[b]

    dn = (((1,), (1,)), ((), ()))              # contract last dims, no transposes
    head_outs = []
    # TODO(synk): batch heads into one einsum / head grid axis at real head counts,
    # and stream Sk with an online-softmax accumulator for long sequences.
    for h in range(num_heads):
        qh = q_all[:, h * dh:(h + 1) * dh]
        kh = k_all[:, h * dh:(h + 1) * dh]
        vh = v_all[:, h * dh:(h + 1) * dh]
        s = jax.lax.dot_general(qh, kh, dn,
                                preferred_element_type=jnp.float32) * scale
        s = jnp.where(keep, s, -1e6)           # same fill value as d2l masked_softmax
        m = jnp.max(s, axis=-1, keepdims=True)
        p = jnp.exp(s - m)
        denom = jnp.sum(p, axis=-1, keepdims=True)
        p = (p * pl.reciprocal(denom, approx=True)).astype(vh.dtype)
        head_outs.append(jnp.dot(p, vh, preferred_element_type=jnp.float32))

    o = jnp.concatenate(head_outs, axis=-1).astype(wo_ref.dtype)   # (tq, H) bf16
    y = jnp.dot(o, wo_ref[...], preferred_element_type=jnp.float32)
    z = x.astype(jnp.float32) + y
    o_ref[0] = _layer_norm(z, g_ref[...], beta_ref[...]).astype(o_ref.dtype)


def attn_add_norm(q_src, kv_src, x_res, w_o, gamma, beta, valid_lens, num_heads,
                  *, causal):
    """LayerNorm(x + MHA(q_src, kv_src) @ W_o), all in one kernel.

    q_src: (B, Sq, *) where the last H columns are the Q projection.
    kv_src: (B, Sk, >=2H) where cols [:H] are K and [H:2H] are V.
    """
    B, Sq, H = x_res.shape
    Sk = kv_src.shape[1]
    dh = H // num_heads
    tq = 256 if (Sq > 256 and Sq % 256 == 0) else Sq
    if valid_lens is None:
        vl = jnp.full((B,), Sk, jnp.int32)     # keep all keys (fixes latent mask-all bug)
    else:
        vl = valid_lens.astype(jnp.int32)
    Wq = q_src.shape[2]
    Wkv = kv_src.shape[2]
    grid_spec = pltpu.PrefetchScalarGridSpec(
        num_scalar_prefetch=1,
        grid=(B, Sq // tq),
        in_specs=[
            pl.BlockSpec((1, tq, Wq), lambda b, qi, vl: (b, qi, 0)),
            pl.BlockSpec((1, Sk, Wkv), lambda b, qi, vl: (b, 0, 0)),
            pl.BlockSpec((1, tq, H), lambda b, qi, vl: (b, qi, 0)),
            pl.BlockSpec((H, H), lambda b, qi, vl: (0, 0)),
            pl.BlockSpec((1, H), lambda b, qi, vl: (0, 0)),
            pl.BlockSpec((1, H), lambda b, qi, vl: (0, 0)),
        ],
        out_specs=pl.BlockSpec((1, tq, H), lambda b, qi, vl: (b, qi, 0)),
    )
    return pl.pallas_call(
        functools.partial(_attn_addnorm_kernel, num_heads=num_heads,
                          causal=causal, scale=1.0 / math.sqrt(dh)),
        out_shape=jax.ShapeDtypeStruct((B, Sq, H), jnp.bfloat16),
        grid_spec=grid_spec,
        compiler_params=_cparams(("parallel", "parallel")),
    )(vl, q_src, kv_src, x_res,
      w_o.astype(jnp.bfloat16),
      gamma.reshape(1, H).astype(jnp.float32),
      beta.reshape(1, H).astype(jnp.float32))


# ------------------------------ model glue ----------------------------------

def positional_encoding(seq_len, num_hiddens):
    pos = jnp.arange(seq_len, dtype=jnp.float32)[:, None]
    div = jnp.power(10000.0, jnp.arange(0, num_hiddens, 2,
                                        dtype=jnp.float32) / num_hiddens)
    angles = pos / div
    P = jnp.zeros((seq_len, num_hiddens), jnp.float32)
    P = P.at[:, 0::2].set(jnp.sin(angles))
    P = P.at[:, 1::2].set(jnp.cos(angles))
    return P[None]  # (1, S, H)


def embed_plus_pe(table, tokens, H):
    # plain JAX: XLA fuses gather + scale + PE add; cast stream to bf16.
    S = tokens.shape[1]
    emb = jnp.take(table, tokens, axis=0).astype(jnp.float32)
    return (emb * math.sqrt(H) + positional_encoding(S, H)).astype(jnp.bfloat16)


def encoder_block(p, X, enc_valid_lens, num_heads):
    B, S, H = X.shape
    kvq = matmul(X.reshape(-1, H), p['attn']['W_kvq']).reshape(B, S, 3 * H)
    Y = attn_add_norm(kvq, kvq, X, p['attn']['W_o'], p['ln1_g'], p['ln1_b'],
                      enc_valid_lens, num_heads, causal=False)
    return ffn_add_norm(Y, p['ffn_w1'], p['ffn_b1'], p['ffn_w2'], p['ffn_b2'],
                        p['ln2_g'], p['ln2_b'])


def decoder_block(p, X, enc_outputs, enc_valid_lens, num_heads):
    B, S, H = X.shape
    # masked (causal) self-attention; training mode: key_values == X
    kvq = matmul(X.reshape(-1, H), p['attn1']['W_kvq']).reshape(B, S, 3 * H)
    Y = attn_add_norm(kvq, kvq, X, p['attn1']['W_o'], p['ln1_g'], p['ln1_b'],
                      None, num_heads, causal=True)
    # encoder-decoder cross attention
    Sk = enc_outputs.shape[1]
    q = matmul(Y.reshape(-1, H), p['attn2']['W_q']).reshape(B, S, H)
    kv = matmul(enc_outputs.reshape(-1, H), p['attn2']['W_kv']).reshape(B, Sk, 2 * H)
    Z = attn_add_norm(q, kv, Y, p['attn2']['W_o'], p['ln2_g'], p['ln2_b'],
                      enc_valid_lens, num_heads, causal=False)
    return ffn_add_norm(Z, p['ffn_w1'], p['ffn_b1'], p['ffn_w2'], p['ffn_b2'],
                        p['ln3_g'], p['ln3_b'])


def encode(ep, enc_X, enc_valid_lens, num_heads, H):
    X = embed_plus_pe(ep['embedding'], enc_X, H)
    for blk in ep['blocks']:
        X = encoder_block(blk, X, enc_valid_lens, num_heads)
    return X


def decode(dp, dec_X, enc_outputs, enc_valid_lens, num_heads, H):
    B, S = dec_X.shape
    X = embed_plus_pe(dp['embedding'], dec_X, H)
    key_values_state = []
    for blk in dp['blocks']:
        key_values_state.append(X)  # training-mode: key_values == block input X
        X = decoder_block(blk, X, enc_outputs, enc_valid_lens, num_heads)
    logits = dense(X.reshape(-1, H), dp['dense_w'], dp['dense_b']).reshape(B, S, -1)
    state = [enc_outputs, enc_valid_lens, key_values_state]
    return logits, state


def encoder_decoder_forward(params, enc_X, dec_X, enc_valid_lens, num_heads, H):
    # mirrors: enc_outputs = encoder(enc_X, valid_lens)
    #          dec_state   = decoder.init_state(enc_outputs, valid_lens)
    #          return decoder(dec_X, dec_state)
    enc_outputs = encode(params['encoder'], enc_X, enc_valid_lens, num_heads, H)
    return decode(params['decoder'], dec_X, enc_outputs, enc_valid_lens, num_heads, H)


# ---------------------------- parameter init --------------------------------

def init_params(key, vocab, H, ffn_h, num_layers):
    keys = iter(jax.random.split(key, 256))

    def weight(din, dout):
        return (jax.random.normal(next(keys), (din, dout), jnp.float32)
                * 0.02).astype(jnp.bfloat16)

    def self_attn():
        # fused [W_k | W_v | W_q] (bias=False, as in d2l MultiHeadAttention)
        return dict(W_kvq=jnp.concatenate([weight(H, H), weight(H, H), weight(H, H)],
                                          axis=1),
                    W_o=weight(H, H))

    def cross_attn():
        return dict(W_q=weight(H, H),
                    W_kv=jnp.concatenate([weight(H, H), weight(H, H)], axis=1),
                    W_o=weight(H, H))

    def ln():
        return jnp.ones((H,), jnp.float32), jnp.zeros((H,), jnp.float32)

    def enc_block():
        g1, b1 = ln(); g2, b2 = ln()
        return dict(attn=self_attn(), ln1_g=g1, ln1_b=b1, ln2_g=g2, ln2_b=b2,
                    ffn_w1=weight(H, ffn_h), ffn_b1=jnp.zeros((ffn_h,), jnp.float32),
                    ffn_w2=weight(ffn_h, H), ffn_b2=jnp.zeros((H,), jnp.float32))

    def dec_block():
        g1, b1 = ln(); g2, b2 = ln(); g3, b3 = ln()
        return dict(attn1=self_attn(), attn2=cross_attn(),
                    ln1_g=g1, ln1_b=b1, ln2_g=g2, ln2_b=b2, ln3_g=g3, ln3_b=b3,
                    ffn_w1=weight(H, ffn_h), ffn_b1=jnp.zeros((ffn_h,), jnp.float32),
                    ffn_w2=weight(ffn_h, H), ffn_b2=jnp.zeros((H,), jnp.float32))

    encoder = dict(
        embedding=(jax.random.normal(next(keys), (vocab, H), jnp.float32)
                   ).astype(jnp.bfloat16),
        blocks=[enc_block() for _ in range(num_layers)])
    decoder = dict(
        embedding=(jax.random.normal(next(keys), (vocab, H), jnp.float32)
                   ).astype(jnp.bfloat16),
        blocks=[dec_block() for _ in range(num_layers)],
        dense_w=weight(H, vocab),
        dense_b=jnp.zeros((vocab,), jnp.float32))
    return dict(encoder=encoder, decoder=decoder)


# --------------------------------- main --------------------------------------

if __name__ == "__main__":
    B, S, H, num_heads, num_layers, ffn_h, vocab = 2, 8, 32, 4, 2, 64, 40

    key = jax.random.PRNGKey(0)
    k1, k2, k3 = jax.random.split(key, 3)
    enc_X = jax.random.randint(k1, (B, S), 0, vocab, dtype=jnp.int32)
    dec_X = jax.random.randint(k2, (B, S), 0, vocab, dtype=jnp.int32)
    enc_valid_lens = jnp.array([S, S - 3], dtype=jnp.int32)

    params = init_params(k3, vocab, H, ffn_h, num_layers)

    fwd = jax.jit(encoder_decoder_forward, static_argnums=(4, 5))
    logits, state = fwd(params, enc_X, dec_X, enc_valid_lens, num_heads, H)
    jax.block_until_ready(logits)
    assert logits.shape == (B, S, vocab)
    assert state[0].shape == (B, S, H)
    print("KERNEL_OK")
</pallas_src>

<mosaic_0001>
module attributes {stable_mosaic.version = 11 : i64} {
  func.func @_matmul_kernel(%arg0: i32, %arg1: i32, %arg2: i32, %arg3: memref<16x128xbf16, #tpu.memory_space<vmem>>, %arg4: memref<128x128xbf16, #tpu.memory_space<vmem>>, %arg5: memref<16x128xbf16, #tpu.memory_space<vmem>>, %arg6: memref<16x128xf32, #tpu.memory_space<vmem>>) attributes {dimension_semantics = [#tpu.dimension_semantics<parallel>, #tpu.dimension_semantics<parallel>, #tpu.dimension_semantics<arbitrary>], iteration_bounds = array<i64: 1, 1, 1>, scalar_prefetch = 0 : i64, scratch_operands = 1 : i64, tpu.core_type = #tpu.core_type<tc>, window_params = [{transform_indices = @transform_0, window_bounds = array<i64: 16, 128>}, {transform_indices = @transform_1, window_bounds = array<i64: 128, 128>}, {transform_indices = @transform_2, window_bounds = array<i64: 16, 128>}]} {
    %c0_i32 = arith.constant 0 : i32
    %0 = arith.cmpi eq, %arg2, %c0_i32 : i32
    %1 = arith.extui %0 : i1 to i32
    %c0_i32_0 = arith.constant 0 : i32
    %2 = arith.cmpi ne, %1, %c0_i32_0 : i32
    scf.if %2 {
      %cst_10 = arith.constant 0.000000e+00 : f32
      %12 = vector.broadcast %cst_10 : f32 to vector<16x128xf32>
      %c0_11 = arith.constant 0 : index
      %c0_12 = arith.constant 0 : index
      %13 = vector.load %arg6[%c0_11, %c0_12] : memref<16x128xf32, #tpu.memory_space<vmem>>, vector<16x128xf32>
      tpu.vector_store %arg6[%c0_11, %c0_12], %12 {strides = array<i32>} : memref<16x128xf32, #tpu.memory_space<vmem>>, vector<16x128xf32>,
    } else {
    }
    %c0 = arith.constant 0 : index
    %c0_1 = arith.constant 0 : index
    %3 = vector.load %arg6[%c0, %c0_1] : memref<16x128xf32, #tpu.memory_space<vmem>>, vector<16x128xf32>
    %c0_2 = arith.constant 0 : index
    %c0_3 = arith.constant 0 : index
    %4 = vector.load %arg3[%c0_2, %c0_3] : memref<16x128xbf16, #tpu.memory_space<vmem>>, vector<16x128xbf16>
    %c0_4 = arith.constant 0 : index
    %c0_5 = arith.constant 0 : index
    %5 = vector.load %arg4[%c0_4, %c0_5] : memref<128x128xbf16, #tpu.memory_space<vmem>>, vector<128x128xbf16>
    %cst = arith.constant dense<0.000000e+00> : vector<16x128xf32>
    %6 = tpu.matmul %4, %5, %cst {dimension_numbers = #tpu.dot_dimension_numbers<[1], [0], [0], [1], [0, 0, 1, 1], [], []>} : vector<16x128xbf16>, vector<128x128xbf16>, vector<16x128xf32> -> vector<16x128xf32>
    %7 = arith.addf %3, %6 : vector<16x128xf32>
    %c0_6 = arith.constant 0 : index
    %c0_7 = arith.constant 0 : index
    %8 = vector.load %arg6[%c0_6, %c0_7] : memref<16x128xf32, #tpu.memory_space<vmem>>, vector<16x128xf32>
    tpu.vector_store %arg6[%c0_6, %c0_7], %7 {strides = array<i32>} : memref<16x128xf32, #tpu.memory_space<vmem>>, vector<16x128xf32>,
    %c0_i32_8 = arith.constant 0 : i32
    %9 = arith.cmpi eq, %arg2, %c0_i32_8 : i32
    %10 = arith.extui %9 : i1 to i32
    %c0_i32_9 = arith.constant 0 : i32
    %11 = arith.cmpi ne, %10, %c0_i32_9 : i32
    scf.if %11 {
      %c0_10 = arith.constant 0 : index
      %c0_11 = arith.constant 0 : index
      %12 = vector.load %arg6[%c0_10, %c0_11] : memref<16x128xf32, #tpu.memory_space<vmem>>, vector<16x128xf32>
      %13 = arith.truncf %12 : vector<16x128xf32> to vector<16x128xbf16>
      %c0_12 = arith.constant 0 : index
      %c0_13 = arith.constant 0 : index
      %14 = vector.load %arg5[%c0_12, %c0_13] : memref<16x128xbf16, #tpu.memory_space<vmem>>, vector<16x128xbf16>
      tpu.vector_store %arg5[%c0_12, %c0_13], %13 {strides = array<i32>} : memref<16x128xbf16, #tpu.memory_space<vmem>>, vector<16x128xbf16>,
    } else {
    }
    return
  }
  func.func @transform_0(%arg0: i32, %arg1: i32, %arg2: i32) -> (i32, i32) {
    %c0_i32 = arith.constant 0 : i32
    return %arg0, %arg2 : i32, i32
  }
  func.func @transform_1(%arg0: i32, %arg1: i32, %arg2: i32) -> (i32, i32) {
    %c0_i32 = arith.constant 0 : i32
    return %arg2, %arg1 : i32, i32
  }
  func.func @transform_2(%arg0: i32, %arg1: i32, %arg2: i32) -> (i32, i32) {
    %c0_i32 = arith.constant 0 : i32
    return %arg0, %arg1 : i32, i32
  }
}

module attributes {stable_mosaic.version = 11 : i64} {
  func.func @_attn_addnorm_kernel(%arg0: i32, %arg1: i32, %arg2: memref<2xi32, #tpu.memory_space<smem>>, %arg3: memref<1x8x96xbf16, #tpu.memory_space<vmem>>, %arg4: memref<1x8x96xbf16, #tpu.memory_space<vmem>>, %arg5: memref<1x8x32xbf16, #tpu.memory_space<vmem>>, %arg6: memref<32x32xbf16, #tpu.memory_space<vmem>>, %arg7: memref<1x32xf32, #tpu.memory_space<vmem>>, %arg8: memref<1x32xf32, #tpu.memory_space<vmem>>, %arg9: memref<1x8x32xbf16, #tpu.memory_space<vmem>>) attributes {dimension_semantics = [#tpu.dimension_semantics<parallel>, #tpu.dimension_semantics<parallel>], iteration_bounds = array<i64: 2, 1>, scalar_prefetch = 1 : i64, scratch_operands = 0 : i64, tpu.core_type = #tpu.core_type<tc>, window_params = [{transform_indices = @transform_0, window_bounds = array<i64: 1, 8, 96>}, {transform_indices = @transform_1, window_bounds = array<i64: 1, 8, 96>}, {transform_indices = @transform_2, window_bounds = array<i64: 1, 8, 32>}, {pipeline_mode = #tpu.pipeline_mode<synchronous>, transform_indices = @transform_3, window_bounds = array<i64: 32, 32>}, {pipeline_mode = #tpu.pipeline_mode<synchronous>, transform_indices = @transform_4, window_bounds = array<i64: 1, 32>}, {pipeline_mode = #tpu.pipeline_mode<synchronous>, transform_indices = @transform_5, window_bounds = array<i64: 1, 32>}, {transform_indices = @transform_6, window_bounds = array<i64: 1, 8, 32>}]} {
    %c0 = arith.constant 0 : index
    %c0_0 = arith.constant 0 : index
    %c0_1 = arith.constant 0 : index
    %0 = vector.load %arg5[%c0, %c0_0, %c0_1] : memref<1x8x32xbf16, #tpu.memory_space<vmem>>, vector<1x8x32xbf16>
    %1 = vector.shape_cast %0 : vector<1x8x32xbf16> to vector<8x32xbf16>
    %c0_2 = arith.constant 0 : index
    %c0_3 = arith.constant 0 : index
    %c0_4 = arith.constant 0 : index
    %2 = vector.load %arg3[%c0_2, %c0_3, %c0_4] : memref<1x8x96xbf16, #tpu.memory_space<vmem>>, vector<1x8x96xbf16>
    %3 = vector.shape_cast %2 : vector<1x8x96xbf16> to vector<8x96xbf16>
    %4 = vector.extract_strided_slice %3 {offsets = [0, 64], sizes = [8, 32], strides = [1, 1]} : vector<8x96xbf16> to vector<8x32xbf16>
    %c0_5 = arith.constant 0 : index
    %c0_6 = arith.constant 0 : index
    %c0_7 = arith.constant 0 : index
    %5 = vector.load %arg4[%c0_5, %c0_6, %c0_7] : memref<1x8x96xbf16, #tpu.memory_space<vmem>>, vector<1x8x96xbf16>
    %6 = vector.shape_cast %5 : vector<1x8x96xbf16> to vector<8x96xbf16>
    %7 = vector.extract_strided_slice %6 {offsets = [0, 0], sizes = [8, 32], strides = [1, 1]} : vector<8x96xbf16> to vector<8x32xbf16>
    %8 = vector.extract_strided_slice %6 {offsets = [0, 32], sizes = [8, 32], strides = [1, 1]} : vector<8x96xbf16> to vector<8x32xbf16>
    %9 = tpu.iota {dimensions = array<i32: 1>} : vector<8x8xi32>
    %10 = arith.index_cast %arg0 : i32 to index
    %11 = memref.load %arg2[%10] : memref<2xi32, #tpu.memory_space<smem>>
    %12 = vector.broadcast %11 : i32 to vector<8x8xi32>
    %13 = arith.cmpi slt, %9, %12 : vector<8x8xi32>
    %14 = vector.extract_strided_slice %4 {offsets = [0, 0], sizes = [8, 8], strides = [1, 1]} : vector<8x32xbf16> to vector<8x8xbf16>
    %15 = vector.extract_strided_slice %7 {offsets = [0, 0], sizes = [8, 8], strides = [1, 1]} : vector<8x32xbf16> to vector<8x8xbf16>
    %16 = vector.extract_strided_slice %8 {offsets = [0, 0], sizes = [8, 8], strides = [1, 1]} : vector<8x32xbf16> to vector<8x8xbf16>
    %cst = arith.constant dense<0.000000e+00> : vector<8x8xf32>
    %17 = tpu.matmul %14, %15, %cst {dimension_numbers = #tpu.dot_dimension_numbers<[1], [1], [0], [0], [0, 0, 1, 0], [], []>} : vector<8x8xbf16>, vector<8x8xbf16>, vector<8x8xf32> -> vector<8x8xf32>
    %cst_8 = arith.constant 0.353553385 : f32
    %18 = vector.broadcast %cst_8 : f32 to vector<8x8xf32>
    %19 = arith.mulf %17, %18 : vector<8x8xf32>
    %cst_9 = arith.constant -1.000000e+06 : f32
    %20 = vector.broadcast %cst_9 : f32 to vector<8x8xf32>
    %21 = arith.select %13, %19, %20 : vector<8x8xi1>, vector<8x8xf32>
    %cst_10 = arith.constant dense<0xFF800000> : vector<8xf32>
    %22 = vector.multi_reduction <maximumf>, %21, %cst_10 [1] : vector<8x8xf32> to vector<8xf32>
    %23 = vector.shape_cast %22 : vector<8xf32> to vector<8x1xf32>
    %24 = vector.broadcast %23 : vector<8x1xf32> to vector<8x8xf32>
    %25 = arith.subf %21, %24 : vector<8x8xf32>
    %26 = math.exp %25 : vector<8x8xf32>
    %cst_11 = arith.constant dense<0.000000e+00> : vector<8xf32>
    %27 = vector.multi_reduction <add>, %26, %cst_11 [1] : vector<8x8xf32> to vector<8xf32>
    %28 = vector.shape_cast %27 : vector<8xf32> to vector<8x1xf32>
    %29 = tpu.reciprocal %28 {approx = true} : vector<8x1xf32> -> vector<8x1xf32>
    %30 = vector.broadcast %29 : vector<8x1xf32> to vector<8x8xf32>
    %31 = arith.mulf %26, %30 : vector<8x8xf32>
    %32 = arith.truncf %31 : vector<8x8xf32> to vector<8x8xbf16>
    %cst_12 = arith.constant dense<0.000000e+00> : vector<8x8xf32>
    %33 = tpu.matmul %32, %16, %cst_12 {dimension_numbers = #tpu.dot_dimension_numbers<[1], [0], [0], [1], [0, 0, 1, 1], [], []>} : vector<8x8xbf16>, vector<8x8xbf16>, vector<8x8xf32> -> vector<8x8xf32>
    %34 = vector.extract_strided_slice %4 {offsets = [0, 8], sizes = [8, 8], strides = [1, 1]} : vector<8x32xbf16> to vector<8x8xbf16>
    %35 = vector.extract_strided_slice %7 {offsets = [0, 8], sizes = [8, 8], strides = [1, 1]} : vector<8x32xbf16> to vector<8x8xbf16>
    %36 = vector.extract_strided_slice %8 {offsets = [0, 8], sizes = [8, 8], strides = [1, 1]} : vector<8x32xbf16> to vector<8x8xbf16>
    %cst_13 = arith.constant dense<0.000000e+00> : vector<8x8xf32>
    %37 = tpu.matmul %34, %35, %cst_13 {dimension_numbers = #tpu.dot_dimension_numbers<[1], [1], [0], [0], [0, 0, 1, 0], [], []>} : vector<8x8xbf16>, vector<8x8xbf16>, vector<8x8xf32> -> vector<8x8xf32>
    %cst_14 = arith.constant 0.353553385 : f32
    %38 = vector.broadcast %cst_14 : f32 to vector<8x8xf32>
    %39 = arith.mulf %37, %38 : vector<8x8xf32>
    %cst_15 = arith.constant -1.000000e+06 : f32
    %40 = vector.broadcast %cst_15 : f32 to vector<8x8xf32>
    %41 = arith.select %13, %39, %40 : vector<8x8xi1>, vector<8x8xf32>
    %cst_16 = arith.constant dense<0xFF800000> : vector<8xf32>
    %42 = vector.multi_reduction <maximumf>, %41, %cst_16 [1] : vector<8x8xf32> to vector<8xf32>
    %43 = vector.shape_cast %42 : vector<8xf32> to vector<8x1xf32>
    %44 = vector.broadcast %43 : vector<8x1xf32> to vector<8x8xf32>
    %45 = arith.subf %41, %44 : vector<8x8xf32>
    %46 = math.exp %45 : vector<8x8xf32>
    %cst_17 = arith.constant dense<0.000000e+00> : vector<8xf32>
    %47 = vector.multi_reduction <add>, %46, %cst_17 [1] : vector<8x8xf32> to vector<8xf32>
    %48 = vector.shape_cast %47 : vector<8xf32> to vector<8x1xf32>
    %49 = tpu.reciprocal %48 {approx = true} : vector<8x1xf32> -> vector<8x1xf32>
    %50 = vector.broadcast %49 : vector<8x1xf32> to vector<8x8xf32>
    %51 = arith.mulf %46, %50 : vector<8x8xf32>
    %52 = arith.truncf %51 : vector<8x8xf32> to vector<8x8xbf16>
    %cst_18 = arith.constant dense<0.000000e+00> : vector<8x8xf32>
    %53 = tpu.matmul %52, %36, %cst_18 {dimension_numbers = #tpu.dot_dimension_numbers<[1], [0], [0], [1], [0, 0, 1, 1], [], []>} : vector<8x8xbf16>, vector<8x8xbf16>, vector<8x8xf32> -> vector<8x8xf32>
    %54 = vector.extract_strided_slice %4 {offsets = [0, 16], sizes = [8, 8], strides = [1, 1]} : vector<8x32xbf16> to vector<8x8xbf16>
    %55 = vector.extract_strided_slice %7 {offsets = [0, 16], sizes = [8, 8], strides = [1, 1]} : vector<8x32xbf16> to vector<8x8xbf16>
    %56 = vector.extract_strided_slice %8 {offsets = [0, 16], sizes = [8, 8], strides = [1, 1]} : vector<8x32xbf16> to vector<8x8xbf16>
    %cst_19 = arith.constant dense<0.000000e+00> : vector<8x8xf32>
    %57 = tpu.matmul %54, %55, %cst_19 {dimension_numbers = #tpu.dot_dimension_numbers<[1], [1], [0], [0], [0, 0, 1, 0], [], []>} : vector<8x8xbf16>, vector<8x8xbf16>, vector<8x8xf32> -> vector<8x8xf32>
    %cst_20 = arith.constant 0.353553385 : f32
    %58 = vector.broadcast %cst_20 : f32 to vector<8x8xf32>
    %59 = arith.mulf %57, %58 : vector<8x8xf32>
    %cst_21 = arith.constant -1.000000e+06 : f32
    %60 = vector.broadcast %cst_21 : f32 to vector<8x8xf32>
    %61 = arith.select %13, %59, %60 : vector<8x8xi1>, vector<8x8xf32>
    %cst_22 = arith.constant dense<0xFF800000> : vector<8xf32>
    %62 = vector.multi_reduction <maximumf>, %61, %cst_22 [1] : vector<8x8xf32> to vector<8xf32>
    %63 = vector.shape_cast %62 : vector<8xf32> to vector<8x1xf32>
    %64 = vector.broadcast %63 : vector<8x1xf32> to vector<8x8xf32>
    %65 = arith.subf %61, %64 : vector<8x8xf32>
    %66 = math.exp %65 : vector<8x8xf32>
    %cst_23 = arith.constant dense<0.000000e+00> : vector<8xf32>
    %67 = vector.multi_reduction <add>, %66, %cst_23 [1] : vector<8x8xf32> to vector<8xf32>
    %68 = vector.shape_cast %67 : vector<8xf32> to vector<8x1xf32>
    %69 = tpu.reciprocal %68 {approx = true} : vector<8x1xf32> -> vector<8x1xf32>
    %70 = vector.broadcast %69 : vector<8x1xf32> to vector<8x8xf32>
    %71 = arith.mulf %66, %70 : vector<8x8xf32>
    %72 = arith.truncf %71 : vector<8x8xf32> to vector<8x8xbf16>
    %cst_24 = arith.constant dense<0.000000e+00> : vector<8x8xf32>
    %73 = tpu.matmul %72, %56, %cst_24 {dimension_numbers = #tpu.dot_dimension_numbers<[1], [0], [0], [1], [0, 0, 1, 1], [], []>} : vector<8x8xbf16>, vector<8x8xbf16>, vector<8x8xf32> -> vector<8x8xf32>
    %74 = vector.extract_strided_slice %4 {offsets = [0, 24], sizes = [8, 8], strides = [1, 1]} : vector<8x32xbf16> to vector<8x8xbf16>
    %75 = vector.extract_strided_slice %7 {offsets = [0, 24], sizes = [8, 8], strides = [1, 1]} : vector<8x32xbf16> to vector<8x8xbf16>
    %76 = vector.extract_strided_slice %8 {offsets = [0, 24], sizes = [8, 8], strides = [1, 1]} : vector<8x32xbf16> to vector<8x8xbf16>
    %cst_25 = arith.constant dense<0.000000e+00> : vector<8x8xf32>
    %77 = tpu.matmul %74, %75, %cst_25 {dimension_numbers = #tpu.dot_dimension_numbers<[1], [1], [0], [0], [0, 0, 1, 0], [], []>} : vector<8x8xbf16>, vector<8x8xbf16>, vector<8x8xf32> -> vector<8x8xf32>
    %cst_26 = arith.constant 0.353553385 : f32
    %78 = vector.broadcast %cst_26 : f32 to vector<8x8xf32>
    %79 = arith.mulf %77, %78 : vector<8x8xf32>
    %cst_27 = arith.constant -1.000000e+06 : f32
    %80 = vector.broadcast %cst_27 : f32 to vector<8x8xf32>
    %81 = arith.select %13, %79, %80 : vector<8x8xi1>, vector<8x8xf32>
    %cst_28 = arith.constant dense<0xFF800000> : vector<8xf32>
    %82 = vector.multi_reduction <maximumf>, %81, %cst_28 [1] : vector<8x8xf32> to vector<8xf32>
    %83 = vector.shape_cast %82 : vector<8xf32> to vector<8x1xf32>
    %84 = vector.broadcast %83 : vector<8x1xf32> to vector<8x8xf32>
    %85 = arith.subf %81, %84 : vector<8x8xf32>
    %86 = math.exp %85 : vector<8x8xf32>
    %cst_29 = arith.constant dense<0.000000e+00> : vector<8xf32>
    %87 = vector.multi_reduction <add>, %86, %cst_29 [1] : vector<8x8xf32> to vector<8xf32>
    %88 = vector.shape_cast %87 : vector<8xf32> to vector<8x1xf32>
    %89 = tpu.reciprocal %88 {approx = true} : vector<8x1xf32> -> vector<8x1xf32>
    %90 = vector.broadcast %89 : vector<8x1xf32> to vector<8x8xf32>
    %91 = arith.mulf %86, %90 : vector<8x8xf32>
    %92 = arith.truncf %91 : vector<8x8xf32> to vector<8x8xbf16>
    %cst_30 = arith.constant dense<0.000000e+00> : vector<8x8xf32>
    %93 = tpu.matmul %92, %76, %cst_30 {dimension_numbers = #tpu.dot_dimension_numbers<[1], [0], [0], [1], [0, 0, 1, 1], [], []>} : vector<8x8xbf16>, vector<8x8xbf16>, vector<8x8xf32> -> vector<8x8xf32>
    %94 = tpu.concatenate %33, %53, %73, %93 in 1 : vector<8x8xf32>, vector<8x8xf32>, vector<8x8xf32>, vector<8x8xf32> -> vector<8x32xf32>
    %95 = arith.truncf %94 : vector<8x32xf32> to vector<8x32xbf16>
    %c0_31 = arith.constant 0 : index
    %c0_32 = arith.constant 0 : index
    %96 = vector.load %arg6[%c0_31, %c0_32] : memref<32x32xbf16, #tpu.memory_space<vmem>>, vector<32x32xbf16>
    %cst_33 = arith.constant dense<0.000000e+00> : vector<8x32xf32>
    %97 = tpu.matmul %95, %96, %cst_33 {dimension_numbers = #tpu.dot_dimension_numbers<[1], [0], [0], [1], [0, 0, 1, 1], [], []>} : vector<8x32xbf16>, vector<32x32xbf16>, vector<8x32xf32> -> vector<8x32xf32>
    %98 = arith.extf %1 : vector<8x32xbf16> to vector<8x32xf32>
    %99 = arith.addf %98, %97 : vector<8x32xf32>
    %c0_34 = arith.constant 0 : index
    %c0_35 = arith.constant 0 : index
    %100 = vector.load %arg7[%c0_34, %c0_35] : memref<1x32xf32, #tpu.memory_space<vmem>>, vector<1x32xf32>
    %c0_36 = arith.constant 0 : index
    %c0_37 = arith.constant 0 : index
    %101 = vector.load %arg8[%c0_36, %c0_37] : memref<1x32xf32, #tpu.memory_space<vmem>>, vector<1x32xf32>
    %cst_38 = arith.constant dense<0.000000e+00> : vector<8xf32>
    %102 = vector.multi_reduction <add>, %99, %cst_38 [1] : vector<8x32xf32> to vector<8xf32>
    %103 = vector.shape_cast %102 : vector<8xf32> to vector<8x1xf32>
    %cst_39 = arith.constant 3.200000e+01 : f32
    %104 = vector.broadcast %cst_39 : f32 to vector<8x1xf32>
    %105 = arith.divf %103, %104 : vector<8x1xf32>
    %106 = vector.broadcast %105 : vector<8x1xf32> to vector<8x32xf32>
    %107 = arith.subf %99, %106 : vector<8x32xf32>
    %108 = arith.mulf %107, %107 : vector<8x32xf32>
    %cst_40 = arith.constant dense<0.000000e+00> : vector<8xf32>
    %109 = vector.multi_reduction <add>, %108, %cst_40 [1] : vector<8x32xf32> to vector<8xf32>
    %110 = vector.shape_cast %109 : vector<8xf32> to vector<8x1xf32>
    %cst_41 = arith.constant 3.200000e+01 : f32
    %111 = vector.broadcast %cst_41 : f32 to vector<8x1xf32>
    %112 = arith.divf %110, %111 : vector<8x1xf32>
    %113 = vector.broadcast %105 : vector<8x1xf32> to vector<8x32xf32>
    %114 = arith.subf %99, %113 : vector<8x32xf32>
    %cst_42 = arith.constant 9.99999974E-6 : f32
    %115 = vector.broadcast %cst_42 : f32 to vector<8x1xf32>
    %116 = arith.addf %112, %115 : vector<8x1xf32>
    %117 = math.rsqrt %116 : vector<8x1xf32>
    %118 = vector.broadcast %117 : vector<8x1xf32> to vector<8x32xf32>
    %119 = arith.mulf %114, %118 : vector<8x32xf32>
    %120 = vector.broadcast %100 : vector<1x32xf32> to vector<8x32xf32>
    %121 = arith.mulf %119, %120 : vector<8x32xf32>
    %122 = vector.broadcast %101 : vector<1x32xf32> to vector<8x32xf32>
    %123 = arith.addf %121, %122 : vector<8x32xf32>
    %124 = arith.truncf %123 : vector<8x32xf32> to vector<8x32xbf16>
    %c0_43 = arith.constant 0 : index
    %c0_44 = arith.constant 0 : index
    %c0_45 = arith.constant 0 : index
    %125 = vector.load %arg9[%c0_43, %c0_44, %c0_45] : memref<1x8x32xbf16, #tpu.memory_space<vmem>>, vector<1x8x32xbf16>
    %126 = vector.shape_cast %125 : vector<1x8x32xbf16> to vector<8x32xbf16>
    %127 = vector.shape_cast %124 : vector<8x32xbf16> to vector<1x8x32xbf16>
    tpu.vector_store %arg9[%c0_43, %c0_44, %c0_45], %127 {strides = array<i32>} : memref<1x8x32xbf16, #tpu.memory_space<vmem>>, vector<1x8x32xbf16>,
    return
  }
  func.func @transform_0(%arg0: i32, %arg1: i32, %arg2: memref<2xi32, #tpu.memory_space<smem>>) -> (i32, i32, i32) {
    %c0_i32 = arith.constant 0 : i32
    %c0_i32_0 = arith.constant 0 : i32
    return %arg0, %arg1, %c0_i32 : i32, i32, i32
  }
  func.func @transform_1(%arg0: i32, %arg1: i32, %arg2: memref<2xi32, #tpu.memory_space<smem>>) -> (i32, i32, i32) {
    %c0_i32 = arith.constant 0 : i32
    %c0_i32_0 = arith.constant 0 : i32
    %c0_i32_1 = arith.constant 0 : i32
    return %arg0, %c0_i32, %c0_i32_0 : i32, i32, i32
  }
  func.func @transform_2(%arg0: i32, %arg1: i32, %arg2: memref<2xi32, #tpu.memory_space<smem>>) -> (i32, i32, i32) {
    %c0_i32 = arith.constant 0 : i32
    %c0_i32_0 = arith.constant 0 : i32
    return %arg0, %arg1, %c0_i32 : i32, i32, i32
  }
  func.func @transform_3(%arg0: i32, %arg1: i32, %arg2: memref<2xi32, #tpu.memory_space<smem>>) -> (i32, i32) {
    %c0_i32 = arith.constant 0 : i32
    %c0_i32_0 = arith.constant 0 : i32
    %c0_i32_1 = arith.constant 0 : i32
    return %c0_i32, %c0_i32_0 : i32, i32
  }
  func.func @transform_4(%arg0: i32, %arg1: i32, %arg2: memref<2xi32, #tpu.memory_space<smem>>) -> (i32, i32) {
    %c0_i32 = arith.constant 0 : i32
    %c0_i32_0 = arith.constant 0 : i32
    %c0_i32_1 = arith.constant 0 : i32
    return %c0_i32, %c0_i32_0 : i32, i32
  }
  func.func @transform_5(%arg0: i32, %arg1: i32, %arg2: memref<2xi32, #tpu.memory_space<smem>>) -> (i32, i32) {
    %c0_i32 = arith.constant 0 : i32
    %c0_i32_0 = arith.constant 0 : i32
    %c0_i32_1 = arith.constant 0 : i32
    return %c0_i32, %c0_i32_0 : i32, i32
  }
  func.func @transform_6(%arg0: i32, %arg1: i32, %arg2: memref<2xi32, #tpu.memory_space<smem>>) -> (i32, i32, i32) {
    %c0_i32 = arith.constant 0 : i32
    %c0_i32_0 = arith.constant 0 : i32
    return %arg0, %arg1, %c0_i32 : i32, i32, i32
  }
}

module attributes {stable_mosaic.version = 11 : i64} {
  func.func @_ffn_addnorm_kernel(%arg0: i32, %arg1: i32, %arg2: memref<16x32xbf16, #tpu.memory_space<vmem>>, %arg3: memref<32x128xbf16, #tpu.memory_space<vmem>>, %arg4: memref<1x128xf32, #tpu.memory_space<vmem>>, %arg5: memref<128x32xbf16, #tpu.memory_space<vmem>>, %arg6: memref<1x32xf32, #tpu.memory_space<vmem>>, %arg7: memref<1x32xf32, #tpu.memory_space<vmem>>, %arg8: memref<1x32xf32, #tpu.memory_space<vmem>>, %arg9: memref<16x32xbf16, #tpu.memory_space<vmem>>, %arg10: memref<16x32xf32, #tpu.memory_space<vmem>>) attributes {dimension_semantics = [#tpu.dimension_semantics<parallel>, #tpu.dimension_semantics<arbitrary>], iteration_bounds = array<i64: 1, 1>, scalar_prefetch = 0 : i64, scratch_operands = 1 : i64, tpu.core_type = #tpu.core_type<tc>, window_params = [{transform_indices = @transform_0, window_bounds = array<i64: 16, 32>}, {transform_indices = @transform_1, window_bounds = array<i64: 32, 128>}, {transform_indices = @transform_2, window_bounds = array<i64: 1, 128>}, {transform_indices = @transform_3, window_bounds = array<i64: 128, 32>}, {pipeline_mode = #tpu.pipeline_mode<synchronous>, transform_indices = @transform_4, window_bounds = array<i64: 1, 32>}, {pipeline_mode = #tpu.pipeline_mode<synchronous>, transform_indices = @transform_5, window_bounds = array<i64: 1, 32>}, {pipeline_mode = #tpu.pipeline_mode<synchronous>, transform_indices = @transform_6, window_bounds = array<i64: 1, 32>}, {transform_indices = @transform_7, window_bounds = array<i64: 16, 32>}]} {
    %c0_i32 = arith.constant 0 : i32
    %0 = arith.cmpi eq, %arg1, %c0_i32 : i32
    %1 = arith.extui %0 : i1 to i32
    %c0_i32_0 = arith.constant 0 : i32
    %2 = arith.cmpi ne, %1, %c0_i32_0 : i32
    scf.if %2 {
      %cst_16 = arith.constant 0.000000e+00 : f32
      %20 = vector.broadcast %cst_16 : f32 to vector<16x32xf32>
      %c0_17 = arith.constant 0 : index
      %c0_18 = arith.constant 0 : index
      %21 = vector.load %arg10[%c0_17, %c0_18] : memref<16x32xf32, #tpu.memory_space<vmem>>, vector<16x32xf32>
      tpu.vector_store %arg10[%c0_17, %c0_18], %20 {strides = array<i32>} : memref<16x32xf32, #tpu.memory_space<vmem>>, vector<16x32xf32>,
    } else {
    }
    %c0 = arith.constant 0 : index
    %c0_1 = arith.constant 0 : index
    %3 = vector.load %arg2[%c0, %c0_1] : memref<16x32xbf16, #tpu.memory_space<vmem>>, vector<16x32xbf16>
    %c0_2 = arith.constant 0 : index
    %c0_3 = arith.constant 0 : index
    %4 = vector.load %arg3[%c0_2, %c0_3] : memref<32x128xbf16, #tpu.memory_space<vmem>>, vector<32x128xbf16>
    %cst = arith.constant dense<0.000000e+00> : vector<16x128xf32>
    %5 = tpu.matmul %3, %4, %cst {dimension_numbers = #tpu.dot_dimension_numbers<[1], [0], [0], [1], [0, 0, 1, 1], [], []>} : vector<16x32xbf16>, vector<32x128xbf16>, vector<16x128xf32> -> vector<16x128xf32>
    %c0_4 = arith.constant 0 : index
    %c0_5 = arith.constant 0 : index
    %6 = vector.load %arg4[%c0_4, %c0_5] : memref<1x128xf32, #tpu.memory_space<vmem>>, vector<1x128xf32>
    %7 = vector.broadcast %6 : vector<1x128xf32> to vector<16x128xf32>
    %8 = arith.addf %5, %7 : vector<16x128xf32>
    %cst_6 = arith.constant 0.000000e+00 : f32
    %9 = vector.broadcast %cst_6 : f32 to vector<16x128xf32>
    %10 = arith.maximumf %8, %9 : vector<16x128xf32>
    %11 = arith.truncf %10 : vector<16x128xf32> to vector<16x128xbf16>
    %c0_7 = arith.constant 0 : index
    %c0_8 = arith.constant 0 : index
    %12 = vector.load %arg10[%c0_7, %c0_8] : memref<16x32xf32, #tpu.memory_space<vmem>>, vector<16x32xf32>
    %c0_9 = arith.constant 0 : index
    %c0_10 = arith.constant 0 : index
    %13 = vector.load %arg5[%c0_9, %c0_10] : memref<128x32xbf16, #tpu.memory_space<vmem>>, vector<128x32xbf16>
    %cst_11 = arith.constant dense<0.000000e+00> : vector<16x32xf32>
    %14 = tpu.matmul %11, %13, %cst_11 {dimension_numbers = #tpu.dot_dimension_numbers<[1], [0], [0], [1], [0, 0, 1, 1], [], []>} : vector<16x128xbf16>, vector<128x32xbf16>, vector<16x32xf32> -> vector<16x32xf32>
    %15 = arith.addf %12, %14 : vector<16x32xf32>
    %c0_12 = arith.constant 0 : index
    %c0_13 = arith.constant 0 : index
    %16 = vector.load %arg10[%c0_12, %c0_13] : memref<16x32xf32, #tpu.memory_space<vmem>>, vector<16x32xf32>
    tpu.vector_store %arg10[%c0_12, %c0_13], %15 {strides = array<i32>} : memref<16x32xf32, #tpu.memory_space<vmem>>, vector<16x32xf32>,
    %c0_i32_14 = arith.constant 0 : i32
    %17 = arith.cmpi eq, %arg1, %c0_i32_14 : i32
    %18 = arith.extui %17 : i1 to i32
    %c0_i32_15 = arith.constant 0 : i32
    %19 = arith.cmpi ne, %18, %c0_i32_15 : i32
    scf.if %19 {
      %c0_16 = arith.constant 0 : index
      %c0_17 = arith.constant 0 : index
      %20 = vector.load %arg2[%c0_16, %c0_17] : memref<16x32xbf16, #tpu.memory_space<vmem>>, vector<16x32xbf16>
      %21 = arith.extf %20 : vector<16x32xbf16> to vector<16x32xf32>
      %c0_18 = arith.constant 0 : index
      %c0_19 = arith.constant 0 : index
      %22 = vector.load %arg10[%c0_18, %c0_19] : memref<16x32xf32, #tpu.memory_space<vmem>>, vector<16x32xf32>
      %23 = arith.addf %21, %22 : vector<16x32xf32>
      %c0_20 = arith.constant 0 : index
      %c0_21 = arith.constant 0 : index
      %24 = vector.load %arg6[%c0_20, %c0_21] : memref<1x32xf32, #tpu.memory_space<vmem>>, vector<1x32xf32>
      %25 = vector.broadcast %24 : vector<1x32xf32> to vector<16x32xf32>
      %26 = arith.addf %23, %25 : vector<16x32xf32>
      %c0_22 = arith.constant 0 : index
      %c0_23 = arith.constant 0 : index
      %27 = vector.load %arg7[%c0_22, %c0_23] : memref<1x32xf32, #tpu.memory_space<vmem>>, vector<1x32xf32>
      %c0_24 = arith.constant 0 : index
      %c0_25 = arith.constant 0 : index
      %28 = vector.load %arg8[%c0_24, %c0_25] : memref<1x32xf32, #tpu.memory_space<vmem>>, vector<1x32xf32>
      %cst_26 = arith.constant dense<0.000000e+00> : vector<16xf32>
      %29 = vector.multi_reduction <add>, %26, %cst_26 [1] : vector<16x32xf32> to vector<16xf32>
      %30 = vector.shape_cast %29 : vector<16xf32> to vector<16x1xf32>
      %cst_27 = arith.constant 3.200000e+01 : f32
      %31 = vector.broadcast %cst_27 : f32 to vector<16x1xf32>
      %32 = arith.divf %30, %31 : vector<16x1xf32>
      %33 = vector.broadcast %32 : vector<16x1xf32> to vector<16x32xf32>
      %34 = arith.subf %26, %33 : vector<16x32xf32>
      %35 = arith.mulf %34, %34 : vector<16x32xf32>
      %cst_28 = arith.constant dense<0.000000e+00> : vector<16xf32>
      %36 = vector.multi_reduction <add>, %35, %cst_28 [1] : vector<16x32xf32> to vector<16xf32>
      %37 = vector.shape_cast %36 : vector<16xf32> to vector<16x1xf32>
      %cst_29 = arith.constant 3.200000e+01 : f32
      %38 = vector.broadcast %cst_29 : f32 to vector<16x1xf32>
      %39 = arith.divf %37, %38 : vector<16x1xf32>
      %40 = vector.broadcast %32 : vector<16x1xf32> to vector<16x32xf32>
      %41 = arith.subf %26, %40 : vector<16x32xf32>
      %cst_30 = arith.constant 9.99999974E-6 : f32
      %42 = vector.broadcast %cst_30 : f32 to vector<16x1xf32>
      %43 = arith.addf %39, %42 : vector<16x1xf32>
      %44 = math.rsqrt %43 : vector<16x1xf32>
      %45 = vector.broadcast %44 : vector<16x1xf32> to vector<16x32xf32>
      %46 = arith.mulf %41, %45 : vector<16x32xf32>
      %47 = vector.broadcast %27 : vector<1x32xf32> to vector<16x32xf32>
      %48 = arith.mulf %46, %47 : vector<16x32xf32>
      %49 = vector.broadcast %28 : vector<1x32xf32> to vector<16x32xf32>
      %50 = arith.addf %48, %49 : vector<16x32xf32>
      %51 = arith.truncf %50 : vector<16x32xf32> to vector<16x32xbf16>
      %c0_31 = arith.constant 0 : index
      %c0_32 = arith.constant 0 : index
      %52 = vector.load %arg9[%c0_31, %c0_32] : memref<16x32xbf16, #tpu.memory_space<vmem>>, vector<16x32xbf16>
      tpu.vector_store %arg9[%c0_31, %c0_32], %51 {strides = array<i32>} : memref<16x32xbf16, #tpu.memory_space<vmem>>, vector<16x32xbf16>,
    } else {
    }
    return
  }
  func.func @transform_0(%arg0: i32, %arg1: i32) -> (i32, i32) {
    %c0_i32 = arith.constant 0 : i32
    %c0_i32_0 = arith.constant 0 : i32
    return %arg0, %c0_i32 : i32, i32
  }
  func.func @transform_1(%arg0: i32, %arg1: i32) -> (i32, i32) {
    %c0_i32 = arith.constant 0 : i32
    %c0_i32_0 = arith.constant 0 : i32
    return %c0_i32, %arg1 : i32, i32
  }
  func.func @transform_2(%arg0: i32, %arg1: i32) -> (i32, i32) {
    %c0_i32 = arith.constant 0 : i32
    %c0_i32_0 = arith.constant 0 : i32
    return %c0_i32, %arg1 : i32, i32
  }
  func.func @transform_3(%arg0: i32, %arg1: i32) -> (i32, i32) {
    %c0_i32 = arith.constant 0 : i32
    %c0_i32_0 = arith.constant 0 : i32
    return %arg1, %c0_i32 : i32, i32
  }
  func.func @transform_4(%arg0: i32, %arg1: i32) -> (i32, i32) {
    %c0_i32 = arith.constant 0 : i32
    %c0_i32_0 = arith.constant 0 : i32
    %c0_i32_1 = arith.constant 0 : i32
    return %c0_i32, %c0_i32_0 : i32, i32
  }
  func.func @transform_5(%arg0: i32, %arg1: i32) -> (i32, i32) {
    %c0_i32 = arith.constant 0 : i32
    %c0_i32_0 = arith.constant 0 : i32
    %c0_i32_1 = arith.constant 0 : i32
    return %c0_i32, %c0_i32_0 : i32, i32
  }
  func.func @transform_6(%arg0: i32, %arg1: i32) -> (i32, i32) {
    %c0_i32 = arith.constant 0 : i32
    %c0_i32_0 = arith.constant 0 : i32
    %c0_i32_1 = arith.constant 0 : i32
    return %c0_i32, %c0_i32_0 : i32, i32
  }
  func.func @transform_7(%arg0: i32, %arg1: i32) -> (i32, i32) {
    %c0_i32 = arith.constant 0 : i32
    %c0_i32_0 = arith.constant 0 : i32
    return %arg0, %c0_i32 : i32, i32
  }
}

module attributes {stable_mosaic.version = 11 : i64} {
  func.func @_attn_addnorm_kernel(%arg0: i32, %arg1: i32, %arg2: memref<2xi32, #tpu.memory_space<smem>>, %arg3: memref<1x8x96xbf16, #tpu.memory_space<vmem>>, %arg4: memref<1x8x96xbf16, #tpu.memory_space<vmem>>, %arg5: memref<1x8x32xbf16, #tpu.memory_space<vmem>>, %arg6: memref<32x32xbf16, #tpu.memory_space<vmem>>, %arg7: memref<1x32xf32, #tpu.memory_space<vmem>>, %arg8: memref<1x32xf32, #tpu.memory_space<vmem>>, %arg9: memref<1x8x32xbf16, #tpu.memory_space<vmem>>) attributes {dimension_semantics = [#tpu.dimension_semantics<parallel>, #tpu.dimension_semantics<parallel>], iteration_bounds = array<i64: 2, 1>, scalar_prefetch = 1 : i64, scratch_operands = 0 : i64, tpu.core_type = #tpu.core_type<tc>, window_params = [{transform_indices = @transform_0, window_bounds = array<i64: 1, 8, 96>}, {transform_indices = @transform_1, window_bounds = array<i64: 1, 8, 96>}, {transform_indices = @transform_2, window_bounds = array<i64: 1, 8, 32>}, {pipeline_mode = #tpu.pipeline_mode<synchronous>, transform_indices = @transform_3, window_bounds = array<i64: 32, 32>}, {pipeline_mode = #tpu.pipeline_mode<synchronous>, transform_indices = @transform_4, window_bounds = array<i64: 1, 32>}, {pipeline_mode = #tpu.pipeline_mode<synchronous>, transform_indices = @transform_5, window_bounds = array<i64: 1, 32>}, {transform_indices = @transform_6, window_bounds = array<i64: 1, 8, 32>}]} {
    %c0 = arith.constant 0 : index
    %c0_0 = arith.constant 0 : index
    %c0_1 = arith.constant 0 : index
    %0 = vector.load %arg5[%c0, %c0_0, %c0_1] : memref<1x8x32xbf16, #tpu.memory_space<vmem>>, vector<1x8x32xbf16>
    %1 = vector.shape_cast %0 : vector<1x8x32xbf16> to vector<8x32xbf16>
    %c0_2 = arith.constant 0 : index
    %c0_3 = arith.constant 0 : index
    %c0_4 = arith.constant 0 : index
    %2 = vector.load %arg3[%c0_2, %c0_3, %c0_4] : memref<1x8x96xbf16, #tpu.memory_space<vmem>>, vector<1x8x96xbf16>
    %3 = vector.shape_cast %2 : vector<1x8x96xbf16> to vector<8x96xbf16>
    %4 = vector.extract_strided_slice %3 {offsets = [0, 64], sizes = [8, 32], strides = [1, 1]} : vector<8x96xbf16> to vector<8x32xbf16>
    %c0_5 = arith.constant 0 : index
    %c0_6 = arith.constant 0 : index
    %c0_7 = arith.constant 0 : index
    %5 = vector.load %arg4[%c0_5, %c0_6, %c0_7] : memref<1x8x96xbf16, #tpu.memory_space<vmem>>, vector<1x8x96xbf16>
    %6 = vector.shape_cast %5 : vector<1x8x96xbf16> to vector<8x96xbf16>
    %7 = vector.extract_strided_slice %6 {offsets = [0, 0], sizes = [8, 32], strides = [1, 1]} : vector<8x96xbf16> to vector<8x32xbf16>
    %8 = vector.extract_strided_slice %6 {offsets = [0, 32], sizes = [8, 32], strides = [1, 1]} : vector<8x96xbf16> to vector<8x32xbf16>
    %9 = tpu.iota {dimensions = array<i32: 1>} : vector<8x8xi32>
    %10 = tpu.iota {dimensions = array<i32: 0>} : vector<8x8xi32>
    %c8_i32 = arith.constant 8 : i32
    %11 = arith.muli %arg1, %c8_i32 : i32
    %12 = vector.broadcast %11 : i32 to vector<8x8xi32>
    %13 = arith.addi %10, %12 : vector<8x8xi32>
    %14 = arith.cmpi sle, %9, %13 : vector<8x8xi32>
    %15 = vector.extract_strided_slice %4 {offsets = [0, 0], sizes = [8, 8], strides = [1, 1]} : vector<8x32xbf16> to vector<8x8xbf16>
    %16 = vector.extract_strided_slice %7 {offsets = [0, 0], sizes = [8, 8], strides = [1, 1]} : vector<8x32xbf16> to vector<8x8xbf16>
    %17 = vector.extract_strided_slice %8 {offsets = [0, 0], sizes = [8, 8], strides = [1, 1]} : vector<8x32xbf16> to vector<8x8xbf16>
    %cst = arith.constant dense<0.000000e+00> : vector<8x8xf32>
    %18 = tpu.matmul %15, %16, %cst {dimension_numbers = #tpu.dot_dimension_numbers<[1], [1], [0], [0], [0, 0, 1, 0], [], []>} : vector<8x8xbf16>, vector<8x8xbf16>, vector<8x8xf32> -> vector<8x8xf32>
    %cst_8 = arith.constant 0.353553385 : f32
    %19 = vector.broadcast %cst_8 : f32 to vector<8x8xf32>
    %20 = arith.mulf %18, %19 : vector<8x8xf32>
    %cst_9 = arith.constant -1.000000e+06 : f32
    %21 = vector.broadcast %cst_9 : f32 to vector<8x8xf32>
    %22 = arith.select %14, %20, %21 : vector<8x8xi1>, vector<8x8xf32>
    %cst_10 = arith.constant dense<0xFF800000> : vector<8xf32>
    %23 = vector.multi_reduction <maximumf>, %22, %cst_10 [1] : vector<8x8xf32> to vector<8xf32>
    %24 = vector.shape_cast %23 : vector<8xf32> to vector<8x1xf32>
    %25 = vector.broadcast %24 : vector<8x1xf32> to vector<8x8xf32>
    %26 = arith.subf %22, %25 : vector<8x8xf32>
    %27 = math.exp %26 : vector<8x8xf32>
    %cst_11 = arith.constant dense<0.000000e+00> : vector<8xf32>
    %28 = vector.multi_reduction <add>, %27, %cst_11 [1] : vector<8x8xf32> to vector<8xf32>
    %29 = vector.shape_cast %28 : vector<8xf32> to vector<8x1xf32>
    %30 = tpu.reciprocal %29 {approx = true} : vector<8x1xf32> -> vector<8x1xf32>
    %31 = vector.broadcast %30 : vector<8x1xf32> to vector<8x8xf32>
    %32 = arith.mulf %27, %31 : vector<8x8xf32>
    %33 = arith.truncf %32 : vector<8x8xf32> to vector<8x8xbf16>
    %cst_12 = arith.constant dense<0.000000e+00> : vector<8x8xf32>
    %34 = tpu.matmul %33, %17, %cst_12 {dimension_numbers = #tpu.dot_dimension_numbers<[1], [0], [0], [1], [0, 0, 1, 1], [], []>} : vector<8x8xbf16>, vector<8x8xbf16>, vector<8x8xf32> -> vector<8x8xf32>
    %35 = vector.extract_strided_slice %4 {offsets = [0, 8], sizes = [8, 8], strides = [1, 1]} : vector<8x32xbf16> to vector<8x8xbf16>
    %36 = vector.extract_strided_slice %7 {offsets = [0, 8], sizes = [8, 8], strides = [1, 1]} : vector<8x32xbf16> to vector<8x8xbf16>
    %37 = vector.extract_strided_slice %8 {offsets = [0, 8], sizes = [8, 8], strides = [1, 1]} : vector<8x32xbf16> to vector<8x8xbf16>
    %cst_13 = arith.constant dense<0.000000e+00> : vector<8x8xf32>
    %38 = tpu.matmul %35, %36, %cst_13 {dimension_numbers = #tpu.dot_dimension_numbers<[1], [1], [0], [0], [0, 0, 1, 0], [], []>} : vector<8x8xbf16>, vector<8x8xbf16>, vector<8x8xf32> -> vector<8x8xf32>
    %cst_14 = arith.constant 0.353553385 : f32
    %39 = vector.broadcast %cst_14 : f32 to vector<8x8xf32>
    %40 = arith.mulf %38, %39 : vector<8x8xf32>
    %cst_15 = arith.constant -1.000000e+06 : f32
    %41 = vector.broadcast %cst_15 : f32 to vector<8x8xf32>
    %42 = arith.select %14, %40, %41 : vector<8x8xi1>, vector<8x8xf32>
    %cst_16 = arith.constant dense<0xFF800000> : vector<8xf32>
    %43 = vector.multi_reduction <maximumf>, %42, %cst_16 [1] : vector<8x8xf32> to vector<8xf32>
    %44 = vector.shape_cast %43 : vector<8xf32> to vector<8x1xf32>
    %45 = vector.broadcast %44 : vector<8x1xf32> to vector<8x8xf32>
    %46 = arith.subf %42, %45 : vector<8x8xf32>
    %47 = math.exp %46 : vector<8x8xf32>
    %cst_17 = arith.constant dense<0.000000e+00> : vector<8xf32>
    %48 = vector.multi_reduction <add>, %47, %cst_17 [1] : vector<8x8xf32> to vector<8xf32>
    %49 = vector.shape_cast %48 : vector<8xf32> to vector<8x1xf32>
    %50 = tpu.reciprocal %49 {approx = true} : vector<8x1xf32> -> vector<8x1xf32>
    %51 = vector.broadcast %50 : vector<8x1xf32> to vector<8x8xf32>
    %52 = arith.mulf %47, %51 : vector<8x8xf32>
    %53 = arith.truncf %52 : vector<8x8xf32> to vector<8x8xbf16>
    %cst_18 = arith.constant dense<0.000000e+00> : vector<8x8xf32>
    %54 = tpu.matmul %53, %37, %cst_18 {dimension_numbers = #tpu.dot_dimension_numbers<[1], [0], [0], [1], [0, 0, 1, 1], [], []>} : vector<8x8xbf16>, vector<8x8xbf16>, vector<8x8xf32> -> vector<8x8xf32>
    %55 = vector.extract_strided_slice %4 {offsets = [0, 16], sizes = [8, 8], strides = [1, 1]} : vector<8x32xbf16> to vector<8x8xbf16>
    %56 = vector.extract_strided_slice %7 {offsets = [0, 16], sizes = [8, 8], strides = [1, 1]} : vector<8x32xbf16> to vector<8x8xbf16>
    %57 = vector.extract_strided_slice %8 {offsets = [0, 16], sizes = [8, 8], strides = [1, 1]} : vector<8x32xbf16> to vector<8x8xbf16>
    %cst_19 = arith.constant dense<0.000000e+00> : vector<8x8xf32>
    %58 = tpu.matmul %55, %56, %cst_19 {dimension_numbers = #tpu.dot_dimension_numbers<[1], [1], [0], [0], [0, 0, 1, 0], [], []>} : vector<8x8xbf16>, vector<8x8xbf16>, vector<8x8xf32> -> vector<8x8xf32>
    %cst_20 = arith.constant 0.353553385 : f32
    %59 = vector.broadcast %cst_20 : f32 to vector<8x8xf32>
    %60 = arith.mulf %58, %59 : vector<8x8xf32>
    %cst_21 = arith.constant -1.000000e+06 : f32
    %61 = vector.broadcast %cst_21 : f32 to vector<8x8xf32>
    %62 = arith.select %14, %60, %61 : vector<8x8xi1>, vector<8x8xf32>
    %cst_22 = arith.constant dense<0xFF800000> : vector<8xf32>
    %63 = vector.multi_reduction <maximumf>, %62, %cst_22 [1] : vector<8x8xf32> to vector<8xf32>
    %64 = vector.shape_cast %63 : vector<8xf32> to vector<8x1xf32>
    %65 = vector.broadcast %64 : vector<8x1xf32> to vector<8x8xf32>
    %66 = arith.subf %62, %65 : vector<8x8xf32>
    %67 = math.exp %66 : vector<8x8xf32>
    %cst_23 = arith.constant dense<0.000000e+00> : vector<8xf32>
    %68 = vector.multi_reduction <add>, %67, %cst_23 [1] : vector<8x8xf32> to vector<8xf32>
    %69 = vector.shape_cast %68 : vector<8xf32> to vector<8x1xf32>
    %70 = tpu.reciprocal %69 {approx = true} : vector<8x1xf32> -> vector<8x1xf32>
    %71 = vector.broadcast %70 : vector<8x1xf32> to vector<8x8xf32>
    %72 = arith.mulf %67, %71 : vector<8x8xf32>
    %73 = arith.truncf %72 : vector<8x8xf32> to vector<8x8xbf16>
    %cst_24 = arith.constant dense<0.000000e+00> : vector<8x8xf32>
    %74 = tpu.matmul %73, %57, %cst_24 {dimension_numbers = #tpu.dot_dimension_numbers<[1], [0], [0], [1], [0, 0, 1, 1], [], []>} : vector<8x8xbf16>, vector<8x8xbf16>, vector<8x8xf32> -> vector<8x8xf32>
    %75 = vector.extract_strided_slice %4 {offsets = [0, 24], sizes = [8, 8], strides = [1, 1]} : vector<8x32xbf16> to vector<8x8xbf16>
    %76 = vector.extract_strided_slice %7 {offsets = [0, 24], sizes = [8, 8], strides = [1, 1]} : vector<8x32xbf16> to vector<8x8xbf16>
    %77 = vector.extract_strided_slice %8 {offsets = [0, 24], sizes = [8, 8], strides = [1, 1]} : vector<8x32xbf16> to vector<8x8xbf16>
    %cst_25 = arith.constant dense<0.000000e+00> : vector<8x8xf32>
    %78 = tpu.matmul %75, %76, %cst_25 {dimension_numbers = #tpu.dot_dimension_numbers<[1], [1], [0], [0], [0, 0, 1, 0], [], []>} : vector<8x8xbf16>, vector<8x8xbf16>, vector<8x8xf32> -> vector<8x8xf32>
    %cst_26 = arith.constant 0.353553385 : f32
    %79 = vector.broadcast %cst_26 : f32 to vector<8x8xf32>
    %80 = arith.mulf %78, %79 : vector<8x8xf32>
    %cst_27 = arith.constant -1.000000e+06 : f32
    %81 = vector.broadcast %cst_27 : f32 to vector<8x8xf32>
    %82 = arith.select %14, %80, %81 : vector<8x8xi1>, vector<8x8xf32>
    %cst_28 = arith.constant dense<0xFF800000> : vector<8xf32>
    %83 = vector.multi_reduction <maximumf>, %82, %cst_28 [1] : vector<8x8xf32> to vector<8xf32>
    %84 = vector.shape_cast %83 : vector<8xf32> to vector<8x1xf32>
    %85 = vector.broadcast %84 : vector<8x1xf32> to vector<8x8xf32>
    %86 = arith.subf %82, %85 : vector<8x8xf32>
    %87 = math.exp %86 : vector<8x8xf32>
    %cst_29 = arith.constant dense<0.000000e+00> : vector<8xf32>
    %88 = vector.multi_reduction <add>, %87, %cst_29 [1] : vector<8x8xf32> to vector<8xf32>
    %89 = vector.shape_cast %88 : vector<8xf32> to vector<8x1xf32>
    %90 = tpu.reciprocal %89 {approx = true} : vector<8x1xf32> -> vector<8x1xf32>
    %91 = vector.broadcast %90 : vector<8x1xf32> to vector<8x8xf32>
    %92 = arith.mulf %87, %91 : vector<8x8xf32>
    %93 = arith.truncf %92 : vector<8x8xf32> to vector<8x8xbf16>
    %cst_30 = arith.constant dense<0.000000e+00> : vector<8x8xf32>
    %94 = tpu.matmul %93, %77, %cst_30 {dimension_numbers = #tpu.dot_dimension_numbers<[1], [0], [0], [1], [0, 0, 1, 1], [], []>} : vector<8x8xbf16>, vector<8x8xbf16>, vector<8x8xf32> -> vector<8x8xf32>
    %95 = tpu.concatenate %34, %54, %74, %94 in 1 : vector<8x8xf32>, vector<8x8xf32>, vector<8x8xf32>, vector<8x8xf32> -> vector<8x32xf32>
    %96 = arith.truncf %95 : vector<8x32xf32> to vector<8x32xbf16>
    %c0_31 = arith.constant 0 : index
    %c0_32 = arith.constant 0 : index
    %97 = vector.load %arg6[%c0_31, %c0_32] : memref<32x32xbf16, #tpu.memory_space<vmem>>, vector<32x32xbf16>
    %cst_33 = arith.constant dense<0.000000e+00> : vector<8x32xf32>
    %98 = tpu.matmul %96, %97, %cst_33 {dimension_numbers = #tpu.dot_dimension_numbers<[1], [0], [0], [1], [0, 0, 1, 1], [], []>} : vector<8x32xbf16>, vector<32x32xbf16>, vector<8x32xf32> -> vector<8x32xf32>
    %99 = arith.extf %1 : vector<8x32xbf16> to vector<8x32xf32>
    %100 = arith.addf %99, %98 : vector<8x32xf32>
    %c0_34 = arith.constant 0 : index
    %c0_35 = arith.constant 0 : index
    %101 = vector.load %arg7[%c0_34, %c0_35] : memref<1x32xf32, #tpu.memory_space<vmem>>, vector<1x32xf32>
    %c0_36 = arith.constant 0 : index
    %c0_37 = arith.constant 0 : index
    %102 = vector.load %arg8[%c0_36, %c0_37] : memref<1x32xf32, #tpu.memory_space<vmem>>, vector<1x32xf32>
    %cst_38 = arith.constant dense<0.000000e+00> : vector<8xf32>
    %103 = vector.multi_reduction <add>, %100, %cst_38 [1] : vector<8x32xf32> to vector<8xf32>
    %104 = vector.shape_cast %103 : vector<8xf32> to vector<8x1xf32>
    %cst_39 = arith.constant 3.200000e+01 : f32
    %105 = vector.broadcast %cst_39 : f32 to vector<8x1xf32>
    %106 = arith.divf %104, %105 : vector<8x1xf32>
    %107 = vector.broadcast %106 : vector<8x1xf32> to vector<8x32xf32>
    %108 = arith.subf %100, %107 : vector<8x32xf32>
    %109 = arith.mulf %108, %108 : vector<8x32xf32>
    %cst_40 = arith.constant dense<0.000000e+00> : vector<8xf32>
    %110 = vector.multi_reduction <add>, %109, %cst_40 [1] : vector<8x32xf32> to vector<8xf32>
    %111 = vector.shape_cast %110 : vector<8xf32> to vector<8x1xf32>
    %cst_41 = arith.constant 3.200000e+01 : f32
    %112 = vector.broadcast %cst_41 : f32 to vector<8x1xf32>
    %113 = arith.divf %111, %112 : vector<8x1xf32>
    %114 = vector.broadcast %106 : vector<8x1xf32> to vector<8x32xf32>
    %115 = arith.subf %100, %114 : vector<8x32xf32>
    %cst_42 = arith.constant 9.99999974E-6 : f32
    %116 = vector.broadcast %cst_42 : f32 to vector<8x1xf32>
    %117 = arith.addf %113, %116 : vector<8x1xf32>
    %118 = math.rsqrt %117 : vector<8x1xf32>
    %119 = vector.broadcast %118 : vector<8x1xf32> to vector<8x32xf32>
    %120 = arith.mulf %115, %119 : vector<8x32xf32>
    %121 = vector.broadcast %101 : vector<1x32xf32> to vector<8x32xf32>
    %122 = arith.mulf %120, %121 : vector<8x32xf32>
    %123 = vector.broadcast %102 : vector<1x32xf32> to vector<8x32xf32>
    %124 = arith.addf %122, %123 : vector<8x32xf32>
    %125 = arith.truncf %124 : vector<8x32xf32> to vector<8x32xbf16>
    %c0_43 = arith.constant 0 : index
    %c0_44 = arith.constant 0 : index
    %c0_45 = arith.constant 0 : index
    %126 = vector.load %arg9[%c0_43, %c0_44, %c0_45] : memref<1x8x32xbf16, #tpu.memory_space<vmem>>, vector<1x8x32xbf16>
    %127 = vector.shape_cast %126 : vector<1x8x32xbf16> to vector<8x32xbf16>
    %128 = vector.shape_cast %125 : vector<8x32xbf16> to vector<1x8x32xbf16>
    tpu.vector_store %arg9[%c0_43, %c0_44, %c0_45], %128 {strides = array<i32>} : memref<1x8x32xbf16, #tpu.memory_space<vmem>>, vector<1x8x32xbf16>,
    return
  }
  func.func @transform_0(%arg0: i32, %arg1: i32, %arg2: memref<2xi32, #tpu.memory_space<smem>>) -> (i32, i32, i32) {
    %c0_i32 = arith.constant 0 : i32
    %c0_i32_0 = arith.constant 0 : i32
    return %arg0, %arg1, %c0_i32 : i32, i32, i32
  }
  func.func @transform_1(%arg0: i32, %arg1: i32, %arg2: memref<2xi32, #tpu.memory_space<smem>>) -> (i32, i32, i32) {
    %c0_i32 = arith.constant 0 : i32
    %c0_i32_0 = arith.constant 0 : i32
    %c0_i32_1 = arith.constant 0 : i32
    return %arg0, %c0_i32, %c0_i32_0 : i32, i32, i32
  }
  func.func @transform_2(%arg0: i32, %arg1: i32, %arg2: memref<2xi32, #tpu.memory_space<smem>>) -> (i32, i32, i32) {
    %c0_i32 = arith.constant 0 : i32
    %c0_i32_0 = arith.constant 0 : i32
    return %arg0, %arg1, %c0_i32 : i32, i32, i32
  }
  func.func @transform_3(%arg0: i32, %arg1: i32, %arg2: memref<2xi32, #tpu.memory_space<smem>>) -> (i32, i32) {
    %c0_i32 = arith.constant 0 : i32
    %c0_i32_0 = arith.constant 0 : i32
    %c0_i32_1 = arith.constant 0 : i32
    return %c0_i32, %c0_i32_0 : i32, i32
  }
  func.func @transform_4(%arg0: i32, %arg1: i32, %arg2: memref<2xi32, #tpu.memory_space<smem>>) -> (i32, i32) {
    %c0_i32 = arith.constant 0 : i32
    %c0_i32_0 = arith.constant 0 : i32
    %c0_i32_1 = arith.constant 0 : i32
    return %c0_i32, %c0_i32_0 : i32, i32
  }
  func.func @transform_5(%arg0: i32, %arg1: i32, %arg2: memref<2xi32, #tpu.memory_space<smem>>) -> (i32, i32) {
    %c0_i32 = arith.constant 0 : i32
    %c0_i32_0 = arith.constant 0 : i32
    %c0_i32_1 = arith.constant 0 : i32
    return %c0_i32, %c0_i32_0 : i32, i32
  }
  func.func @transform_6(%arg0: i32, %arg1: i32, %arg2: memref<2xi32, #tpu.memory_space<smem>>) -> (i32, i32, i32) {
    %c0_i32 = arith.constant 0 : i32
    %c0_i32_0 = arith.constant 0 : i32
    return %arg0, %arg1, %c0_i32 : i32, i32, i32
  }
}

module attributes {stable_mosaic.version = 11 : i64} {
  func.func @_dense_kernel(%arg0: i32, %arg1: i32, %arg2: memref<16x32xbf16, #tpu.memory_space<vmem>>, %arg3: memref<32x128xbf16, #tpu.memory_space<vmem>>, %arg4: memref<1x128xf32, #tpu.memory_space<vmem>>, %arg5: memref<16x128xf32, #tpu.memory_space<vmem>>) attributes {dimension_semantics = [#tpu.dimension_semantics<parallel>, #tpu.dimension_semantics<parallel>], iteration_bounds = array<i64: 1, 1>, scalar_prefetch = 0 : i64, scratch_operands = 0 : i64, tpu.core_type = #tpu.core_type<tc>, window_params = [{transform_indices = @transform_0, window_bounds = array<i64: 16, 32>}, {transform_indices = @transform_1, window_bounds = array<i64: 32, 128>}, {transform_indices = @transform_2, window_bounds = array<i64: 1, 128>}, {transform_indices = @transform_3, window_bounds = array<i64: 16, 128>}]} {
    %c0 = arith.constant 0 : index
    %c0_0 = arith.constant 0 : index
    %0 = vector.load %arg2[%c0, %c0_0] : memref<16x32xbf16, #tpu.memory_space<vmem>>, vector<16x32xbf16>
    %c0_1 = arith.constant 0 : index
    %c0_2 = arith.constant 0 : index
    %1 = vector.load %arg3[%c0_1, %c0_2] : memref<32x128xbf16, #tpu.memory_space<vmem>>, vector<32x128xbf16>
    %cst = arith.constant dense<0.000000e+00> : vector<16x128xf32>
    %2 = tpu.matmul %0, %1, %cst {dimension_numbers = #tpu.dot_dimension_numbers<[1], [0], [0], [1], [0, 0, 1, 1], [], []>} : vector<16x32xbf16>, vector<32x128xbf16>, vector<16x128xf32> -> vector<16x128xf32>
    %c0_3 = arith.constant 0 : index
    %c0_4 = arith.constant 0 : index
    %3 = vector.load %arg4[%c0_3, %c0_4] : memref<1x128xf32, #tpu.memory_space<vmem>>, vector<1x128xf32>
    %4 = vector.broadcast %3 : vector<1x128xf32> to vector<16x128xf32>
    %5 = arith.addf %2, %4 : vector<16x128xf32>
    %c0_5 = arith.constant 0 : index
    %c0_6 = arith.constant 0 : index
    %6 = vector.load %arg5[%c0_5, %c0_6] : memref<16x128xf32, #tpu.memory_space<vmem>>, vector<16x128xf32>
    tpu.vector_store %arg5[%c0_5, %c0_6], %5 {strides = array<i32>} : memref<16x128xf32, #tpu.memory_space<vmem>>, vector<16x128xf32>,
    return
  }
  func.func @transform_0(%arg0: i32, %arg1: i32) -> (i32, i32) {
    %c0_i32 = arith.constant 0 : i32
    %c0_i32_0 = arith.constant 0 : i32
    return %arg0, %c0_i32 : i32, i32
  }
  func.func @transform_1(%arg0: i32, %arg1: i32) -> (i32, i32) {
    %c0_i32 = arith.constant 0 : i32
    %c0_i32_0 = arith.constant 0 : i32
    return %c0_i32, %arg1 : i32, i32
  }
  func.func @transform_2(%arg0: i32, %arg1: i32) -> (i32, i32) {
    %c0_i32 = arith.constant 0 : i32
    %c0_i32_0 = arith.constant 0 : i32
    return %c0_i32, %arg1 : i32, i32
  }
  func.func @transform_3(%arg0: i32, %arg1: i32) -> (i32, i32) {
    %c0_i32 = arith.constant 0 : i32
    return %arg0, %arg1 : i32, i32
  }
}

module attributes {stable_mosaic.version = 11 : i64} {
  func.func @_attn_addnorm_kernel(%arg0: i32, %arg1: i32, %arg2: memref<2xi32, #tpu.memory_space<smem>>, %arg3: memref<1x8x32xbf16, #tpu.memory_space<vmem>>, %arg4: memref<1x8x64xbf16, #tpu.memory_space<vmem>>, %arg5: memref<1x8x32xbf16, #tpu.memory_space<vmem>>, %arg6: memref<32x32xbf16, #tpu.memory_space<vmem>>, %arg7: memref<1x32xf32, #tpu.memory_space<vmem>>, %arg8: memref<1x32xf32, #tpu.memory_space<vmem>>, %arg9: memref<1x8x32xbf16, #tpu.memory_space<vmem>>) attributes {dimension_semantics = [#tpu.dimension_semantics<parallel>, #tpu.dimension_semantics<parallel>], iteration_bounds = array<i64: 2, 1>, scalar_prefetch = 1 : i64, scratch_operands = 0 : i64, tpu.core_type = #tpu.core_type<tc>, window_params = [{transform_indices = @transform_0, window_bounds = array<i64: 1, 8, 32>}, {transform_indices = @transform_1, window_bounds = array<i64: 1, 8, 64>}, {transform_indices = @transform_2, window_bounds = array<i64: 1, 8, 32>}, {pipeline_mode = #tpu.pipeline_mode<synchronous>, transform_indices = @transform_3, window_bounds = array<i64: 32, 32>}, {pipeline_mode = #tpu.pipeline_mode<synchronous>, transform_indices = @transform_4, window_bounds = array<i64: 1, 32>}, {pipeline_mode = #tpu.pipeline_mode<synchronous>, transform_indices = @transform_5, window_bounds = array<i64: 1, 32>}, {transform_indices = @transform_6, window_bounds = array<i64: 1, 8, 32>}]} {
    %c0 = arith.constant 0 : index
    %c0_0 = arith.constant 0 : index
    %c0_1 = arith.constant 0 : index
    %0 = vector.load %arg5[%c0, %c0_0, %c0_1] : memref<1x8x32xbf16, #tpu.memory_space<vmem>>, vector<1x8x32xbf16>
    %1 = vector.shape_cast %0 : vector<1x8x32xbf16> to vector<8x32xbf16>
    %c0_2 = arith.constant 0 : index
    %c0_3 = arith.constant 0 : index
    %c0_4 = arith.constant 0 : index
    %2 = vector.load %arg3[%c0_2, %c0_3, %c0_4] : memref<1x8x32xbf16, #tpu.memory_space<vmem>>, vector<1x8x32xbf16>
    %3 = vector.shape_cast %2 : vector<1x8x32xbf16> to vector<8x32xbf16>
    %c0_5 = arith.constant 0 : index
    %c0_6 = arith.constant 0 : index
    %c0_7 = arith.constant 0 : index
    %4 = vector.load %arg4[%c0_5, %c0_6, %c0_7] : memref<1x8x64xbf16, #tpu.memory_space<vmem>>, vector<1x8x64xbf16>
    %5 = vector.shape_cast %4 : vector<1x8x64xbf16> to vector<8x64xbf16>
    %6 = vector.extract_strided_slice %5 {offsets = [0, 0], sizes = [8, 32], strides = [1, 1]} : vector<8x64xbf16> to vector<8x32xbf16>
    %7 = vector.extract_strided_slice %5 {offsets = [0, 32], sizes = [8, 32], strides = [1, 1]} : vector<8x64xbf16> to vector<8x32xbf16>
    %8 = tpu.iota {dimensions = array<i32: 1>} : vector<8x8xi32>
    %9 = arith.index_cast %arg0 : i32 to index
    %10 = memref.load %arg2[%9] : memref<2xi32, #tpu.memory_space<smem>>
    %11 = vector.broadcast %10 : i32 to vector<8x8xi32>
    %12 = arith.cmpi slt, %8, %11 : vector<8x8xi32>
    %13 = vector.extract_strided_slice %3 {offsets = [0, 0], sizes = [8, 8], strides = [1, 1]} : vector<8x32xbf16> to vector<8x8xbf16>
    %14 = vector.extract_strided_slice %6 {offsets = [0, 0], sizes = [8, 8], strides = [1, 1]} : vector<8x32xbf16> to vector<8x8xbf16>
    %15 = vector.extract_strided_slice %7 {offsets = [0, 0], sizes = [8, 8], strides = [1, 1]} : vector<8x32xbf16> to vector<8x8xbf16>
    %cst = arith.constant dense<0.000000e+00> : vector<8x8xf32>
    %16 = tpu.matmul %13, %14, %cst {dimension_numbers = #tpu.dot_dimension_numbers<[1], [1], [0], [0], [0, 0, 1, 0], [], []>} : vector<8x8xbf16>, vector<8x8xbf16>, vector<8x8xf32> -> vector<8x8xf32>
    %cst_8 = arith.constant 0.353553385 : f32
    %17 = vector.broadcast %cst_8 : f32 to vector<8x8xf32>
    %18 = arith.mulf %16, %17 : vector<8x8xf32>
    %cst_9 = arith.constant -1.000000e+06 : f32
    %19 = vector.broadcast %cst_9 : f32 to vector<8x8xf32>
    %20 = arith.select %12, %18, %19 : vector<8x8xi1>, vector<8x8xf32>
    %cst_10 = arith.constant dense<0xFF800000> : vector<8xf32>
    %21 = vector.multi_reduction <maximumf>, %20, %cst_10 [1] : vector<8x8xf32> to vector<8xf32>
    %22 = vector.shape_cast %21 : vector<8xf32> to vector<8x1xf32>
    %23 = vector.broadcast %22 : vector<8x1xf32> to vector<8x8xf32>
    %24 = arith.subf %20, %23 : vector<8x8xf32>
    %25 = math.exp %24 : vector<8x8xf32>
    %cst_11 = arith.constant dense<0.000000e+00> : vector<8xf32>
    %26 = vector.multi_reduction <add>, %25, %cst_11 [1] : vector<8x8xf32> to vector<8xf32>
    %27 = vector.shape_cast %26 : vector<8xf32> to vector<8x1xf32>
    %28 = tpu.reciprocal %27 {approx = true} : vector<8x1xf32> -> vector<8x1xf32>
    %29 = vector.broadcast %28 : vector<8x1xf32> to vector<8x8xf32>
    %30 = arith.mulf %25, %29 : vector<8x8xf32>
    %31 = arith.truncf %30 : vector<8x8xf32> to vector<8x8xbf16>
    %cst_12 = arith.constant dense<0.000000e+00> : vector<8x8xf32>
    %32 = tpu.matmul %31, %15, %cst_12 {dimension_numbers = #tpu.dot_dimension_numbers<[1], [0], [0], [1], [0, 0, 1, 1], [], []>} : vector<8x8xbf16>, vector<8x8xbf16>, vector<8x8xf32> -> vector<8x8xf32>
    %33 = vector.extract_strided_slice %3 {offsets = [0, 8], sizes = [8, 8], strides = [1, 1]} : vector<8x32xbf16> to vector<8x8xbf16>
    %34 = vector.extract_strided_slice %6 {offsets = [0, 8], sizes = [8, 8], strides = [1, 1]} : vector<8x32xbf16> to vector<8x8xbf16>
    %35 = vector.extract_strided_slice %7 {offsets = [0, 8], sizes = [8, 8], strides = [1, 1]} : vector<8x32xbf16> to vector<8x8xbf16>
    %cst_13 = arith.constant dense<0.000000e+00> : vector<8x8xf32>
    %36 = tpu.matmul %33, %34, %cst_13 {dimension_numbers = #tpu.dot_dimension_numbers<[1], [1], [0], [0], [0, 0, 1, 0], [], []>} : vector<8x8xbf16>, vector<8x8xbf16>, vector<8x8xf32> -> vector<8x8xf32>
    %cst_14 = arith.constant 0.353553385 : f32
    %37 = vector.broadcast %cst_14 : f32 to vector<8x8xf32>
    %38 = arith.mulf %36, %37 : vector<8x8xf32>
    %cst_15 = arith.constant -1.000000e+06 : f32
    %39 = vector.broadcast %cst_15 : f32 to vector<8x8xf32>
    %40 = arith.select %12, %38, %39 : vector<8x8xi1>, vector<8x8xf32>
    %cst_16 = arith.constant dense<0xFF800000> : vector<8xf32>
    %41 = vector.multi_reduction <maximumf>, %40, %cst_16 [1] : vector<8x8xf32> to vector<8xf32>
    %42 = vector.shape_cast %41 : vector<8xf32> to vector<8x1xf32>
    %43 = vector.broadcast %42 : vector<8x1xf32> to vector<8x8xf32>
    %44 = arith.subf %40, %43 : vector<8x8xf32>
    %45 = math.exp %44 : vector<8x8xf32>
    %cst_17 = arith.constant dense<0.000000e+00> : vector<8xf32>
    %46 = vector.multi_reduction <add>, %45, %cst_17 [1] : vector<8x8xf32> to vector<8xf32>
    %47 = vector.shape_cast %46 : vector<8xf32> to vector<8x1xf32>
    %48 = tpu.reciprocal %47 {approx = true} : vector<8x1xf32> -> vector<8x1xf32>
    %49 = vector.broadcast %48 : vector<8x1xf32> to vector<8x8xf32>
    %50 = arith.mulf %45, %49 : vector<8x8xf32>
    %51 = arith.truncf %50 : vector<8x8xf32> to vector<8x8xbf16>
    %cst_18 = arith.constant dense<0.000000e+00> : vector<8x8xf32>
    %52 = tpu.matmul %51, %35, %cst_18 {dimension_numbers = #tpu.dot_dimension_numbers<[1], [0], [0], [1], [0, 0, 1, 1], [], []>} : vector<8x8xbf16>, vector<8x8xbf16>, vector<8x8xf32> -> vector<8x8xf32>
    %53 = vector.extract_strided_slice %3 {offsets = [0, 16], sizes = [8, 8], strides = [1, 1]} : vector<8x32xbf16> to vector<8x8xbf16>
    %54 = vector.extract_strided_slice %6 {offsets = [0, 16], sizes = [8, 8], strides = [1, 1]} : vector<8x32xbf16> to vector<8x8xbf16>
    %55 = vector.extract_strided_slice %7 {offsets = [0, 16], sizes = [8, 8], strides = [1, 1]} : vector<8x32xbf16> to vector<8x8xbf16>
    %cst_19 = arith.constant dense<0.000000e+00> : vector<8x8xf32>
    %56 = tpu.matmul %53, %54, %cst_19 {dimension_numbers = #tpu.dot_dimension_numbers<[1], [1], [0], [0], [0, 0, 1, 0], [], []>} : vector<8x8xbf16>, vector<8x8xbf16>, vector<8x8xf32> -> vector<8x8xf32>
    %cst_20 = arith.constant 0.353553385 : f32
    %57 = vector.broadcast %cst_20 : f32 to vector<8x8xf32>
    %58 = arith.mulf %56, %57 : vector<8x8xf32>
    %cst_21 = arith.constant -1.000000e+06 : f32
    %59 = vector.broadcast %cst_21 : f32 to vector<8x8xf32>
    %60 = arith.select %12, %58, %59 : vector<8x8xi1>, vector<8x8xf32>
    %cst_22 = arith.constant dense<0xFF800000> : vector<8xf32>
    %61 = vector.multi_reduction <maximumf>, %60, %cst_22 [1] : vector<8x8xf32> to vector<8xf32>
    %62 = vector.shape_cast %61 : vector<8xf32> to vector<8x1xf32>
    %63 = vector.broadcast %62 : vector<8x1xf32> to vector<8x8xf32>
    %64 = arith.subf %60, %63 : vector<8x8xf32>
    %65 = math.exp %64 : vector<8x8xf32>
    %cst_23 = arith.constant dense<0.000000e+00> : vector<8xf32>
    %66 = vector.multi_reduction <add>, %65, %cst_23 [1] : vector<8x8xf32> to vector<8xf32>
    %67 = vector.shape_cast %66 : vector<8xf32> to vector<8x1xf32>
    %68 = tpu.reciprocal %67 {approx = true} : vector<8x1xf32> -> vector<8x1xf32>
    %69 = vector.broadcast %68 : vector<8x1xf32> to vector<8x8xf32>
    %70 = arith.mulf %65, %69 : vector<8x8xf32>
    %71 = arith.truncf %70 : vector<8x8xf32> to vector<8x8xbf16>
    %cst_24 = arith.constant dense<0.000000e+00> : vector<8x8xf32>
    %72 = tpu.matmul %71, %55, %cst_24 {dimension_numbers = #tpu.dot_dimension_numbers<[1], [0], [0], [1], [0, 0, 1, 1], [], []>} : vector<8x8xbf16>, vector<8x8xbf16>, vector<8x8xf32> -> vector<8x8xf32>
    %73 = vector.extract_strided_slice %3 {offsets = [0, 24], sizes = [8, 8], strides = [1, 1]} : vector<8x32xbf16> to vector<8x8xbf16>
    %74 = vector.extract_strided_slice %6 {offsets = [0, 24], sizes = [8, 8], strides = [1, 1]} : vector<8x32xbf16> to vector<8x8xbf16>
    %75 = vector.extract_strided_slice %7 {offsets = [0, 24], sizes = [8, 8], strides = [1, 1]} : vector<8x32xbf16> to vector<8x8xbf16>
    %cst_25 = arith.constant dense<0.000000e+00> : vector<8x8xf32>
    %76 = tpu.matmul %73, %74, %cst_25 {dimension_numbers = #tpu.dot_dimension_numbers<[1], [1], [0], [0], [0, 0, 1, 0], [], []>} : vector<8x8xbf16>, vector<8x8xbf16>, vector<8x8xf32> -> vector<8x8xf32>
    %cst_26 = arith.constant 0.353553385 : f32
    %77 = vector.broadcast %cst_26 : f32 to vector<8x8xf32>
    %78 = arith.mulf %76, %77 : vector<8x8xf32>
    %cst_27 = arith.constant -1.000000e+06 : f32
    %79 = vector.broadcast %cst_27 : f32 to vector<8x8xf32>
    %80 = arith.select %12, %78, %79 : vector<8x8xi1>, vector<8x8xf32>
    %cst_28 = arith.constant dense<0xFF800000> : vector<8xf32>
    %81 = vector.multi_reduction <maximumf>, %80, %cst_28 [1] : vector<8x8xf32> to vector<8xf32>
    %82 = vector.shape_cast %81 : vector<8xf32> to vector<8x1xf32>
    %83 = vector.broadcast %82 : vector<8x1xf32> to vector<8x8xf32>
    %84 = arith.subf %80, %83 : vector<8x8xf32>
    %85 = math.exp %84 : vector<8x8xf32>
    %cst_29 = arith.constant dense<0.000000e+00> : vector<8xf32>
    %86 = vector.multi_reduction <add>, %85, %cst_29 [1] : vector<8x8xf32> to vector<8xf32>
    %87 = vector.shape_cast %86 : vector<8xf32> to vector<8x1xf32>
    %88 = tpu.reciprocal %87 {approx = true} : vector<8x1xf32> -> vector<8x1xf32>
    %89 = vector.broadcast %88 : vector<8x1xf32> to vector<8x8xf32>
    %90 = arith.mulf %85, %89 : vector<8x8xf32>
    %91 = arith.truncf %90 : vector<8x8xf32> to vector<8x8xbf16>
    %cst_30 = arith.constant dense<0.000000e+00> : vector<8x8xf32>
    %92 = tpu.matmul %91, %75, %cst_30 {dimension_numbers = #tpu.dot_dimension_numbers<[1], [0], [0], [1], [0, 0, 1, 1], [], []>} : vector<8x8xbf16>, vector<8x8xbf16>, vector<8x8xf32> -> vector<8x8xf32>
    %93 = tpu.concatenate %32, %52, %72, %92 in 1 : vector<8x8xf32>, vector<8x8xf32>, vector<8x8xf32>, vector<8x8xf32> -> vector<8x32xf32>
    %94 = arith.truncf %93 : vector<8x32xf32> to vector<8x32xbf16>
    %c0_31 = arith.constant 0 : index
    %c0_32 = arith.constant 0 : index
    %95 = vector.load %arg6[%c0_31, %c0_32] : memref<32x32xbf16, #tpu.memory_space<vmem>>, vector<32x32xbf16>
    %cst_33 = arith.constant dense<0.000000e+00> : vector<8x32xf32>
    %96 = tpu.matmul %94, %95, %cst_33 {dimension_numbers = #tpu.dot_dimension_numbers<[1], [0], [0], [1], [0, 0, 1, 1], [], []>} : vector<8x32xbf16>, vector<32x32xbf16>, vector<8x32xf32> -> vector<8x32xf32>
    %97 = arith.extf %1 : vector<8x32xbf16> to vector<8x32xf32>
    %98 = arith.addf %97, %96 : vector<8x32xf32>
    %c0_34 = arith.constant 0 : index
    %c0_35 = arith.constant 0 : index
    %99 = vector.load %arg7[%c0_34, %c0_35] : memref<1x32xf32, #tpu.memory_space<vmem>>, vector<1x32xf32>
    %c0_36 = arith.constant 0 : index
    %c0_37 = arith.constant 0 : index
    %100 = vector.load %arg8[%c0_36, %c0_37] : memref<1x32xf32, #tpu.memory_space<vmem>>, vector<1x32xf32>
    %cst_38 = arith.constant dense<0.000000e+00> : vector<8xf32>
    %101 = vector.multi_reduction <add>, %98, %cst_38 [1] : vector<8x32xf32> to vector<8xf32>
    %102 = vector.shape_cast %101 : vector<8xf32> to vector<8x1xf32>
    %cst_39 = arith.constant 3.200000e+01 : f32
    %103 = vector.broadcast %cst_39 : f32 to vector<8x1xf32>
    %104 = arith.divf %102, %103 : vector<8x1xf32>
    %105 = vector.broadcast %104 : vector<8x1xf32> to vector<8x32xf32>
    %106 = arith.subf %98, %105 : vector<8x32xf32>
    %107 = arith.mulf %106, %106 : vector<8x32xf32>
    %cst_40 = arith.constant dense<0.000000e+00> : vector<8xf32>
    %108 = vector.multi_reduction <add>, %107, %cst_40 [1] : vector<8x32xf32> to vector<8xf32>
    %109 = vector.shape_cast %108 : vector<8xf32> to vector<8x1xf32>
    %cst_41 = arith.constant 3.200000e+01 : f32
    %110 = vector.broadcast %cst_41 : f32 to vector<8x1xf32>
    %111 = arith.divf %109, %110 : vector<8x1xf32>
    %112 = vector.broadcast %104 : vector<8x1xf32> to vector<8x32xf32>
    %113 = arith.subf %98, %112 : vector<8x32xf32>
    %cst_42 = arith.constant 9.99999974E-6 : f32
    %114 = vector.broadcast %cst_42 : f32 to vector<8x1xf32>
    %115 = arith.addf %111, %114 : vector<8x1xf32>
    %116 = math.rsqrt %115 : vector<8x1xf32>
    %117 = vector.broadcast %116 : vector<8x1xf32> to vector<8x32xf32>
    %118 = arith.mulf %113, %117 : vector<8x32xf32>
    %119 = vector.broadcast %99 : vector<1x32xf32> to vector<8x32xf32>
    %120 = arith.mulf %118, %119 : vector<8x32xf32>
    %121 = vector.broadcast %100 : vector<1x32xf32> to vector<8x32xf32>
    %122 = arith.addf %120, %121 : vector<8x32xf32>
    %123 = arith.truncf %122 : vector<8x32xf32> to vector<8x32xbf16>
    %c0_43 = arith.constant 0 : index
    %c0_44 = arith.constant 0 : index
    %c0_45 = arith.constant 0 : index
    %124 = vector.load %arg9[%c0_43, %c0_44, %c0_45] : memref<1x8x32xbf16, #tpu.memory_space<vmem>>, vector<1x8x32xbf16>
    %125 = vector.shape_cast %124 : vector<1x8x32xbf16> to vector<8x32xbf16>
    %126 = vector.shape_cast %123 : vector<8x32xbf16> to vector<1x8x32xbf16>
    tpu.vector_store %arg9[%c0_43, %c0_44, %c0_45], %126 {strides = array<i32>} : memref<1x8x32xbf16, #tpu.memory_space<vmem>>, vector<1x8x32xbf16>,
    return
  }
  func.func @transform_0(%arg0: i32, %arg1: i32, %arg2: memref<2xi32, #tpu.memory_space<smem>>) -> (i32, i32, i32) {
    %c0_i32 = arith.constant 0 : i32
    %c0_i32_0 = arith.constant 0 : i32
    return %arg0, %arg1, %c0_i32 : i32, i32, i32
  }
  func.func @transform_1(%arg0: i32, %arg1: i32, %arg2: memref<2xi32, #tpu.memory_space<smem>>) -> (i32, i32, i32) {
    %c0_i32 = arith.constant 0 : i32
    %c0_i32_0 = arith.constant 0 : i32
    %c0_i32_1 = arith.constant 0 : i32
    return %arg0, %c0_i32, %c0_i32_0 : i32, i32, i32
  }
  func.func @transform_2(%arg0: i32, %arg1: i32, %arg2: memref<2xi32, #tpu.memory_space<smem>>) -> (i32, i32, i32) {
    %c0_i32 = arith.constant 0 : i32
    %c0_i32_0 = arith.constant 0 : i32
    return %arg0, %arg1, %c0_i32 : i32, i32, i32
  }
  func.func @transform_3(%arg0: i32, %arg1: i32, %arg2: memref<2xi32, #tpu.memory_space<smem>>) -> (i32, i32) {
    %c0_i32 = arith.constant 0 : i32
    %c0_i32_0 = arith.constant 0 : i32
    %c0_i32_1 = arith.constant 0 : i32
    return %c0_i32, %c0_i32_0 : i32, i32
  }
  func.func @transform_4(%arg0: i32, %arg1: i32, %arg2: memref<2xi32, #tpu.memory_space<smem>>) -> (i32, i32) {
    %c0_i32 = arith.constant 0 : i32
    %c0_i32_0 = arith.constant 0 : i32
    %c0_i32_1 = arith.constant 0 : i32
    return %c0_i32, %c0_i32_0 : i32, i32
  }
  func.func @transform_5(%arg0: i32, %arg1: i32, %arg2: memref<2xi32, #tpu.memory_space<smem>>) -> (i32, i32) {
    %c0_i32 = arith.constant 0 : i32
    %c0_i32_0 = arith.constant 0 : i32
    %c0_i32_1 = arith.constant 0 : i32
    return %c0_i32, %c0_i32_0 : i32, i32
  }
  func.func @transform_6(%arg0: i32, %arg1: i32, %arg2: memref<2xi32, #tpu.memory_space<smem>>) -> (i32, i32, i32) {
    %c0_i32 = arith.constant 0 : i32
    %c0_i32_0 = arith.constant 0 : i32
    return %arg0, %arg1, %c0_i32 : i32, i32, i32
  }
}

</mosaic_0001>

<bundles_post_ra>
// kernel: encoder_decoder_forward.19
= control target key start
LH: loop header
LB: loop body
LE: loop exit
PB: predicated region body
PF: predicated region fallthrough
CT: control target
= control target key end

     0   :  { %v214_v0 = vmov 0.0   ;;  %vm215_vm0 = vmmov 0   ;;  %s261_s1 = inlined_call_operand.vmem [shape: bf16[128,128], index: 1, kind: input, shape index: {}]   ;;  %s262_s0 = inlined_call_operand.vmem [shape: bf16[16,128], index: 0, kind: input, shape index: {}]   ;;  %s263_s2 = inlined_call_operand.vmem [shape: bf16[16,128], index: 2, kind: output, shape index: {}]  }
   0x1   :  { %183 = vmatprep.subr.bf16.mxu0 %v214_v0  ;;  %v205_v1 = vld [vmem:[%s261_s1 + $0x38] sm:$0xff]   ;;  %199 = vmatprep.mubr.msk.bf16.mxu0 %vm215_vm0, %v214_v0  ;;  %v206_v2 = vld [vmem:[%s261_s1 + $0x30] sm:$0xff]   ;;  %v207_v3 = vld [vmem:[%s261_s1 + $0x28] sm:$0xff]  }
   0x2   :  { %184 = vmatpush3.bf16.msra.mxu0 %v205_v1  ;;  %v208_v4 = vld [vmem:[%s261_s1 + $0x20] sm:$0xff]   ;;  %v209_v5 = vld [vmem:[%s261_s1 + $0x18] sm:$0xff]   ;;  %v210_v6 = vld [vmem:[%s261_s1 + $0x10] sm:$0xff]  }
   0x3   :  { %185 = vmatprep.subr.bf16.mxu0 %v214_v0  ;;  %v211_v7 = vld [vmem:[%s261_s1 + $0x8] sm:$0xff]   ;;  %v212_v8 = vld [vmem:[%s261_s1] sm:$0xff]  }
   0x4   :  { %v213_v9 = vld [vmem:[%s262_s0] sm:$0xff]  }
   0x6   :  { %186 = vmatpush3.bf16.msra.mxu0 %v206_v2 }
   0x7   :  { %187 = vmatprep.subr.bf16.mxu0 %v214_v0 }
   0xa   :  { %188 = vmatpush3.bf16.msra.mxu0 %v207_v3 }
   0xb   :  { %189 = vmatprep.subr.bf16.mxu0 %v214_v0 }
   0xe   :  { %190 = vmatpush3.bf16.msra.mxu0 %v208_v4 }
   0xf   :  { %191 = vmatprep.subr.bf16.mxu0 %v214_v0 }
  0x12   :  { %192 = vmatpush3.bf16.msra.mxu0 %v209_v5 }
  0x13   :  { %193 = vmatprep.subr.bf16.mxu0 %v214_v0 }
  0x16   :  { %194 = vmatpush3.bf16.msra.mxu0 %v210_v6 }
  0x17   :  { %195 = vmatprep.subr.bf16.mxu0 %v214_v0 }
  0x1a   :  { %196 = vmatpush3.bf16.msra.mxu0 %v211_v7 }
  0x1b   :  { %197 = vmatprep.subr.bf16.mxu0 %v214_v0 }
  0x1e   :  { %198 = vmatpush3.bf16.msra.mxu0 %v212_v8 }
  0x21   :  { %200 = vmatmul.mubr.bf16.vlgmr.msra.gmra.mxu0 %v213_v9 }
  0xe1   :  { %v126_v10 = vpop.f32.mrf.mxu0 }
  0xe3   :  { %v201_v11 = vpop.f32.mrf.mxu0 }
  0xe5   :  { %v129_v12 = vpop.f32.mrf.mxu0 }
  0xe6   :  { %v172_v13 = vpack.c.bf16 %v129_v12, %v126_v10 }
  0xe7   :  { %v202_v14 = vpop.f32.mrf.mxu0 }
  0xe8   :  { %173 = vst [vmem:[%s263_s2] sm:$0xff] %v172_v13  }

// kernel: encoder_decoder_forward.21
= control target key start
LH: loop header
LB: loop body
LE: loop exit
PB: predicated region body
PF: predicated region fallthrough
CT: control target
= control target key end

     0   :  { %vm31_vm0 = vcmask 261120   ;;  %v384_v0 = vmov 0.0   ;;  %vm385_vm1 = vmmov 0   ;;  %vm296_vm2 = vcmask 257024   ;;  %s489_s1 = inlined_call_operand.vmem [shape: bf16[32,128], index: 1, kind: input, shape index: {}]   ;;  %s490_s3 = inlined_call_operand.vmem [shape: bf16[128,32], index: 3, kind: input, shape index: {}]   ;;  %s491_s0 = inlined_call_operand.vmem [shape: bf16[16,32], index: 0, kind: input, shape index: {}]   ;;  %s492_s2 = inlined_call_operand.vmem [shape: f32[1,128], index: 2, kind: input, shape index: {}]   ;;  %s493_s4 = inlined_call_operand.vmem [shape: f32[1,32], index: 4, kind: input, shape index: {}]   ;;  %s494_s5 = inlined_call_operand.vmem [shape: f32[1,32], index: 5, kind: input, shape index: {}]   ;;  %s495_s6 = inlined_call_operand.vmem [shape: f32[1,32], index: 6, kind: input, shape index: {}]   ;;  %s496_s7 = inlined_call_operand.vmem [shape: bf16[16,32], index: 7, kind: output, shape index: {}]  }
   0x1   :  { %339 = vmatprep.subr.bf16.mxu0 %v384_v0  ;;  %v369_v1 = vld [vmem:[%s489_s1 + $0x8] sm:$0xff]   ;;  %343 = vmatprep.mubr.msk.bf16.mxu0 %vm385_vm1, %v384_v0  ;;  %32 = vst.msk [vmem:[#allocation2] sm:$0xff] %vm31_vm0, %v384_v0  ;;  %33 = vst.msk [vmem:[#allocation2 + $0x8] sm:$0xff] %vm31_vm0, %v384_v0  ;;  %v370_v2 = vld [vmem:[%s489_s1] sm:$0xff]  }
   0x2   :  { %347 = vmatprep.subr.bf16.mxu1 %v384_v0  ;;  %363 = vmatprep.mubr.msk.bf16.mxu1 %vm385_vm1, %v384_v0  ;;  %v372_v3 = vld [vmem:[%s490_s3 + $0x38] sm:$0xff]   ;;  %v371_v4 = vld [vmem:[%s491_s0] sm:$0xff]   ;;  %v373_v5 = vld [vmem:[%s490_s3 + $0x30] sm:$0xff]  }
   0x3   :  { %340 = vmatpush3.bf16.msra.mxu0 %v369_v1  ;;  %348 = vmatpush3.bf16.msra.mxu1 %v372_v3  ;;  %v374_v6 = vld [vmem:[%s490_s3 + $0x28] sm:$0xff]   ;;  %v375_v7 = vld [vmem:[%s490_s3 + $0x20] sm:$0xff]   ;;  %v376_v8 = vld [vmem:[%s490_s3 + $0x18] sm:$0xff]  }
   0x4   :  { %341 = vmatprep.subr.bf16.mxu0 %v384_v0  ;;  %349 = vmatprep.subr.bf16.mxu1 %v384_v0  ;;  %v377_v9 = vld [vmem:[%s490_s3 + $0x10] sm:$0xff]   ;;  %v378_v10 = vld [vmem:[%s490_s3 + $0x8] sm:$0xff]   ;;  %v379_v11 = vld [vmem:[%s490_s3] sm:$0xff]  }
   0x5   :  { %v303_v12 = vld [vmem:[%s492_s2] ss:$0 sm:$0xff] }
   0x6   :  { %v324_v28 = vld [vmem:[%s491_s0] sm:$0xff]  }
   0x7   :  { %342 = vmatpush3.bf16.msra.mxu0 %v370_v2  ;;  %350 = vmatpush3.bf16.msra.mxu1 %v373_v5  ;;  %v325_v31 = vunpack.c.l.bf16 %v324_v28  ;;  %v316_v33 = vld [vmem:[%s493_s4] ss:$0 sm:$0xff]  ;;  %v326_v35 = vunpack.c.h.bf16 %v324_v28 }
   0x8   :  { %351 = vmatprep.subr.bf16.mxu1 %v384_v0  ;;  %v112_v22 = vld [vmem:[#allocation2] sm:$0xff]  ;;  %v113_v26 = vld [vmem:[#allocation2 + $0x8] sm:$0xff] }
   0x9   :  { %v317_v59 = vld [vmem:[%s494_s5] ss:$0 sm:$0xff] }
   0xa   :  { %344 = vmatmul.mubr.msk.bf16.vlgmr.msra.gmra.mxu0 %vm31_vm0, %v371_v4  ;;  %v318_v61 = vld [vmem:[%s495_s6] ss:$0 sm:$0xff] }
   0xb   :  { %352 = vmatpush3.bf16.msra.mxu1 %v374_v6 }
   0xc   :  { %353 = vmatprep.subr.bf16.mxu1 %v384_v0 }
   0xf   :  { %354 = vmatpush3.bf16.msra.mxu1 %v375_v7 }
  0x10   :  { %355 = vmatprep.subr.bf16.mxu1 %v384_v0 }
  0x13   :  { %356 = vmatpush3.bf16.msra.mxu1 %v376_v8 }
  0x14   :  { %357 = vmatprep.subr.bf16.mxu1 %v384_v0 }
  0x17   :  { %358 = vmatpush3.bf16.msra.mxu1 %v377_v9 }
  0x18   :  { %359 = vmatprep.subr.bf16.mxu1 %v384_v0 }
  0x1b   :  { %360 = vmatpush3.bf16.msra.mxu1 %v378_v10 }
  0x1c   :  { %361 = vmatprep.subr.bf16.mxu1 %v384_v0 }
  0x1f   :  { %362 = vmatpush3.bf16.msra.mxu1 %v379_v11 }
  0xca   :  { %v102_v13 = vpop.f32.mrf.mxu0 }
  0xcb   :  { %v103_v15 = vadd.f32 %v303_v12, %v102_v13 }
  0xcc   :  { %v345_v14 = vpop.f32.mrf.mxu0 }
  0xcd   :  { %v109_v19 = vmax.f32 %v103_v15, 0.0 }
  0xce   :  { %v105_v16 = vpop.f32.mrf.mxu0 }
  0xcf   :  { %v106_v17 = vadd.f32 %v303_v12, %v105_v16 }
  0xd0   :  { %v346_v18 = vpop.f32.mrf.mxu0 }
  0xd1   :  { %v110_v20 = vmax.f32 %v106_v17, 0.0 }
  0xd3   :  { %v111_v21 = vpack.c.bf16 %v110_v20, %v109_v19 }
  0xd5   :  { %364 = vmatmul.mubr.bf16.vlgmr.msra.gmra.mxu1 %v111_v21 }
 0x195   :  { %v212_v23 = vpop.f32.mrf.mxu1 }
 0x196   :  { %v219_v24 = vadd.f32 %v212_v23, %v112_v22 }
 0x197   :  { %v365_v25 = vpop.f32.mrf.mxu1 }
 0x198   :  { %221 = vst.msk [vmem:[#allocation2] sm:$0xff] %vm31_vm0, %v219_v24 }
 0x199   :  { %v215_v27 = vpop.f32.mrf.mxu1 }
 0x19a   :  { %v220_v29 = vadd.f32 %v215_v27, %v113_v26 }
 0x19b   :  { %v366_v30 = vpop.f32.mrf.mxu1 }
 0x19c   :  { %222 = vst.msk [vmem:[#allocation2 + $0x8] sm:$0xff] %vm31_vm0, %v220_v29 }
 0x19f   :  { %v230_v32 = vld [vmem:[#allocation2] sm:$0xff] }
 0x1a0   :  { %v232_v34 = vadd.f32 %v325_v31, %v230_v32 }
 0x1a2   :  { %v241_v36 = vadd.f32 %v316_v33, %v232_v34 }
 0x1a3   :  { %v231_v37 = vld [vmem:[#allocation2 + $0x8] sm:$0xff] }
 0x1a4   :  { %v245_v38 = vsel %vm31_vm0, %v241_v36, 0.0  ;;  %v233_v39 = vadd.f32 %v326_v35, %v231_v37 }
 0x1a5   :  { %246 = vadd.xlane.f32.xlu0 %v245_v38 }
 0x1a6   :  { %v242_v40 = vadd.f32 %v316_v33, %v233_v39 }
 0x1a8   :  { %v248_v41 = vsel %vm31_vm0, %v242_v40, 0.0 }
 0x1a9   :  { %249 = vadd.xlane.f32.xlu0 %v248_v41 }
 0x22e   :  { %v247_v42 = vpop.xlane.xlu0 %246 }
 0x22f   :  { %v252_v43 = vmul.f32 0.03125, %v247_v42 }
 0x231   :  { %v254_v44 = vsub.f32 %v241_v36, %v252_v43 }
 0x232   :  { %v250_v45 = vpop.xlane.xlu0 %249 }
 0x233   :  { %v253_v46 = vmul.f32 0.03125, %v250_v45  ;;  %v256_v47 = vmul.f32 %v254_v44, %v254_v44 }
 0x235   :  { %v255_v48 = vsub.f32 %v242_v40, %v253_v46  ;;  %v258_v49 = vsel %vm31_vm0, %v256_v47, 0.0 }
 0x236   :  { %259 = vadd.xlane.f32.xlu1 %v258_v49 }
 0x237   :  { %v257_v50 = vmul.f32 %v255_v48, %v255_v48 }
 0x239   :  { %v261_v51 = vsel %vm31_vm0, %v257_v50, 0.0 }
 0x23a   :  { %262 = vadd.xlane.f32.xlu1 %v261_v51 }
 0x2bf   :  { %v260_v52 = vpop.xlane.xlu1 %259 }
 0x2c0   :  { %v264_v53 = vmul.f32 0.03125, %v260_v52 }
 0x2c2   :  { %v266_v54 = vadd.f32 1e-05, %v264_v53 }
 0x2c3   :  { %v263_v55 = vpop.xlane.xlu1 %262 }
 0x2c4   :  { %380 = vrsqrt.f32 %v266_v54  ;;  %v265_v56 = vmul.f32 0.03125, %v263_v55 }
 0x2c6   :  { %v267_v57 = vadd.f32 1e-05, %v265_v56 }
 0x2c8   :  { %382 = vrsqrt.f32 %v267_v57 }
 0x2d1   :  { %v381_v58 = vpop.eup %380 }
 0x2d2   :  { %v270_v60 = vmul.f32 %v381_v58, %v254_v44 }
 0x2d4   :  { %v278_v62 = vmul.f32 %v317_v59, %v270_v60 }
 0x2d5   :  { %v383_v63 = vpop.eup %382 }
 0x2d6   :  { %v286_v0 = vadd.f32 %v318_v61, %v278_v62  ;;  %v271_v1 = vmul.f32 %v383_v63, %v255_v48 }
 0x2d8   :  { %v321_v2 = vpack.c.bf16 %v286_v0, %v286_v0  ;;  %v279_v3 = vmul.f32 %v317_v59, %v271_v1 }
 0x2da   :  { %297 = vst.msk [vmem:[%s496_s7] sm:$0xf] %vm296_vm2, %v321_v2  ;;  %v287_v4 = vadd.f32 %v318_v61, %v279_v3 }
 0x2dc   :  { %v322_v5 = vpack.c.bf16 %v287_v4, %v287_v4 }
 0x2de   :  { %298 = vst.msk [vmem:[%s496_s7 + $0x4] sm:$0xf] %vm296_vm2, %v322_v5 }

// kernel: encoder_decoder_forward.20
= control target key start
LH: loop header
LB: loop body
LE: loop exit
PB: predicated region body
PF: predicated region fallthrough
CT: control target
= control target key end

     0   :  { %s1411_s0 = inlined_call_operand.vmem [shape: s32[2], index: 0, kind: input, shape index: {}]   ;;  %s1412_s1 = inlined_call_operand.vmem [shape: bf16[2,8,96], index: 1, kind: input, shape index: {}, may-alias: {1,2}]   ;;  %s1413_s2 = inlined_call_operand.vmem [shape: bf16[2,8,96], index: 2, kind: input, shape index: {}, may-alias: {1,2}]   ;;  %s1414_s3 = inlined_call_operand.vmem [shape: bf16[2,8,32], index: 3, kind: input, shape index: {}]   ;;  %s1415_s4 = inlined_call_operand.vmem [shape: bf16[32,32], index: 4, kind: input, shape index: {}]   ;;  %s1416_s5 = inlined_call_operand.vmem [shape: f32[1,32], index: 5, kind: input, shape index: {}]   ;;  %s1417_s6 = inlined_call_operand.vmem [shape: f32[1,32], index: 6, kind: input, shape index: {}]   ;;  %s1418_s7 = inlined_call_operand.vmem [shape: bf16[2,8,32], index: 7, kind: output, shape index: {}]  }
   0x1   :  { %s12_s26 = sshll.u32 %s1411_s0, 4  ;;  %s13_s26 = int_to_ptr.vmem [resolvable:$true] %s12_s26 }
   0x2   :  { %s1171_s27 = scalar_lea.vmem %s13_s26, 16  ;;  %p1176_p1 = scmp.lt.s32.totalorder %s13_s26, %s13_s26 }
   0x3   :  { %p1172_p0 = scmp.ne.s32.totalorder %s13_s26, %s1171_s27  ;;  %p1177_p2 = scmp.lt.s32.totalorder %s1171_s27, %s1171_s27 }
   0x5   :  { %p1178_p3 = por %p1177_p2, %p1176_p1 }
   0x7   :  { %p1179_p4 = pnand %p1178_p3, %p1172_p0 }
   0x9   :  { %1182 = shalt.err (!%p1179_p4)  }
   0xa   :  { %s1209_s28 = smov [#allocation3]  }
   0xb   :  { %15 = dma.vmem_to_smem %s13_s26, 16, %s1209_s28, [#allocation2] }
   0xc   :  { %1195 = dma.done.wait [#allocation2], 16 }
   0xd   :  { %1196 = vsyncadd [#allocation2], 4294967280 }
   0xe   :  { %17 = sfence }
   0xf   :  { %s1269_s29 = smov 0   ;;  %s1271_s30 = smov 0  }
  0x10   :  { %s1273_s8 = smov 0  }
  0x11 LB: > { %s35_s0 = sadd.s32 1, %s1203_s30  ;;  %p1011_p5 = scmp.ge.s32.totalorder %s1207_s8, 1  ;;  %s1207_s8 = sphi %s1273_s8, %s23_s8   ;;  %s1203_s30 = sphi %s1271_s30, %s1422_s30   ;;  %s1199_s29 = sphi %s1269_s29, %s1421_s29  }
  0x12   : > { %p37_p6 = scmp.ge.s32.totalorder %s35_s0, 2  ;;  %p260_p7 = scmp.lt.s32.totalorder %s1207_s8, 3 }
  0x14   : > { %s1424_s0 = smov (%p37_p6, %s35_s0), 0  ;;  %p261_p8 = pnand %p1011_p5, %p260_p7 }
  0x15   : > { %p305_p9 = scmp.lt.s32.totalorder (!%p261_p8), %s1199_s29, 1  ;;  %s1212_s17 = smov (!%p261_p8), 64  }
  0x16   : > { %264 = sbr.rel (%p261_p8) target bundleno = 2053 (0x805), region = 44  ;;  %s1213_s18 = smov (!%p261_p8), 96  }
  0x17   : > { %s1214_s19 = smov (!%p261_p8), 120   ;;  %s336_s20 = sld [smem:[#allocation3 + %s1199_s29]] (!%p261_p8) }
  0x18   : > { %s1215_s21 = smov (!%p261_p8), 104   ;;  %s1216_s22 = smov (!%p261_p8), 56  }
  0x19   : > { %s1217_s23 = smov (!%p261_p8), 112   ;;  %s1218_s24 = smov (!%p261_p8), 48  }
  0x1a   : > { %s1219_s25 = smov (!%p261_p8), 40   ;;  %s1220_s26 = smov (!%p261_p8), 88  }
  0x1b   : > { %v1210_v0 = vmov 0.0   ;;  %vm1211_vm0 = vmmov 0   ;;  %s306_s9 = scalar_select %p305_p9, %s1199_s29, 1  ;;  %vm344_vm1 = vcmask 64512   ;;  %v334_v6 = vlaneseq }
  0x1c   : > { %1052 = vmatprep.subr.bf16.mxu0 %v1210_v0  ;;  %1054 = vmatprep.mubr.msk.bf16.mxu0 %vm1211_vm0, %v1210_v0  ;;  %vm413_vm3 = vcmask 1043456   ;;  %s1221_s27 = smov 80   ;;  %s1222_s28 = smov 72   ;;  %vm806_vm4 = vcmask 130048   ;;  %vm808_vm5 = vcmask 195584   ;;  %vm827_vm6 = vcmask 261120  }
  0x1d   : > { %1058 = vmatprep.subr.bf16.mxu1 %v1210_v0  ;;  %1060 = vmatprep.mubr.msk.bf16.mxu1 %vm1211_vm0, %v1210_v0  ;;  %s1297_s10 = sshll.u32 %s306_s9, 2  ;;  %v335_v7 = vand.u32 127, %v334_v6  ;;  %v337_v8 = vstv %s336_s20  ;;  %s1223_s29 = smov 8   ;;  %vm904_vm7 = vcmask 257024  }
  0x1e   : > { %s311_s13 = scalar_lea.vmem %s1412_s1, %s1297_s10  ;;  %s315_s16 = scalar_lea.vmem %s1413_s2, %s1297_s10 }
  0x1f   : > { %v1149_v1 = vld [vmem:[%s311_s13] ss:$0 sps:$4 sm:$0xff]   ;;  %vm1317_vm2 = vcmp.lt.s32.totalorder %v335_v7, %v337_v8  ;;  %s1224_s14 = smov 16   ;;  %s1225_s15 = smov 24  }
  0x20   : > { %v333_v2 = vld [vmem:[%s315_s16] sm:$0xf]  ;;  %342 = vrot.lane.b32.xlu0 %v1149_v1, %s1212_s17 }
  0x21   : > { %v349_v3 = vsel %vm344_vm1, %v333_v2, 0  ;;  %v1312_v5 = vcombine.low %v333_v2, %v333_v2 }
  0x22   : > { %1053 = vmatpush3.bf16.xpose.msra.mxu0 %v349_v3 }
  0x23   : > { %1070 = vmatprep.subr.bf16.mxu0 %v1210_v0  ;;  %408 = vrot.lane.b32.xlu1 %v1312_v5, %s1213_s18  ;;  %s322_s18 = scalar_lea.vmem %s1414_s3, %s1297_s10 }
  0x27   : > { %459 = vrot.lane.b32.xlu1 %v1312_v5, %s1214_s19 }
  0x92   : > { %v343_v4 = vpop.permute.xlu0 %342 }
  0x93   : > { %1055 = vmatmul.mubr.msk.bf16.vlgmr.msra.gmra.mxu0 %vm344_vm1, %v343_v4 }
  0x94   : > { %1072 = vmatprep.mubr.msk.bf16.mxu0 %vm1211_vm0, %v1210_v0 }
  0x95   : > { %v409_v17 = vpop.permute.xlu1 %408 }
  0x96   : > { %v415_v18 = vsel %vm413_vm3, %v409_v17, 0 }
  0x97   : > { %1059 = vmatpush3.bf16.msra.mxu1 %v415_v18 }
  0x98   : > { %1064 = vmatprep.subr.bf16.mxu1 %v1210_v0 }
  0x99   : > { %v460_v24 = vpop.permute.xlu1 %459 }
  0x9a   : > { %v465_v30 = vsel %vm344_vm1, %v460_v24, 0 }
 0x153   : > { %v385_v9 = vpop.f32.mrf.mxu0 }
 0x154   : > { %v391_v11 = vmul.f32 0.35355338, %v385_v9 }
 0x155   : > { %v1056_v12 = vpop.f32.mrf.mxu0 }
 0x156   : > { %v392_v13 = vsel %vm1317_vm2, %v391_v11, -1000000.0 }
 0x157   : > { %v388_v14 = vpop.f32.mrf.mxu0  ;;  %v393_v15 = vsel %vm344_vm1, %v392_v13, -inf }
 0x158   : > { %394 = vmax.xlane.f32.xlu0 %v393_v15 }
 0x159   : > { %v1057_v16 = vpop.f32.mrf.mxu0 }
 0x16e   : > { %683 = vrot.lane.b32.xlu0 %v1312_v5, %s1215_s21 }
 0x1e1   : > { %v395_v19 = vpop.xlane.xlu0 %394 }
 0x1e2   : > { %v396_v20 = vsub.f32 %v392_v13, %v395_v19 }
 0x1e4   : > { %v397_v21 = vmul.f32 1.442695, %v396_v20 }
 0x1e5   : > { %v684_v33 = vpop.permute.xlu0 %683 }
 0x1e6   : > { %1153 = vpow2.f32 %v397_v21  ;;  %v689_v35 = vsel %vm344_vm1, %v684_v33, 0 }
 0x1f3   : > { %v1154_v22 = vpop.eup %1153 }
 0x1f4   : > { %v399_v23 = vsel %vm344_vm1, %v1154_v22, 0.0 }
 0x1f5   : > { %400 = vadd.xlane.f32.xlu1 %v399_v23 }
 0x206   : > { %457 = vrot.lane.b32.xlu1 %v1149_v1, %s1216_s22 }
 0x20a   : > { %571 = vrot.lane.b32.xlu1 %v1312_v5, %s1217_s23 }
 0x20e   : > { %569 = vrot.lane.b32.xlu1 %v1149_v1, %s1218_s24 }
 0x212   : > { %681 = vrot.lane.b32.xlu1 %v1149_v1, %s1219_s25  ;;  %s329_s25 = scalar_lea.vmem %s1418_s7, %s1297_s10 }
 0x27e   : > { %v401_v25 = vpop.xlane.xlu1 %400 }
 0x27f   : > { %1155 = vrcp.f32 %v401_v25 }
 0x282   : > { %v458_v28 = vpop.permute.xlu1 %457 }
 0x286   : > { %v572_v31 = vpop.permute.xlu1 %571 }
 0x287   : > { %v577_v32 = vsel %vm344_vm1, %v572_v31, 0 }
 0x28a   : > { %v570_v34 = vpop.permute.xlu1 %569 }
 0x28c   : > { %v1156_v26 = vpop.eup %1155 }
 0x28d   : > { %v403_v27 = vmul.f32 %v1156_v26, %v1154_v22 }
 0x28e   : > { %v682_v36 = vpop.permute.xlu1 %681 }
 0x28f   : > { %v404_v29 = vpack.c.bf16 %v403_v27, %v403_v27 }
 0x291   : > { %1061 = vmatmul.mubr.msk.bf16.vlgmr.msra.gmra.mxu1 %vm344_vm1, %v404_v29 }
 0x292   : > { %1065 = vmatpush3.bf16.xpose.msra.mxu1 %v465_v30  ;;  %1066 = vmatprep.mubr.msk.bf16.mxu1 %vm1211_vm0, %v1210_v0 }
 0x293   : > { %1076 = vmatprep.subr.bf16.mxu1 %v1210_v0 }
 0x299   : > { %1067 = vmatmul.mubr.msk.bf16.vlgmr.msra.gmra.mxu1 %vm344_vm1, %v458_v28 }
 0x29a   : > { %1077 = vmatpush3.bf16.xpose.msra.mxu1 %v577_v32  ;;  %1078 = vmatprep.mubr.msk.bf16.mxu1 %vm1211_vm0, %v1210_v0 }
 0x29b   : > { %1088 = vmatprep.subr.bf16.mxu1 %v1210_v0 }
 0x2a1   : > { %1079 = vmatmul.mubr.msk.bf16.vlgmr.msra.gmra.mxu1 %vm344_vm1, %v570_v34 }
 0x2a2   : > { %1089 = vmatpush3.bf16.xpose.msra.mxu1 %v689_v35  ;;  %1090 = vmatprep.mubr.msk.bf16.mxu1 %vm1211_vm0, %v1210_v0 }
 0x2a3   : > { %1100 = vmatprep.subr.bf16.mxu1 %v1210_v0 }
 0x2a9   : > { %1091 = vmatmul.mubr.msk.bf16.vlgmr.msra.gmra.mxu1 %vm344_vm1, %v682_v36  ;;  %v1151_v36 = vld [vmem:[%s1415_s4 + $0x8] sm:$0xff]  }
 0x2aa   : > { %1104 = vmatprep.mubr.msk.bf16.mxu1 %vm1211_vm0, %v1210_v0  ;;  %1101 = vmatpush3.bf16.msra.mxu1 %v1151_v36 }
 0x2ab   : > { %1102 = vmatprep.subr.bf16.mxu1 %v1210_v0 }
 0x351   : > { %v1347_v37 = vpop.f32.mrf.mxu1 }
 0x353   : > { %v1062_v38 = vpop.f32.mrf.mxu1 }
 0x354   : > { %v1152_v38 = vld [vmem:[%s1415_s4] sm:$0xff]  }
 0x355   : > { %v454_v39 = vpop.f32.mrf.mxu1  ;;  %1103 = vmatpush3.bf16.msra.mxu1 %v1152_v38 }
 0x357   : > { %v1063_v40 = vpop.f32.mrf.mxu1 }
 0x359   : > { %v501_v41 = vpop.f32.mrf.mxu1 }
 0x35a   : > { %v507_v42 = vmul.f32 0.35355338, %v501_v41 }
 0x35b   : > { %v1068_v43 = vpop.f32.mrf.mxu1 }
 0x35c   : > { %v508_v44 = vsel %vm1317_vm2, %v507_v42, -1000000.0 }
 0x35d   : > { %v504_v45 = vpop.f32.mrf.mxu1  ;;  %v509_v46 = vsel %vm344_vm1, %v508_v44, -inf }
 0x35e   : > { %510 = vmax.xlane.f32.xlu1 %v509_v46 }
 0x35f   : > { %v1069_v47 = vpop.f32.mrf.mxu1 }
 0x361   : > { %v613_v48 = vpop.f32.mrf.mxu1 }
 0x362   : > { %v619_v49 = vmul.f32 0.35355338, %v613_v48 }
 0x363   : > { %v1080_v50 = vpop.f32.mrf.mxu1 }
 0x364   : > { %v620_v51 = vsel %vm1317_vm2, %v619_v49, -1000000.0 }
 0x365   : > { %v616_v52 = vpop.f32.mrf.mxu1  ;;  %v621_v53 = vsel %vm344_vm1, %v620_v51, -inf }
 0x366   : > { %622 = vmax.xlane.f32.xlu0 %v621_v53  ;;  %v331_v53 = vld [vmem:[%s322_s18] sm:$0xf] }
 0x367   : > { %v1081_v54 = vpop.f32.mrf.mxu1 }
 0x368   : > { %v871_v54 = vunpack.c.l.bf16 %v331_v53 }
 0x369   : > { %v725_v55 = vpop.f32.mrf.mxu1 }
 0x36a   : > { %v731_v56 = vmul.f32 0.35355338, %v725_v55 }
 0x36b   : > { %v1092_v57 = vpop.f32.mrf.mxu1 }
 0x36c   : > { %v732_v58 = vsel %vm1317_vm2, %v731_v56, -1000000.0 }
 0x36d   : > { %v733_v59 = vsel %vm344_vm1, %v732_v58, -inf  ;;  %v728_v60 = vpop.f32.mrf.mxu1 }
 0x36e   : > { %734 = vmax.xlane.f32.xlu1 %v733_v59 }
 0x36f   : > { %v1093_v61 = vpop.f32.mrf.mxu1 }
 0x3e7   : > { %v511_v62 = vpop.xlane.xlu1 %510 }
 0x3e8   : > { %v512_v63 = vsub.f32 %v508_v44, %v511_v62 }
 0x3ea   : > { %v513_v1 = vmul.f32 1.442695, %v512_v63 }
 0x3ec   : > { %1157 = vpow2.f32 %v513_v1 }
 0x3ef   : > { %v623_v10 = vpop.xlane.xlu0 %622 }
 0x3f0   : > { %v624_v11 = vsub.f32 %v620_v51, %v623_v10 }
 0x3f2   : > { %v625_v12 = vmul.f32 1.442695, %v624_v11 }
 0x3f7   : > { %v735_v2 = vpop.xlane.xlu1 %734 }
 0x3f8   : > { %v736_v3 = vsub.f32 %v732_v58, %v735_v2 }
 0x3f9   : > { %v1158_v4 = vpop.eup %1157 }
 0x3fa   : > { %v737_v6 = vmul.f32 1.442695, %v736_v3  ;;  %v515_v7 = vsel %vm344_vm1, %v1158_v4, 0.0 }
 0x3fb   : > { %516 = vadd.xlane.f32.xlu1 %v515_v7  ;;  %v1029_v7 = vld [vmem:[%s1416_s5] ss:$0 sm:$0xff] }
 0x3fc   : > { %1159 = vpow2.f32 %v737_v6 }
 0x3fd   : > { %1161 = vpow2.f32 %v625_v12 }
 0x409   : > { %v1160_v8 = vpop.eup %1159 }
 0x40a   : > { %v739_v9 = vsel %vm344_vm1, %v1160_v8, 0.0  ;;  %v1162_v13 = vpop.eup %1161 }
 0x40b   : > { %740 = vadd.xlane.f32.xlu0 %v739_v9  ;;  %v627_v14 = vsel %vm344_vm1, %v1162_v13, 0.0  ;;  %v1030_v9 = vld [vmem:[%s1417_s6] ss:$0 sm:$0xff] }
 0x40c   : > { %521 = vrot.lane.b32.xlu1 %v1312_v5, %s1220_s26 }
 0x421   : > { %633 = vrot.lane.b32.xlu0 %v1312_v5, %s1221_s27 }
 0x430   : > { %628 = vadd.xlane.f32.xlu1 %v627_v14 }
 0x441   : > { %745 = vrot.lane.b32.xlu1 %v1312_v5, %s1222_s28 }
 0x484   : > { %v517_v15 = vpop.xlane.xlu1 %516 }
 0x485   : > { %1163 = vrcp.f32 %v517_v15 }
 0x488   : > { %v522_v16 = vpop.permute.xlu1 %521 }
 0x489   : > { %v527_v17 = vsel %vm413_vm3, %v522_v16, 0 }
 0x48a   : > { %1071 = vmatpush3.bf16.msra.mxu0 %v527_v17 }
 0x48b   : > { %1082 = vmatprep.subr.bf16.mxu0 %v1210_v0 }
 0x492   : > { %v1164_v18 = vpop.eup %1163 }
 0x493   : > { %v519_v19 = vmul.f32 %v1164_v18, %v1158_v4 }
 0x494   : > { %v741_v20 = vpop.xlane.xlu0 %740 }
 0x495   : > { %v520_v21 = vpack.c.bf16 %v519_v19, %v519_v19 }
 0x497   : > { %1073 = vmatmul.mubr.msk.bf16.vlgmr.msra.gmra.mxu0 %vm344_vm1, %v520_v21 }
 0x498   : > { %v634_v22 = vpop.permute.xlu0 %633  ;;  %1084 = vmatprep.mubr.msk.bf16.mxu0 %vm1211_vm0, %v1210_v0 }
 0x499   : > { %v639_v5 = vsel %vm413_vm3, %v634_v22, 0 }
 0x49a   : > { %1083 = vmatpush3.bf16.msra.mxu0 %v639_v5 }
 0x49b   : > { %1094 = vmatprep.subr.bf16.mxu0 %v1210_v0 }
 0x4b9   : > { %v629_v23 = vpop.xlane.xlu1 %628 }
 0x4ba   : > { %1165 = vrcp.f32 %v629_v23 }
 0x4bb   : > { %1167 = vrcp.f32 %v741_v20 }
 0x4bd   : > { %v746_v25 = vpop.permute.xlu1 %745 }
 0x4be   : > { %v751_v27 = vsel %vm413_vm3, %v746_v25, 0 }
 0x4c7   : > { %v1166_v24 = vpop.eup %1165 }
 0x4c8   : > { %v631_v26 = vmul.f32 %v1166_v24, %v1162_v13  ;;  %v1168_v29 = vpop.eup %1167 }
 0x4c9   : > { %v743_v30 = vmul.f32 %v1168_v29, %v1160_v8 }
 0x4ca   : > { %v632_v28 = vpack.c.bf16 %v631_v26, %v631_v26 }
 0x4cb   : > { %v744_v31 = vpack.c.bf16 %v743_v30, %v743_v30 }
 0x4cc   : > { %1085 = vmatmul.mubr.msk.bf16.vlgmr.msra.gmra.mxu0 %vm344_vm1, %v632_v28 }
 0x4cd   : > { %1095 = vmatpush3.bf16.msra.mxu0 %v751_v27  ;;  %1096 = vmatprep.mubr.msk.bf16.mxu0 %vm1211_vm0, %v1210_v0 }
 0x4d4   : > { %1097 = vmatmul.mubr.msk.bf16.vlgmr.msra.gmra.mxu0 %vm344_vm1, %v744_v31 }
 0x557   : > { %v563_v32 = vpop.f32.mrf.mxu0 }
 0x558   : > { %794 = vrot.lane.b32.xlu1 %v563_v32, %s1223_s29 }
 0x559   : > { %v1074_v33 = vpop.f32.mrf.mxu0 }
 0x55b   : > { %v566_v34 = vpop.f32.mrf.mxu0 }
 0x55d   : > { %v1075_v35 = vpop.f32.mrf.mxu0 }
 0x58c   : > { %v675_v39 = vpop.f32.mrf.mxu0 }
 0x58d   : > { %798 = vrot.lane.b32.xlu0 %v675_v39, %s1224_s14 }
 0x58e   : > { %v1086_v40 = vpop.f32.mrf.mxu0 }
 0x590   : > { %v678_v41 = vpop.f32.mrf.mxu0 }
 0x592   : > { %v1087_v42 = vpop.f32.mrf.mxu0 }
 0x594   : > { %v787_v43 = vpop.f32.mrf.mxu0 }
 0x595   : > { %802 = vrot.lane.b32.xlu1 %v787_v43, %s1225_s15 }
 0x596   : > { %v1098_v44 = vpop.f32.mrf.mxu0 }
 0x598   : > { %v790_v45 = vpop.f32.mrf.mxu0 }
 0x59a   : > { %v1099_v46 = vpop.f32.mrf.mxu0 }
 0x5ca   : > { %v795_v47 = vpop.permute.xlu1 %794 }
 0x5cb   : > { %v805_v0 = vsel %vm344_vm1, %v1347_v37, %v795_v47 }
 0x5ff   : > { %v799_v48 = vpop.permute.xlu0 %798 }
 0x600   : > { %v807_v49 = vsel %vm806_vm4, %v805_v0, %v799_v48 }
 0x607   : > { %v803_v50 = vpop.permute.xlu1 %802 }
 0x608   : > { %v809_v51 = vsel %vm808_vm5, %v807_v49, %v803_v50 }
 0x609   : > { %v810_v52 = vpack.c.bf16 %v809_v51, %v809_v51 }
 0x60b   : > { %1105 = vmatmul.mubr.msk.bf16.vlgmr.msra.gmra.mxu1 %vm827_vm6, %v810_v52 }
 0x6cb   : > { %v865_v55 = vpop.f32.mrf.mxu1 }
 0x6cc   : > { %v872_v56 = vadd.f32 %v871_v54, %v865_v55 }
 0x6cd   : > { %v1106_v57 = vpop.f32.mrf.mxu1 }
 0x6ce   : > { %v875_v58 = vsel %vm827_vm6, %v872_v56, 0.0 }
 0x6cf   : > { %876 = vadd.xlane.f32.xlu0 %v875_v58  ;;  %v868_v37 = vpop.f32.mrf.mxu1 }
 0x6d1   : > { %v1107_v59 = vpop.f32.mrf.mxu1 }
 0x758   : > { %v877_v60 = vpop.xlane.xlu0 %876 }
 0x759   : > { %v879_v61 = vmul.f32 0.03125, %v877_v60 }
 0x75b   : > { %v880_v62 = vsub.f32 %v872_v56, %v879_v61 }
 0x75d   : > { %v881_v63 = vmul.f32 %v880_v62, %v880_v62 }
 0x75f   : > { %v882_v1 = vsel %vm827_vm6, %v881_v63, 0.0 }
 0x760   : > { %883 = vadd.xlane.f32.xlu1 %v882_v1 }
 0x7e9   : > { %v884_v2 = vpop.xlane.xlu1 %883 }
 0x7ea   : > { %v885_v3 = vmul.f32 0.03125, %v884_v2 }
 0x7ec   : > { %v886_v4 = vadd.f32 1e-05, %v885_v3 }
 0x7ee   : > { %1169 = vrsqrt.f32 %v886_v4 }
 0x7fb   : > { %v1170_v6 = vpop.eup %1169 }
 0x7fc   : > { %v888_v8 = vmul.f32 %v1170_v6, %v880_v62 }
 0x7fe   : > { %v895_v10 = vmul.f32 %v1029_v7, %v888_v8 }
 0x800   : > { %v902_v11 = vadd.f32 %v1030_v9, %v895_v10 }
 0x802   : > { %v903_v12 = vpack.c.bf16 %v902_v11, %v902_v11 }
 0x804   : > { %905 = vst.msk [vmem:[%s329_s25] sm:$0xf] %vm904_vm7, %v903_v12 }
 0x805 PF: > { %s23_s8 = sadd.s32 1, %s1207_s8   ;;  %s1421_s29 = smov %s1203_s30 }
 0x806   : > { %p20_p10 = scmp.ge.s32.totalorder %s23_s8, 4   ;;  %s1422_s30 = smov %s1424_s0 }
 0x808   :  { %22 = sbr.rel (!%p20_p10) target bundleno = 17 (0x11), region = 80 }

// kernel: encoder_decoder_forward.26
= control target key start
LH: loop header
LB: loop body
LE: loop exit
PB: predicated region body
PF: predicated region fallthrough
CT: control target
= control target key end

     0   :  { %s1415_s0 = inlined_call_operand.vmem [shape: s32[2], index: 0, kind: input, shape index: {}]   ;;  %s1416_s1 = inlined_call_operand.vmem [shape: bf16[2,8,96], index: 1, kind: input, shape index: {}, may-alias: {1,2}]   ;;  %s1417_s2 = inlined_call_operand.vmem [shape: bf16[2,8,96], index: 2, kind: input, shape index: {}, may-alias: {1,2}]   ;;  %s1418_s3 = inlined_call_operand.vmem [shape: bf16[2,8,32], index: 3, kind: input, shape index: {}]   ;;  %s1419_s4 = inlined_call_operand.vmem [shape: bf16[32,32], index: 4, kind: input, shape index: {}]   ;;  %s1420_s5 = inlined_call_operand.vmem [shape: f32[1,32], index: 5, kind: input, shape index: {}]   ;;  %s1421_s6 = inlined_call_operand.vmem [shape: f32[1,32], index: 6, kind: input, shape index: {}]   ;;  %s1422_s7 = inlined_call_operand.vmem [shape: bf16[2,8,32], index: 7, kind: output, shape index: {}]  }
   0x1   :  { %s12_s26 = sshll.u32 %s1415_s0, 4  ;;  %s13_s26 = int_to_ptr.vmem [resolvable:$true] %s12_s26 }
   0x2   :  { %s1174_s27 = scalar_lea.vmem %s13_s26, 16  ;;  %p1179_p1 = scmp.lt.s32.totalorder %s13_s26, %s13_s26 }
   0x3   :  { %p1175_p0 = scmp.ne.s32.totalorder %s13_s26, %s1174_s27  ;;  %p1180_p2 = scmp.lt.s32.totalorder %s1174_s27, %s1174_s27 }
   0x5   :  { %p1181_p3 = por %p1180_p2, %p1179_p1 }
   0x7   :  { %p1182_p4 = pnand %p1181_p3, %p1175_p0 }
   0x9   :  { %1185 = shalt.err (!%p1182_p4)  }
   0xa   :  { %s1212_s28 = smov [#allocation3]  }
   0xb   :  { %15 = dma.vmem_to_smem %s13_s26, 16, %s1212_s28, [#allocation2] }
   0xc   :  { %1198 = dma.done.wait [#allocation2], 16 }
   0xd   :  { %1199 = vsyncadd [#allocation2], 4294967280 }
   0xe   :  { %17 = sfence }
   0xf   :  { %s1272_s29 = smov 0   ;;  %s1274_s30 = smov 0  }
  0x10   :  { %s1276_s8 = smov 0  }
  0x11 LB: > { %s35_s0 = sadd.s32 1, %s1206_s30  ;;  %p1014_p5 = scmp.ge.s32.totalorder %s1210_s8, 1  ;;  %s1210_s8 = sphi %s1276_s8, %s23_s8   ;;  %s1206_s30 = sphi %s1274_s30, %s1424_s30   ;;  %s1202_s29 = sphi %s1272_s29, %s1423_s29  }
  0x12   : > { %p37_p6 = scmp.ge.s32.totalorder %s35_s0, 2  ;;  %p260_p7 = scmp.lt.s32.totalorder %s1210_s8, 3 }
  0x14   : > { %s1426_s0 = smov (%p37_p6, %s35_s0), 0  ;;  %p261_p8 = pnand %p1014_p5, %p260_p7 }
  0x15   : > { %p305_p9 = scmp.lt.s32.totalorder (!%p261_p8), %s1202_s29, 1  ;;  %s1215_s16 = smov (!%p261_p8), 64  }
  0x16   : > { %264 = sbr.rel (%p261_p8) target bundleno = 2052 (0x804), region = 44  ;;  %s1216_s17 = smov (!%p261_p8), 96  }
  0x17   : > { %s1217_s18 = smov (!%p261_p8), 120   ;;  %s1218_s19 = smov (!%p261_p8), 104  }
  0x18   : > { %s1219_s20 = smov (!%p261_p8), 56   ;;  %s1220_s21 = smov (!%p261_p8), 112  }
  0x19   : > { %s1221_s22 = smov (!%p261_p8), 48   ;;  %s1222_s23 = smov (!%p261_p8), 40  }
  0x1a   : > { %s1223_s24 = smov (!%p261_p8), 88   ;;  %s1224_s25 = smov (!%p261_p8), 80  }
  0x1b   : > { %v1213_v0 = vmov 0.0   ;;  %vm1214_vm0 = vmmov 0   ;;  %s1428_s29 = smov (!%p305_p9, %s1202_s29), 1  ;;  %vm347_vm1 = vcmask 64512   ;;  %v334_v6 = vlaneseq  ;;  %s1225_s26 = smov 72  }
  0x1c   : > { %1055 = vmatprep.subr.bf16.mxu0 %v1213_v0  ;;  %1057 = vmatprep.mubr.msk.bf16.mxu0 %vm1214_vm0, %v1213_v0  ;;  %s1296_s9 = sshll.u32 %s1428_s29, 2  ;;  %vm416_vm3 = vcmask 1043456   ;;  %s1226_s27 = smov 8   ;;  %vm809_vm4 = vcmask 130048   ;;  %vm811_vm5 = vcmask 195584   ;;  %vm830_vm6 = vcmask 261120  }
  0x1d   : > { %1061 = vmatprep.subr.bf16.mxu1 %v1213_v0  ;;  %1063 = vmatprep.mubr.msk.bf16.mxu1 %vm1214_vm0, %v1213_v0  ;;  %s311_s12 = scalar_lea.vmem %s1416_s1, %s1296_s9  ;;  %s315_s15 = scalar_lea.vmem %s1417_s2, %s1296_s9  ;;  %v1315_v7 = vand.u32 127, %v334_v6  ;;  %v1317_v8 = vshrl.u32 %v334_v6, 7  ;;  %vm907_vm7 = vcmask 257024  }
  0x1e   : > { %v1152_v1 = vld [vmem:[%s311_s12] ss:$0 sps:$4 sm:$0xff]   ;;  %s1227_s12 = smov 16   ;;  %s1228_s13 = smov 24  }
  0x1f   : > { %v333_v2 = vld [vmem:[%s315_s15] sm:$0xf]  ;;  %345 = vrot.lane.b32.xlu0 %v1152_v1, %s1215_s16  ;;  %vm341_vm2 = vcmp.le.s32.totalorder %v1315_v7, %v1317_v8  ;;  %s322_s16 = scalar_lea.vmem %s1418_s3, %s1296_s9 }
  0x20   : > { %v352_v3 = vsel %vm347_vm1, %v333_v2, 0  ;;  %v1311_v5 = vcombine.low %v333_v2, %v333_v2 }
  0x21   : > { %1056 = vmatpush3.bf16.xpose.msra.mxu0 %v352_v3 }
  0x22   : > { %1073 = vmatprep.subr.bf16.mxu0 %v1213_v0  ;;  %411 = vrot.lane.b32.xlu1 %v1311_v5, %s1216_s17 }
  0x26   : > { %462 = vrot.lane.b32.xlu1 %v1311_v5, %s1217_s18 }
  0x91   : > { %v346_v4 = vpop.permute.xlu0 %345 }
  0x92   : > { %1058 = vmatmul.mubr.msk.bf16.vlgmr.msra.gmra.mxu0 %vm347_vm1, %v346_v4 }
  0x93   : > { %1075 = vmatprep.mubr.msk.bf16.mxu0 %vm1214_vm0, %v1213_v0 }
  0x94   : > { %v412_v16 = vpop.permute.xlu1 %411 }
  0x95   : > { %v418_v17 = vsel %vm416_vm3, %v412_v16, 0 }
  0x96   : > { %1062 = vmatpush3.bf16.msra.mxu1 %v418_v17 }
  0x97   : > { %1067 = vmatprep.subr.bf16.mxu1 %v1213_v0 }
  0x98   : > { %v463_v23 = vpop.permute.xlu1 %462 }
  0x99   : > { %v468_v29 = vsel %vm347_vm1, %v463_v23, 0 }
 0x152   : > { %v388_v9 = vpop.f32.mrf.mxu0 }
 0x153   : > { %v394_v10 = vmul.f32 0.35355338, %v388_v9 }
 0x154   : > { %v1059_v11 = vpop.f32.mrf.mxu0 }
 0x155   : > { %v395_v12 = vsel %vm341_vm2, %v394_v10, -1000000.0 }
 0x156   : > { %v391_v13 = vpop.f32.mrf.mxu0  ;;  %v396_v14 = vsel %vm347_vm1, %v395_v12, -inf }
 0x157   : > { %397 = vmax.xlane.f32.xlu0 %v396_v14 }
 0x158   : > { %v1060_v15 = vpop.f32.mrf.mxu0 }
 0x16d   : > { %686 = vrot.lane.b32.xlu0 %v1311_v5, %s1218_s19 }
 0x1e0   : > { %v398_v18 = vpop.xlane.xlu0 %397 }
 0x1e1   : > { %v399_v19 = vsub.f32 %v395_v12, %v398_v18 }
 0x1e3   : > { %v400_v20 = vmul.f32 1.442695, %v399_v19 }
 0x1e4   : > { %v687_v32 = vpop.permute.xlu0 %686 }
 0x1e5   : > { %1156 = vpow2.f32 %v400_v20  ;;  %v692_v34 = vsel %vm347_vm1, %v687_v32, 0 }
 0x1f2   : > { %v1157_v21 = vpop.eup %1156 }
 0x1f3   : > { %v402_v22 = vsel %vm347_vm1, %v1157_v21, 0.0 }
 0x1f4   : > { %403 = vadd.xlane.f32.xlu1 %v402_v22 }
 0x205   : > { %460 = vrot.lane.b32.xlu1 %v1152_v1, %s1219_s20 }
 0x209   : > { %574 = vrot.lane.b32.xlu1 %v1311_v5, %s1220_s21 }
 0x20d   : > { %572 = vrot.lane.b32.xlu1 %v1152_v1, %s1221_s22 }
 0x211   : > { %684 = vrot.lane.b32.xlu1 %v1152_v1, %s1222_s23  ;;  %s329_s23 = scalar_lea.vmem %s1422_s7, %s1296_s9 }
 0x27d   : > { %v404_v24 = vpop.xlane.xlu1 %403 }
 0x27e   : > { %1158 = vrcp.f32 %v404_v24 }
 0x281   : > { %v461_v27 = vpop.permute.xlu1 %460 }
 0x285   : > { %v575_v30 = vpop.permute.xlu1 %574 }
 0x286   : > { %v580_v31 = vsel %vm347_vm1, %v575_v30, 0 }
 0x289   : > { %v573_v33 = vpop.permute.xlu1 %572 }
 0x28b   : > { %v1159_v25 = vpop.eup %1158 }
 0x28c   : > { %v406_v26 = vmul.f32 %v1159_v25, %v1157_v21 }
 0x28d   : > { %v685_v35 = vpop.permute.xlu1 %684 }
 0x28e   : > { %v407_v28 = vpack.c.bf16 %v406_v26, %v406_v26 }
 0x290   : > { %1064 = vmatmul.mubr.msk.bf16.vlgmr.msra.gmra.mxu1 %vm347_vm1, %v407_v28 }
 0x291   : > { %1068 = vmatpush3.bf16.xpose.msra.mxu1 %v468_v29  ;;  %1069 = vmatprep.mubr.msk.bf16.mxu1 %vm1214_vm0, %v1213_v0 }
 0x292   : > { %1079 = vmatprep.subr.bf16.mxu1 %v1213_v0 }
 0x298   : > { %1070 = vmatmul.mubr.msk.bf16.vlgmr.msra.gmra.mxu1 %vm347_vm1, %v461_v27 }
 0x299   : > { %1080 = vmatpush3.bf16.xpose.msra.mxu1 %v580_v31  ;;  %1081 = vmatprep.mubr.msk.bf16.mxu1 %vm1214_vm0, %v1213_v0 }
 0x29a   : > { %1091 = vmatprep.subr.bf16.mxu1 %v1213_v0 }
 0x2a0   : > { %1082 = vmatmul.mubr.msk.bf16.vlgmr.msra.gmra.mxu1 %vm347_vm1, %v573_v33 }
 0x2a1   : > { %1092 = vmatpush3.bf16.xpose.msra.mxu1 %v692_v34  ;;  %1093 = vmatprep.mubr.msk.bf16.mxu1 %vm1214_vm0, %v1213_v0 }
 0x2a2   : > { %1103 = vmatprep.subr.bf16.mxu1 %v1213_v0 }
 0x2a8   : > { %1094 = vmatmul.mubr.msk.bf16.vlgmr.msra.gmra.mxu1 %vm347_vm1, %v685_v35  ;;  %v1154_v35 = vld [vmem:[%s1419_s4 + $0x8] sm:$0xff]  }
 0x2a9   : > { %1107 = vmatprep.mubr.msk.bf16.mxu1 %vm1214_vm0, %v1213_v0  ;;  %1104 = vmatpush3.bf16.msra.mxu1 %v1154_v35 }
 0x2aa   : > { %1105 = vmatprep.subr.bf16.mxu1 %v1213_v0 }
 0x350   : > { %v1348_v36 = vpop.f32.mrf.mxu1 }
 0x352   : > { %v1065_v37 = vpop.f32.mrf.mxu1 }
 0x353   : > { %v1155_v37 = vld [vmem:[%s1419_s4] sm:$0xff]  }
 0x354   : > { %v457_v38 = vpop.f32.mrf.mxu1  ;;  %1106 = vmatpush3.bf16.msra.mxu1 %v1155_v37 }
 0x356   : > { %v1066_v39 = vpop.f32.mrf.mxu1 }
 0x358   : > { %v504_v40 = vpop.f32.mrf.mxu1 }
 0x359   : > { %v510_v41 = vmul.f32 0.35355338, %v504_v40 }
 0x35a   : > { %v1071_v42 = vpop.f32.mrf.mxu1 }
 0x35b   : > { %v511_v43 = vsel %vm341_vm2, %v510_v41, -1000000.0 }
 0x35c   : > { %v507_v44 = vpop.f32.mrf.mxu1  ;;  %v512_v45 = vsel %vm347_vm1, %v511_v43, -inf }
 0x35d   : > { %513 = vmax.xlane.f32.xlu1 %v512_v45 }
 0x35e   : > { %v1072_v46 = vpop.f32.mrf.mxu1 }
 0x360   : > { %v616_v47 = vpop.f32.mrf.mxu1 }
 0x361   : > { %v622_v48 = vmul.f32 0.35355338, %v616_v47 }
 0x362   : > { %v1083_v49 = vpop.f32.mrf.mxu1 }
 0x363   : > { %v623_v50 = vsel %vm341_vm2, %v622_v48, -1000000.0 }
 0x364   : > { %v619_v51 = vpop.f32.mrf.mxu1  ;;  %v624_v52 = vsel %vm347_vm1, %v623_v50, -inf }
 0x365   : > { %625 = vmax.xlane.f32.xlu0 %v624_v52  ;;  %v331_v52 = vld [vmem:[%s322_s16] sm:$0xf] }
 0x366   : > { %v1084_v53 = vpop.f32.mrf.mxu1 }
 0x367   : > { %v874_v53 = vunpack.c.l.bf16 %v331_v52 }
 0x368   : > { %v728_v54 = vpop.f32.mrf.mxu1 }
 0x369   : > { %v734_v55 = vmul.f32 0.35355338, %v728_v54 }
 0x36a   : > { %v1095_v56 = vpop.f32.mrf.mxu1 }
 0x36b   : > { %v735_v57 = vsel %vm341_vm2, %v734_v55, -1000000.0 }
 0x36c   : > { %v736_v58 = vsel %vm347_vm1, %v735_v57, -inf  ;;  %v731_v59 = vpop.f32.mrf.mxu1 }
 0x36d   : > { %737 = vmax.xlane.f32.xlu1 %v736_v58 }
 0x36e   : > { %v1096_v60 = vpop.f32.mrf.mxu1 }
 0x3e6   : > { %v514_v61 = vpop.xlane.xlu1 %513 }
 0x3e7   : > { %v515_v62 = vsub.f32 %v511_v43, %v514_v61 }
 0x3e9   : > { %v516_v63 = vmul.f32 1.442695, %v515_v62 }
 0x3eb   : > { %1160 = vpow2.f32 %v516_v63 }
 0x3ee   : > { %v626_v8 = vpop.xlane.xlu0 %625 }
 0x3ef   : > { %v627_v10 = vsub.f32 %v623_v50, %v626_v8 }
 0x3f1   : > { %v628_v11 = vmul.f32 1.442695, %v627_v10 }
 0x3f6   : > { %v738_v1 = vpop.xlane.xlu1 %737 }
 0x3f7   : > { %v739_v2 = vsub.f32 %v735_v57, %v738_v1 }
 0x3f8   : > { %v1161_v3 = vpop.eup %1160 }
 0x3f9   : > { %v740_v4 = vmul.f32 1.442695, %v739_v2  ;;  %v518_v6 = vsel %vm347_vm1, %v1161_v3, 0.0 }
 0x3fa   : > { %519 = vadd.xlane.f32.xlu1 %v518_v6  ;;  %v1032_v6 = vld [vmem:[%s1420_s5] ss:$0 sm:$0xff] }
 0x3fb   : > { %1162 = vpow2.f32 %v740_v4 }
 0x3fc   : > { %1164 = vpow2.f32 %v628_v11 }
 0x408   : > { %v1163_v9 = vpop.eup %1162 }
 0x409   : > { %v742_v7 = vsel %vm347_vm1, %v1163_v9, 0.0  ;;  %v1165_v12 = vpop.eup %1164 }
 0x40a   : > { %743 = vadd.xlane.f32.xlu0 %v742_v7  ;;  %v630_v13 = vsel %vm347_vm1, %v1165_v12, 0.0  ;;  %v1033_v7 = vld [vmem:[%s1421_s6] ss:$0 sm:$0xff] }
 0x40b   : > { %524 = vrot.lane.b32.xlu1 %v1311_v5, %s1223_s24 }
 0x420   : > { %636 = vrot.lane.b32.xlu0 %v1311_v5, %s1224_s25 }
 0x42f   : > { %631 = vadd.xlane.f32.xlu1 %v630_v13 }
 0x440   : > { %748 = vrot.lane.b32.xlu1 %v1311_v5, %s1225_s26 }
 0x483   : > { %v520_v14 = vpop.xlane.xlu1 %519 }
 0x484   : > { %1166 = vrcp.f32 %v520_v14 }
 0x487   : > { %v525_v15 = vpop.permute.xlu1 %524 }
 0x488   : > { %v530_v16 = vsel %vm416_vm3, %v525_v15, 0 }
 0x489   : > { %1074 = vmatpush3.bf16.msra.mxu0 %v530_v16 }
 0x48a   : > { %1085 = vmatprep.subr.bf16.mxu0 %v1213_v0 }
 0x491   : > { %v1167_v17 = vpop.eup %1166 }
 0x492   : > { %v522_v18 = vmul.f32 %v1167_v17, %v1161_v3 }
 0x493   : > { %v744_v19 = vpop.xlane.xlu0 %743 }
 0x494   : > { %v523_v20 = vpack.c.bf16 %v522_v18, %v522_v18 }
 0x496   : > { %1076 = vmatmul.mubr.msk.bf16.vlgmr.msra.gmra.mxu0 %vm347_vm1, %v523_v20 }
 0x497   : > { %v637_v21 = vpop.permute.xlu0 %636  ;;  %1087 = vmatprep.mubr.msk.bf16.mxu0 %vm1214_vm0, %v1213_v0 }
 0x498   : > { %v642_v5 = vsel %vm416_vm3, %v637_v21, 0 }
 0x499   : > { %1086 = vmatpush3.bf16.msra.mxu0 %v642_v5 }
 0x49a   : > { %1097 = vmatprep.subr.bf16.mxu0 %v1213_v0 }
 0x4b8   : > { %v632_v22 = vpop.xlane.xlu1 %631 }
 0x4b9   : > { %1168 = vrcp.f32 %v632_v22 }
 0x4ba   : > { %1170 = vrcp.f32 %v744_v19 }
 0x4bc   : > { %v749_v24 = vpop.permute.xlu1 %748 }
 0x4bd   : > { %v754_v26 = vsel %vm416_vm3, %v749_v24, 0 }
 0x4c6   : > { %v1169_v23 = vpop.eup %1168 }
 0x4c7   : > { %v634_v25 = vmul.f32 %v1169_v23, %v1165_v12  ;;  %v1171_v28 = vpop.eup %1170 }
 0x4c8   : > { %v746_v29 = vmul.f32 %v1171_v28, %v1163_v9 }
 0x4c9   : > { %v635_v27 = vpack.c.bf16 %v634_v25, %v634_v25 }
 0x4ca   : > { %v747_v30 = vpack.c.bf16 %v746_v29, %v746_v29 }
 0x4cb   : > { %1088 = vmatmul.mubr.msk.bf16.vlgmr.msra.gmra.mxu0 %vm347_vm1, %v635_v27 }
 0x4cc   : > { %1098 = vmatpush3.bf16.msra.mxu0 %v754_v26  ;;  %1099 = vmatprep.mubr.msk.bf16.mxu0 %vm1214_vm0, %v1213_v0 }
 0x4d3   : > { %1100 = vmatmul.mubr.msk.bf16.vlgmr.msra.gmra.mxu0 %vm347_vm1, %v747_v30 }
 0x556   : > { %v566_v31 = vpop.f32.mrf.mxu0 }
 0x557   : > { %797 = vrot.lane.b32.xlu1 %v566_v31, %s1226_s27 }
 0x558   : > { %v1077_v32 = vpop.f32.mrf.mxu0 }
 0x55a   : > { %v569_v33 = vpop.f32.mrf.mxu0 }
 0x55c   : > { %v1078_v34 = vpop.f32.mrf.mxu0 }
 0x58b   : > { %v678_v38 = vpop.f32.mrf.mxu0 }
 0x58c   : > { %801 = vrot.lane.b32.xlu0 %v678_v38, %s1227_s12 }
 0x58d   : > { %v1089_v39 = vpop.f32.mrf.mxu0 }
 0x58f   : > { %v681_v40 = vpop.f32.mrf.mxu0 }
 0x591   : > { %v1090_v41 = vpop.f32.mrf.mxu0 }
 0x593   : > { %v790_v42 = vpop.f32.mrf.mxu0 }
 0x594   : > { %805 = vrot.lane.b32.xlu1 %v790_v42, %s1228_s13 }
 0x595   : > { %v1101_v43 = vpop.f32.mrf.mxu0 }
 0x597   : > { %v793_v44 = vpop.f32.mrf.mxu0 }
 0x599   : > { %v1102_v45 = vpop.f32.mrf.mxu0 }
 0x5c9   : > { %v798_v46 = vpop.permute.xlu1 %797 }
 0x5ca   : > { %v808_v0 = vsel %vm347_vm1, %v1348_v36, %v798_v46 }
 0x5fe   : > { %v802_v47 = vpop.permute.xlu0 %801 }
 0x5ff   : > { %v810_v48 = vsel %vm809_vm4, %v808_v0, %v802_v47 }
 0x606   : > { %v806_v49 = vpop.permute.xlu1 %805 }
 0x607   : > { %v812_v50 = vsel %vm811_vm5, %v810_v48, %v806_v49 }
 0x608   : > { %v813_v51 = vpack.c.bf16 %v812_v50, %v812_v50 }
 0x60a   : > { %1108 = vmatmul.mubr.msk.bf16.vlgmr.msra.gmra.mxu1 %vm830_vm6, %v813_v51 }
 0x6ca   : > { %v868_v54 = vpop.f32.mrf.mxu1 }
 0x6cb   : > { %v875_v55 = vadd.f32 %v874_v53, %v868_v54 }
 0x6cc   : > { %v1109_v56 = vpop.f32.mrf.mxu1 }
 0x6cd   : > { %v878_v57 = vsel %vm830_vm6, %v875_v55, 0.0 }
 0x6ce   : > { %879 = vadd.xlane.f32.xlu0 %v878_v57  ;;  %v871_v36 = vpop.f32.mrf.mxu1 }
 0x6d0   : > { %v1110_v58 = vpop.f32.mrf.mxu1 }
 0x757   : > { %v880_v59 = vpop.xlane.xlu0 %879 }
 0x758   : > { %v882_v60 = vmul.f32 0.03125, %v880_v59 }
 0x75a   : > { %v883_v61 = vsub.f32 %v875_v55, %v882_v60 }
 0x75c   : > { %v884_v62 = vmul.f32 %v883_v61, %v883_v61 }
 0x75e   : > { %v885_v63 = vsel %vm830_vm6, %v884_v62, 0.0 }
 0x75f   : > { %886 = vadd.xlane.f32.xlu1 %v885_v63 }
 0x7e8   : > { %v887_v1 = vpop.xlane.xlu1 %886 }
 0x7e9   : > { %v888_v2 = vmul.f32 0.03125, %v887_v1 }
 0x7eb   : > { %v889_v3 = vadd.f32 1e-05, %v888_v2 }
 0x7ed   : > { %1172 = vrsqrt.f32 %v889_v3 }
 0x7fa   : > { %v1173_v4 = vpop.eup %1172 }
 0x7fb   : > { %v891_v9 = vmul.f32 %v1173_v4, %v883_v61 }
 0x7fd   : > { %v898_v8 = vmul.f32 %v1032_v6, %v891_v9 }
 0x7ff   : > { %v905_v10 = vadd.f32 %v1033_v7, %v898_v8 }
 0x801   : > { %v906_v11 = vpack.c.bf16 %v905_v10, %v905_v10 }
 0x803   : > { %908 = vst.msk [vmem:[%s329_s23] sm:$0xf] %vm907_vm7, %v906_v11 }
 0x804 PF: > { %s23_s8 = sadd.s32 1, %s1210_s8   ;;  %s1423_s29 = smov %s1206_s30 }
 0x805   : > { %p20_p10 = scmp.ge.s32.totalorder %s23_s8, 4   ;;  %s1424_s30 = smov %s1426_s0 }
 0x807   :  { %22 = sbr.rel (!%p20_p10) target bundleno = 17 (0x11), region = 80 }

// kernel: encoder_decoder_forward.37
= control target key start
LH: loop header
LB: loop body
LE: loop exit
PB: predicated region body
PF: predicated region fallthrough
CT: control target
= control target key end

     0   :  { %v117_v0 = vmov 0.0   ;;  %vm118_vm0 = vmmov 0   ;;  %vm45_vm1 = vcmask 261120   ;;  %s157_s1 = inlined_call_operand.vmem [shape: bf16[32,128], index: 1, kind: input, shape index: {}]   ;;  %s158_s0 = inlined_call_operand.vmem [shape: bf16[16,32], index: 0, kind: input, shape index: {}]   ;;  %s159_s2 = inlined_call_operand.vmem [shape: f32[1,128], index: 2, kind: input, shape index: {}]   ;;  %s160_s3 = inlined_call_operand.vmem [shape: f32[16,128], index: 3, kind: output, shape index: {}]  }
   0x1   :  { %104 = vmatprep.subr.bf16.mxu0 %v117_v0  ;;  %v114_v1 = vld [vmem:[%s157_s1 + $0x8] sm:$0xff]   ;;  %108 = vmatprep.mubr.msk.bf16.mxu0 %vm118_vm0, %v117_v0  ;;  %v115_v2 = vld [vmem:[%s157_s1] sm:$0xff]  }
   0x2   :  { %105 = vmatpush3.bf16.msra.mxu0 %v114_v1  ;;  %v116_v3 = vld [vmem:[%s158_s0] sm:$0xff]  }
   0x3   :  { %106 = vmatprep.subr.bf16.mxu0 %v117_v0  ;;  %v96_v4 = vld [vmem:[%s159_s2] ss:$0 sm:$0xff] }
   0x6   :  { %107 = vmatpush3.bf16.msra.mxu0 %v115_v2 }
   0x9   :  { %109 = vmatmul.mubr.msk.bf16.vlgmr.msra.gmra.mxu0 %vm45_vm1, %v116_v3 }
  0xc9   :  { %v83_v5 = vpop.f32.mrf.mxu0 }
  0xca   :  { %v84_v6 = vadd.f32 %v96_v4, %v83_v5 }
  0xcb   :  { %v110_v7 = vpop.f32.mrf.mxu0 }
  0xcc   :  { %90 = vst [vmem:[%s160_s3] sm:$0xff] %v84_v6 }
  0xcd   :  { %v86_v8 = vpop.f32.mrf.mxu0 }
  0xce   :  { %v87_v9 = vadd.f32 %v96_v4, %v86_v8 }
  0xcf   :  { %v111_v10 = vpop.f32.mrf.mxu0 }
  0xd0   :  { %91 = vst [vmem:[%s160_s3 + $0x8] sm:$0xff] %v87_v9 }

// kernel: encoder_decoder_forward.29
= control target key start
LH: loop header
LB: loop body
LE: loop exit
PB: predicated region body
PF: predicated region fallthrough
CT: control target
= control target key end

     0   :  { %s1396_s0 = inlined_call_operand.vmem [shape: s32[2], index: 0, kind: input, shape index: {}]   ;;  %s1397_s1 = inlined_call_operand.vmem [shape: bf16[2,8,32], index: 1, kind: input, shape index: {}]   ;;  %s1398_s2 = inlined_call_operand.vmem [shape: bf16[2,8,64], index: 2, kind: input, shape index: {}]   ;;  %s1399_s3 = inlined_call_operand.vmem [shape: bf16[2,8,32], index: 3, kind: input, shape index: {}]   ;;  %s1400_s4 = inlined_call_operand.vmem [shape: bf16[32,32], index: 4, kind: input, shape index: {}]   ;;  %s1401_s5 = inlined_call_operand.vmem [shape: f32[1,32], index: 5, kind: input, shape index: {}]   ;;  %s1402_s6 = inlined_call_operand.vmem [shape: f32[1,32], index: 6, kind: input, shape index: {}]   ;;  %s1403_s7 = inlined_call_operand.vmem [shape: bf16[2,8,32], index: 7, kind: output, shape index: {}]  }
   0x1   :  { %s12_s26 = sshll.u32 %s1396_s0, 4  ;;  %s13_s26 = int_to_ptr.vmem [resolvable:$true] %s12_s26 }
   0x2   :  { %s1165_s27 = scalar_lea.vmem %s13_s26, 16  ;;  %p1170_p1 = scmp.lt.s32.totalorder %s13_s26, %s13_s26 }
   0x3   :  { %p1166_p0 = scmp.ne.s32.totalorder %s13_s26, %s1165_s27  ;;  %p1171_p2 = scmp.lt.s32.totalorder %s1165_s27, %s1165_s27 }
   0x5   :  { %p1172_p3 = por %p1171_p2, %p1170_p1 }
   0x7   :  { %p1173_p4 = pnand %p1172_p3, %p1166_p0 }
   0x9   :  { %1176 = shalt.err (!%p1173_p4)  }
   0xa   :  { %s1203_s28 = smov [#allocation3]  }
   0xb   :  { %15 = dma.vmem_to_smem %s13_s26, 16, %s1203_s28, [#allocation2] }
   0xc   :  { %1189 = dma.done.wait [#allocation2], 16 }
   0xd   :  { %1190 = vsyncadd [#allocation2], 4294967280 }
   0xe   :  { %17 = sfence }
   0xf   :  { %s1259_s29 = smov 0   ;;  %s1261_s30 = smov 0  }
  0x10   :  { %s1263_s8 = smov 0  }
  0x11 LB: > { %s35_s0 = sadd.s32 1, %s1197_s30  ;;  %p1009_p5 = scmp.ge.s32.totalorder %s1201_s8, 1  ;;  %s1201_s8 = sphi %s1263_s8, %s23_s8   ;;  %s1197_s30 = sphi %s1261_s30, %s1407_s30   ;;  %s1193_s29 = sphi %s1259_s29, %s1406_s29  }
  0x12   : > { %p37_p6 = scmp.ge.s32.totalorder %s35_s0, 2  ;;  %p260_p7 = scmp.lt.s32.totalorder %s1201_s8, 3 }
  0x14   : > { %s1409_s0 = smov (%p37_p6, %s35_s0), 0  ;;  %p261_p8 = pnand %p1009_p5, %p260_p7 }
  0x15   : > { %p305_p9 = scmp.lt.s32.totalorder (!%p261_p8), %s1193_s29, 1  ;;  %s336_s17 = sld [smem:[#allocation3 + %s1193_s29]] (!%p261_p8) }
  0x16   : > { %264 = sbr.rel (%p261_p8) target bundleno = 1901 (0x76d), region = 44  ;;  %s1206_s18 = smov (!%p261_p8), 96  }
  0x17   : > { %s1207_s19 = smov (!%p261_p8), 120   ;;  %s1208_s20 = smov (!%p261_p8), 112  }
  0x18   : > { %s1209_s21 = smov (!%p261_p8), 104   ;;  %s1210_s22 = smov (!%p261_p8), 88  }
  0x19   : > { %s1211_s23 = smov (!%p261_p8), 72   ;;  %s1212_s24 = smov (!%p261_p8), 80  }
  0x1a   : > { %s1213_s27 = smov (!%p261_p8), 8   ;;  %s1215_s11 = smov (!%p261_p8), 24  }
  0x1b   : > { %v1204_v0 = vmov 0.0   ;;  %vm1205_vm0 = vmmov 0   ;;  %s306_s9 = scalar_select %p305_p9, %s1193_s29, 1  ;;  %vm339_vm1 = vcmask 64512   ;;  %v334_v4 = vlaneseq }
  0x1c   : > { %1050 = vmatprep.subr.bf16.mxu0 %v1204_v0  ;;  %1052 = vmatprep.mubr.msk.bf16.mxu0 %vm1205_vm0, %v1204_v0  ;;  %v337_v6 = vstv %s336_s17  ;;  %vm408_vm3 = vcmask 1043456   ;;  %vm804_vm4 = vcmask 130048   ;;  %vm806_vm5 = vcmask 195584  }
  0x1d   : > { %1056 = vmatprep.subr.bf16.mxu1 %v1204_v0  ;;  %1058 = vmatprep.mubr.msk.bf16.mxu1 %vm1205_vm0, %v1204_v0  ;;  %s1283_s10 = sshll.u32 %s306_s9, 2  ;;  %v335_v5 = vand.u32 127, %v334_v4  ;;  %s1214_s9 = smov 16   ;;  %vm825_vm6 = vcmask 261120   ;;  %vm902_vm7 = vcmask 257024  }
  0x1e   : > { %s315_s13 = scalar_lea.vmem %s1398_s2, %s1283_s10  ;;  %s311_s16 = scalar_lea.vmem %s1397_s1, %s1283_s10 }
  0x1f   : > { %v333_v1 = vld [vmem:[%s315_s13] sm:$0xf]  ;;  %vm1298_vm2 = vcmp.lt.s32.totalorder %v335_v5, %v337_v6  ;;  %s322_s14 = scalar_lea.vmem %s1399_s3, %s1283_s10 }
  0x20   : > { %v344_v2 = vsel %vm339_vm1, %v333_v1, 0  ;;  %v332_v3 = vld [vmem:[%s311_s16] sm:$0xf]  ;;  %v1305_v15 = vcombine.low %v333_v1, %v333_v1 }
  0x21   : > { %1051 = vmatpush3.bf16.xpose.msra.mxu0 %v344_v2  ;;  %v1017_v16 = vcombine.low %v332_v3, %v332_v3 }
  0x22   : > { %1068 = vmatprep.subr.bf16.mxu0 %v1204_v0  ;;  %403 = vrot.lane.b32.xlu1 %v1305_v15, %s1206_s18 }
  0x26   : > { %457 = vrot.lane.b32.xlu1 %v1305_v15, %s1207_s19 }
  0x28   : > { %1053 = vmatmul.mubr.msk.bf16.vlgmr.msra.gmra.mxu0 %vm339_vm1, %v332_v3 }
  0x29   : > { %1070 = vmatprep.mubr.msk.bf16.mxu0 %vm1205_vm0, %v1204_v0 }
  0x2a   : > { %569 = vrot.lane.b32.xlu1 %v1305_v15, %s1208_s20 }
  0x2e   : > { %567 = vrot.lane.b32.xlu1 %v1017_v16, %s1208_s20 }
  0x32   : > { %681 = vrot.lane.b32.xlu1 %v1305_v15, %s1209_s21 }
  0x36   : > { %679 = vrot.lane.b32.xlu1 %v1017_v16, %s1209_s21  ;;  %s329_s21 = scalar_lea.vmem %s1403_s7, %s1283_s10 }
  0x94   : > { %v404_v22 = vpop.permute.xlu1 %403 }
  0x95   : > { %v410_v23 = vsel %vm408_vm3, %v404_v22, 0 }
  0x96   : > { %1057 = vmatpush3.bf16.msra.mxu1 %v410_v23 }
  0x97   : > { %1062 = vmatprep.subr.bf16.mxu1 %v1204_v0 }
  0x98   : > { %v458_v26 = vpop.permute.xlu1 %457 }
  0x99   : > { %v463_v28 = vsel %vm339_vm1, %v458_v26, 0 }
  0x9c   : > { %v570_v30 = vpop.permute.xlu1 %569 }
  0x9d   : > { %v575_v33 = vsel %vm339_vm1, %v570_v30, 0 }
  0xa0   : > { %v568_v32 = vpop.permute.xlu1 %567 }
  0xa4   : > { %v682_v34 = vpop.permute.xlu1 %681 }
  0xa5   : > { %v687_v35 = vsel %vm339_vm1, %v682_v34, 0 }
  0xa8   : > { %v680_v36 = vpop.permute.xlu1 %679 }
  0xe8   : > { %v380_v7 = vpop.f32.mrf.mxu0 }
  0xe9   : > { %v386_v9 = vmul.f32 0.35355338, %v380_v7 }
  0xea   : > { %v1054_v10 = vpop.f32.mrf.mxu0 }
  0xeb   : > { %v387_v11 = vsel %vm1298_vm2, %v386_v9, -1000000.0 }
  0xec   : > { %v383_v12 = vpop.f32.mrf.mxu0  ;;  %v388_v13 = vsel %vm339_vm1, %v387_v11, -inf }
  0xed   : > { %389 = vmax.xlane.f32.xlu0 %v388_v13 }
  0xee   : > { %v1055_v14 = vpop.f32.mrf.mxu0 }
 0x176   : > { %v390_v17 = vpop.xlane.xlu0 %389 }
 0x177   : > { %v391_v18 = vsub.f32 %v387_v11, %v390_v17 }
 0x179   : > { %v392_v19 = vmul.f32 1.442695, %v391_v18 }
 0x17b   : > { %1147 = vpow2.f32 %v392_v19 }
 0x188   : > { %v1148_v20 = vpop.eup %1147 }
 0x189   : > { %v394_v21 = vsel %vm339_vm1, %v1148_v20, 0.0 }
 0x18a   : > { %395 = vadd.xlane.f32.xlu0 %v394_v21 }
 0x1a0   : > { %455 = vrot.lane.b32.xlu0 %v1017_v16, %s1207_s19 }
 0x213   : > { %v396_v24 = vpop.xlane.xlu0 %395 }
 0x214   : > { %1149 = vrcp.f32 %v396_v24 }
 0x217   : > { %v456_v31 = vpop.permute.xlu0 %455 }
 0x221   : > { %v1150_v25 = vpop.eup %1149 }
 0x222   : > { %v398_v27 = vmul.f32 %v1150_v25, %v1148_v20 }
 0x224   : > { %v399_v29 = vpack.c.bf16 %v398_v27, %v398_v27 }
 0x226   : > { %1059 = vmatmul.mubr.msk.bf16.vlgmr.msra.gmra.mxu1 %vm339_vm1, %v399_v29 }
 0x227   : > { %1063 = vmatpush3.bf16.xpose.msra.mxu1 %v463_v28  ;;  %1064 = vmatprep.mubr.msk.bf16.mxu1 %vm1205_vm0, %v1204_v0 }
 0x228   : > { %1074 = vmatprep.subr.bf16.mxu1 %v1204_v0 }
 0x22e   : > { %1065 = vmatmul.mubr.msk.bf16.vlgmr.msra.gmra.mxu1 %vm339_vm1, %v456_v31 }
 0x22f   : > { %1075 = vmatpush3.bf16.xpose.msra.mxu1 %v575_v33  ;;  %1076 = vmatprep.mubr.msk.bf16.mxu1 %vm1205_vm0, %v1204_v0 }
 0x230   : > { %1086 = vmatprep.subr.bf16.mxu1 %v1204_v0 }
 0x236   : > { %1077 = vmatmul.mubr.msk.bf16.vlgmr.msra.gmra.mxu1 %vm339_vm1, %v568_v32  ;;  %v1145_v32 = vld [vmem:[%s1400_s4 + $0x8] sm:$0xff]  }
 0x237   : > { %1087 = vmatpush3.bf16.xpose.msra.mxu1 %v687_v35  ;;  %1088 = vmatprep.mubr.msk.bf16.mxu1 %vm1205_vm0, %v1204_v0  ;;  %v1146_v35 = vld [vmem:[%s1400_s4] sm:$0xff]  }
 0x238   : > { %1098 = vmatprep.subr.bf16.mxu1 %v1204_v0 }
 0x23e   : > { %1089 = vmatmul.mubr.msk.bf16.vlgmr.msra.gmra.mxu1 %vm339_vm1, %v680_v36 }
 0x23f   : > { %1102 = vmatprep.mubr.msk.bf16.mxu1 %vm1205_vm0, %v1204_v0  ;;  %1099 = vmatpush3.bf16.msra.mxu1 %v1145_v32 }
 0x240   : > { %1100 = vmatprep.subr.bf16.mxu1 %v1204_v0 }
 0x243   : > { %1101 = vmatpush3.bf16.msra.mxu1 %v1146_v35 }
 0x2e6   : > { %v1332_v37 = vpop.f32.mrf.mxu1 }
 0x2e8   : > { %v1060_v38 = vpop.f32.mrf.mxu1 }
 0x2ea   : > { %v449_v39 = vpop.f32.mrf.mxu1 }
 0x2ec   : > { %v1061_v40 = vpop.f32.mrf.mxu1 }
 0x2ee   : > { %v499_v41 = vpop.f32.mrf.mxu1 }
 0x2ef   : > { %v505_v42 = vmul.f32 0.35355338, %v499_v41 }
 0x2f0   : > { %v1066_v43 = vpop.f32.mrf.mxu1 }
 0x2f1   : > { %v506_v44 = vsel %vm1298_vm2, %v505_v42, -1000000.0 }
 0x2f2   : > { %v502_v45 = vpop.f32.mrf.mxu1  ;;  %v507_v46 = vsel %vm339_vm1, %v506_v44, -inf }
 0x2f3   : > { %508 = vmax.xlane.f32.xlu1 %v507_v46 }
 0x2f4   : > { %v1067_v47 = vpop.f32.mrf.mxu1 }
 0x2f6   : > { %v611_v48 = vpop.f32.mrf.mxu1 }
 0x2f7   : > { %v617_v49 = vmul.f32 0.35355338, %v611_v48 }
 0x2f8   : > { %v1078_v50 = vpop.f32.mrf.mxu1 }
 0x2f9   : > { %v618_v51 = vsel %vm1298_vm2, %v617_v49, -1000000.0 }
 0x2fa   : > { %v614_v52 = vpop.f32.mrf.mxu1  ;;  %v619_v53 = vsel %vm339_vm1, %v618_v51, -inf }
 0x2fb   : > { %620 = vmax.xlane.f32.xlu0 %v619_v53  ;;  %v331_v53 = vld [vmem:[%s322_s14] sm:$0xf] }
 0x2fc   : > { %v1079_v54 = vpop.f32.mrf.mxu1 }
 0x2fd   : > { %v869_v54 = vunpack.c.l.bf16 %v331_v53 }
 0x2fe   : > { %v723_v55 = vpop.f32.mrf.mxu1 }
 0x2ff   : > { %v729_v56 = vmul.f32 0.35355338, %v723_v55 }
 0x300   : > { %v1090_v57 = vpop.f32.mrf.mxu1 }
 0x301   : > { %v730_v58 = vsel %vm1298_vm2, %v729_v56, -1000000.0 }
 0x302   : > { %v726_v59 = vpop.f32.mrf.mxu1  ;;  %v731_v60 = vsel %vm339_vm1, %v730_v58, -inf }
 0x303   : > { %732 = vmax.xlane.f32.xlu1 %v731_v60 }
 0x304   : > { %v1091_v61 = vpop.f32.mrf.mxu1 }
 0x314   : > { %519 = vrot.lane.b32.xlu1 %v1305_v15, %s1210_s22 }
 0x37c   : > { %v509_v62 = vpop.xlane.xlu1 %508 }
 0x37d   : > { %v510_v63 = vsub.f32 %v506_v44, %v509_v62 }
 0x37f   : > { %v511_v1 = vmul.f32 1.442695, %v510_v63 }
 0x381   : > { %1151 = vpow2.f32 %v511_v1 }
 0x384   : > { %v621_v2 = vpop.xlane.xlu0 %620 }
 0x385   : > { %v622_v3 = vsub.f32 %v618_v51, %v621_v2 }
 0x387   : > { %v623_v4 = vmul.f32 1.442695, %v622_v3 }
 0x389   : > { %1153 = vpow2.f32 %v623_v4 }
 0x38c   : > { %v733_v5 = vpop.xlane.xlu1 %732 }
 0x38d   : > { %v734_v6 = vsub.f32 %v730_v58, %v733_v5 }
 0x38e   : > { %v1152_v7 = vpop.eup %1151 }
 0x38f   : > { %v735_v8 = vmul.f32 1.442695, %v734_v6  ;;  %v513_v9 = vsel %vm339_vm1, %v1152_v7, 0.0  ;;  %v1027_v6 = vld [vmem:[%s1401_s5] ss:$0 sm:$0xff] }
 0x390   : > { %514 = vadd.xlane.f32.xlu0 %v513_v9  ;;  %v520_v10 = vpop.permute.xlu1 %519 }
 0x391   : > { %1155 = vpow2.f32 %v735_v8  ;;  %v525_v11 = vsel %vm408_vm3, %v520_v10, 0  ;;  %v1028_v8 = vld [vmem:[%s1402_s6] ss:$0 sm:$0xff] }
 0x392   : > { %1069 = vmatpush3.bf16.msra.mxu0 %v525_v11 }
 0x393   : > { %1080 = vmatprep.subr.bf16.mxu0 %v1204_v0 }
 0x396   : > { %v1154_v12 = vpop.eup %1153 }
 0x397   : > { %v625_v13 = vsel %vm339_vm1, %v1154_v12, 0.0 }
 0x398   : > { %626 = vadd.xlane.f32.xlu1 %v625_v13 }
 0x39e   : > { %v1156_v14 = vpop.eup %1155 }
 0x39f   : > { %v737_v16 = vsel %vm339_vm1, %v1156_v14, 0.0 }
 0x3a0   : > { %738 = vadd.xlane.f32.xlu0 %v737_v16 }
 0x3a9   : > { %743 = vrot.lane.b32.xlu1 %v1305_v15, %s1211_s23 }
 0x3b6   : > { %631 = vrot.lane.b32.xlu0 %v1305_v15, %s1212_s24 }
 0x419   : > { %v515_v17 = vpop.xlane.xlu0 %514 }
 0x41a   : > { %1157 = vrcp.f32 %v515_v17 }
 0x421   : > { %v627_v18 = vpop.xlane.xlu1 %626 }
 0x422   : > { %1159 = vrcp.f32 %v627_v18 }
 0x425   : > { %v744_v15 = vpop.permute.xlu1 %743 }
 0x426   : > { %v749_v28 = vsel %vm408_vm3, %v744_v15, 0 }
 0x427   : > { %v1158_v19 = vpop.eup %1157 }
 0x428   : > { %v517_v20 = vmul.f32 %v1158_v19, %v1152_v7 }
 0x429   : > { %v739_v21 = vpop.xlane.xlu0 %738 }
 0x42a   : > { %1161 = vrcp.f32 %v739_v21  ;;  %v518_v22 = vpack.c.bf16 %v517_v20, %v517_v20 }
 0x42c   : > { %1071 = vmatmul.mubr.msk.bf16.vlgmr.msra.gmra.mxu0 %vm339_vm1, %v518_v22 }
 0x42d   : > { %v632_v23 = vpop.permute.xlu0 %631  ;;  %1082 = vmatprep.mubr.msk.bf16.mxu0 %vm1205_vm0, %v1204_v0 }
 0x42e   : > { %v637_v24 = vsel %vm408_vm3, %v632_v23, 0 }
 0x42f   : > { %v1160_v25 = vpop.eup %1159  ;;  %1081 = vmatpush3.bf16.msra.mxu0 %v637_v24 }
 0x430   : > { %v629_v26 = vmul.f32 %v1160_v25, %v1154_v12  ;;  %1092 = vmatprep.subr.bf16.mxu0 %v1204_v0 }
 0x432   : > { %v630_v27 = vpack.c.bf16 %v629_v26, %v629_v26 }
 0x434   : > { %1083 = vmatmul.mubr.msk.bf16.vlgmr.msra.gmra.mxu0 %vm339_vm1, %v630_v27 }
 0x435   : > { %1093 = vmatpush3.bf16.msra.mxu0 %v749_v28  ;;  %1094 = vmatprep.mubr.msk.bf16.mxu0 %vm1205_vm0, %v1204_v0 }
 0x437   : > { %v1162_v29 = vpop.eup %1161 }
 0x438   : > { %v741_v30 = vmul.f32 %v1162_v29, %v1156_v14 }
 0x43a   : > { %v742_v31 = vpack.c.bf16 %v741_v30, %v741_v30 }
 0x43c   : > { %1095 = vmatmul.mubr.msk.bf16.vlgmr.msra.gmra.mxu0 %vm339_vm1, %v742_v31 }
 0x4ec   : > { %v561_v33 = vpop.f32.mrf.mxu0 }
 0x4ed   : > { %792 = vrot.lane.b32.xlu1 %v561_v33, %s1213_s27 }
 0x4ee   : > { %v1072_v34 = vpop.f32.mrf.mxu0 }
 0x4f0   : > { %v564_v36 = vpop.f32.mrf.mxu0 }
 0x4f2   : > { %v1073_v38 = vpop.f32.mrf.mxu0 }
 0x4f4   : > { %v673_v39 = vpop.f32.mrf.mxu0 }
 0x4f5   : > { %796 = vrot.lane.b32.xlu0 %v673_v39, %s1214_s9 }
 0x4f6   : > { %v1084_v40 = vpop.f32.mrf.mxu0 }
 0x4f8   : > { %v676_v41 = vpop.f32.mrf.mxu0 }
 0x4fa   : > { %v1085_v42 = vpop.f32.mrf.mxu0 }
 0x4fc   : > { %v785_v43 = vpop.f32.mrf.mxu0 }
 0x4fd   : > { %800 = vrot.lane.b32.xlu1 %v785_v43, %s1215_s11 }
 0x4fe   : > { %v1096_v0 = vpop.f32.mrf.mxu0 }
 0x500   : > { %v788_v44 = vpop.f32.mrf.mxu0 }
 0x502   : > { %v1097_v45 = vpop.f32.mrf.mxu0 }
 0x55f   : > { %v793_v46 = vpop.permute.xlu1 %792 }
 0x560   : > { %v803_v48 = vsel %vm339_vm1, %v1332_v37, %v793_v46 }
 0x567   : > { %v797_v47 = vpop.permute.xlu0 %796 }
 0x568   : > { %v805_v49 = vsel %vm804_vm4, %v803_v48, %v797_v47 }
 0x56f   : > { %v801_v50 = vpop.permute.xlu1 %800 }
 0x570   : > { %v807_v51 = vsel %vm806_vm5, %v805_v49, %v801_v50 }
 0x571   : > { %v808_v52 = vpack.c.bf16 %v807_v51, %v807_v51 }
 0x573   : > { %1103 = vmatmul.mubr.msk.bf16.vlgmr.msra.gmra.mxu1 %vm825_vm6, %v808_v52 }
 0x633   : > { %v863_v55 = vpop.f32.mrf.mxu1 }
 0x634   : > { %v870_v56 = vadd.f32 %v869_v54, %v863_v55 }
 0x635   : > { %v1104_v57 = vpop.f32.mrf.mxu1 }
 0x636   : > { %v873_v58 = vsel %vm825_vm6, %v870_v56, 0.0 }
 0x637   : > { %874 = vadd.xlane.f32.xlu0 %v873_v58  ;;  %v866_v37 = vpop.f32.mrf.mxu1 }
 0x639   : > { %v1105_v59 = vpop.f32.mrf.mxu1 }
 0x6c0   : > { %v875_v60 = vpop.xlane.xlu0 %874 }
 0x6c1   : > { %v877_v61 = vmul.f32 0.03125, %v875_v60 }
 0x6c3   : > { %v878_v62 = vsub.f32 %v870_v56, %v877_v61 }
 0x6c5   : > { %v879_v63 = vmul.f32 %v878_v62, %v878_v62 }
 0x6c7   : > { %v880_v1 = vsel %vm825_vm6, %v879_v63, 0.0 }
 0x6c8   : > { %881 = vadd.xlane.f32.xlu1 %v880_v1 }
 0x751   : > { %v882_v2 = vpop.xlane.xlu1 %881 }
 0x752   : > { %v883_v3 = vmul.f32 0.03125, %v882_v2 }
 0x754   : > { %v884_v4 = vadd.f32 1e-05, %v883_v3 }
 0x756   : > { %1163 = vrsqrt.f32 %v884_v4 }
 0x763   : > { %v1164_v5 = vpop.eup %1163 }
 0x764   : > { %v886_v7 = vmul.f32 %v1164_v5, %v878_v62 }
 0x766   : > { %v893_v9 = vmul.f32 %v1027_v6, %v886_v7 }
 0x768   : > { %v900_v10 = vadd.f32 %v1028_v8, %v893_v9 }
 0x76a   : > { %v901_v11 = vpack.c.bf16 %v900_v10, %v900_v10 }
 0x76c   : > { %903 = vst.msk [vmem:[%s329_s21] sm:$0xf] %vm902_vm7, %v901_v11 }
 0x76d PF: > { %s23_s8 = sadd.s32 1, %s1201_s8   ;;  %s1406_s29 = smov %s1197_s30 }
 0x76e   : > { %p20_p10 = scmp.ge.s32.totalorder %s23_s8, 4   ;;  %s1407_s30 = smov %s1409_s0 }
 0x770   :  { %22 = sbr.rel (!%p20_p10) target bundleno = 17 (0x11), region = 80 }

</bundles_post_ra>
